<compile_context>
chip_gen: v7x
topology: tpu7x:2x2x1
jax: 0.10.0
libtpu: 0.0.40
codegen_flags: <defaults>
</compile_context>

<pallas_src>
import functools

import jax
import jax.numpy as jnp
from jax import lax
from jax.experimental import pallas as pl
from jax.experimental.pallas import tpu as pltpu


def _eca_basic_block_kernel(x_ref, w1_ref, s1_ref, b1_ref,
                            w2_ref, s2_ref, b2_ref, we_ref,
                            o_ref,
                            *, H, W, C, k_size, mm_dtype):
    f32 = jnp.float32
    HW = H * W

    def conv3x3(img, wmat_ref):
        # Zero-pad H (leading dim) and W (sublane dim) by concatenating tiny
        # constant borders -- no padded scratch, no O(H*W*C) zero stores.
        zr = jnp.zeros((1, W, C), f32)
        zc = jnp.zeros((H + 2, 1, C), f32)
        xp = jnp.concatenate([zr, img, zr], axis=0)             # (H+2, W,   C)
        xp = jnp.concatenate([zc, xp, zc], axis=1)              # (H+2, W+2, C)
        # im2col: the 9 shifted windows fused along the contraction axis ->
        # one fat MXU matmul.  Taps are cast to bf16 at extraction so the big
        # (H*W, 9*C) patch never exists in f32.
        taps = [xp[ky:ky + H, kx:kx + W, :].astype(mm_dtype)
                for ky in range(3) for kx in range(3)]
        patch = jnp.concatenate(taps, axis=-1).reshape(HW, 9 * C)
        return jnp.dot(patch, wmat_ref[...], preferred_element_type=f32)

    # ---- conv1 -> folded BN1 -> ReLU ----
    # Input block is channel-major (C, H*W); transpose on-chip to (H*W, C).
    x_img = x_ref[0].T.reshape(H, W, C)                          # (H, W, C) f32
    h1 = jnp.maximum(conv3x3(x_img, w1_ref) * s1_ref[...] + b1_ref[...], 0.0)

    # ---- conv2 -> folded BN2 ----
    h2 = conv3x3(h1.reshape(H, W, C), w2_ref) * s2_ref[...] + b2_ref[...]  # (HW, C)

    # ---- ECA: global avg pool + k-tap 1D channel conv + sigmoid ----
    # The channel conv is k shifted slices of the pooled vector times scalar
    # taps (VPU FMAs) -- no (C, C) matmul on the serial critical path.
    m = jnp.sum(h2, axis=0, keepdims=True) * (1.0 / HW)          # (1, C)
    pad = (k_size - 1) // 2
    if pad > 0:
        zp = jnp.zeros((1, pad), f32)
        m_pad = jnp.concatenate([zp, m, zp], axis=-1)            # (1, C + 2*pad)
    else:
        m_pad = m
    z = jnp.zeros((1, C), f32)
    for j in range(k_size):
        z = z + m_pad[:, j:j + C] * we_ref[:, j:j + 1]
    attn = 1.0 / (1.0 + jnp.exp(-z))                             # sigmoid, (1, C)

    # ---- gate, residual add (downsample is None), ReLU ----
    # Residual re-derived from the resident input block instead of keeping a
    # full f32 copy alive across both conv matmuls.
    res = x_ref[0].T                                             # (HW, C) f32
    out = jnp.maximum(h2 * attn + res, 0.0)                      # (HW, C) f32
    # Channel-major store: last dim is H*W -> unmasked, lane-dense stores and a
    # dense output DMA.
    o_ref[0] = out.T.astype(o_ref.dtype)                         # (C, H*W)


def _pick_vmem_limit():
    # ~96 MiB on 128-MiB-VMEM chips (v5e/v6e), ~48 MiB on v7x (64 MiB physical);
    # conservative 32 MiB fallback if the query is unavailable.
    try:
        cap = int(pltpu.get_tpu_info().vmem_capacity_bytes)
        if cap > 0:
            return min(96 * 1024 * 1024, (cap * 3) // 4)
    except Exception:
        pass
    return 32 * 1024 * 1024


def eca_basic_block(x_nchw, params, *, use_bf16=True):
    """x_nchw: (N, C, H, W) float32. Returns (N, C, H, W) float32."""
    w1, bn1_scale, bn1_bias, w2, bn2_scale, bn2_bias, w_eca = params
    N, C_in, H, W = x_nchw.shape
    C_out = w1.shape[0]
    assert C_in == C_out, "downsample is None -> inplanes must equal planes"
    HW = H * W
    mm_dtype = jnp.bfloat16 if use_bf16 else jnp.float32

    # Channel-major (N, C, H*W): a free, layout-preserving reshape of NCHW --
    # no HBM transpose in the wrapper; the kernel transposes on-chip.
    x = x_nchw.reshape(N, C_in, HW)

    # conv weights (Cout, Cin, 3, 3) -> im2col slab (9*Cin, Cout), tap-major.
    w1_r = jnp.transpose(w1, (2, 3, 1, 0)).reshape(9 * C_in, C_out).astype(mm_dtype)
    w2_r = jnp.transpose(w2, (2, 3, 1, 0)).reshape(9 * C_out, C_out).astype(mm_dtype)

    s1 = bn1_scale.reshape(1, C_out).astype(jnp.float32)
    b1 = bn1_bias.reshape(1, C_out).astype(jnp.float32)
    s2 = bn2_scale.reshape(1, C_out).astype(jnp.float32)
    b2 = bn2_bias.reshape(1, C_out).astype(jnp.float32)

    k_size = int(w_eca.shape[0])
    we = w_eca.reshape(1, k_size).astype(jnp.float32)

    kernel = functools.partial(_eca_basic_block_kernel, H=H, W=W, C=C_in,
                               k_size=k_size, mm_dtype=mm_dtype)

    const_map = lambda b: (0, 0)   # weights / BN / ECA params stay resident

    out_flat = pl.pallas_call(
        kernel,
        out_shape=jax.ShapeDtypeStruct((N, C_out, HW), x_nchw.dtype),
        grid_spec=pltpu.PrefetchScalarGridSpec(
            num_scalar_prefetch=0,
            grid=(N,),
            in_specs=[
                # activation: channel-major, lane-dense (H*W on lanes).
                pl.BlockSpec((1, C_in, HW), lambda b: (b, 0, 0)),
                pl.BlockSpec((9 * C_in, C_out), const_map),
                pl.BlockSpec((1, C_out), const_map),
                pl.BlockSpec((1, C_out), const_map),
                pl.BlockSpec((9 * C_out, C_out), const_map),
                pl.BlockSpec((1, C_out), const_map),
                pl.BlockSpec((1, C_out), const_map),
                pl.BlockSpec((1, k_size), const_map),
            ],
            out_specs=pl.BlockSpec((1, C_out, HW), lambda b: (b, 0, 0)),
        ),
        compiler_params=pltpu.CompilerParams(
            dimension_semantics=("parallel",),
            vmem_limit_bytes=_pick_vmem_limit(),
        ),
    )(x, w1_r, s1, b1, w2_r, s2, b2, we)

    return out_flat.reshape(N, C_out, H, W)


def _reference(x, params):
    """Pure-JAX NCHW reference mirroring the PyTorch forward (inference BN)."""
    w1, s1, b1, w2, s2, b2, weca = params

    def conv3x3(inp, w):
        return lax.conv_general_dilated(
            inp, w, window_strides=(1, 1), padding=((1, 1), (1, 1)),
            dimension_numbers=('NCHW', 'OIHW', 'NCHW'),
            precision=lax.Precision.HIGHEST)

    out = conv3x3(x, w1)
    out = out * s1[None, :, None, None] + b1[None, :, None, None]
    out = jnp.maximum(out, 0.0)
    out = conv3x3(out, w2)
    out = out * s2[None, :, None, None] + b2[None, :, None, None]
    m = jnp.mean(out, axis=(2, 3))                               # (N, C)
    m_pad = jnp.pad(m, ((0, 0), (1, 1)))
    z = weca[0] * m_pad[:, :-2] + weca[1] * m_pad[:, 1:-1] + weca[2] * m_pad[:, 2:]
    attn = jax.nn.sigmoid(z)[:, :, None, None]
    out = out * attn
    out = jnp.maximum(out + x, 0.0)
    return out


if __name__ == "__main__":
    N, C, H, W = 2, 4, 16, 16
    keys = jax.random.split(jax.random.PRNGKey(0), 12)

    x = jax.random.normal(keys[0], (N, C, H, W), jnp.float32)

    fan_in = 9 * C
    w1 = jax.random.normal(keys[1], (C, C, 3, 3), jnp.float32) * (2.0 / fan_in) ** 0.5
    w2 = jax.random.normal(keys[2], (C, C, 3, 3), jnp.float32) * (2.0 / fan_in) ** 0.5

    eps = 1e-5
    g1 = jax.random.uniform(keys[3], (C,), jnp.float32, 0.5, 1.5)
    be1 = jax.random.normal(keys[4], (C,), jnp.float32) * 0.1
    rm1 = jax.random.normal(keys[5], (C,), jnp.float32) * 0.1
    rv1 = jax.random.uniform(keys[6], (C,), jnp.float32, 0.5, 1.5)
    g2 = jax.random.uniform(keys[7], (C,), jnp.float32, 0.5, 1.5)
    be2 = jax.random.normal(keys[8], (C,), jnp.float32) * 0.1
    rm2 = jax.random.normal(keys[9], (C,), jnp.float32) * 0.1
    rv2 = jax.random.uniform(keys[10], (C,), jnp.float32, 0.5, 1.5)

    s1 = g1 / jnp.sqrt(rv1 + eps)
    b1 = be1 - rm1 * s1
    s2 = g2 / jnp.sqrt(rv2 + eps)
    b2 = be2 - rm2 * s2

    w_eca = jax.random.normal(keys[11], (3,), jnp.float32) * 0.5

    params = (w1, s1, b1, w2, s2, b2, w_eca)

    out = eca_basic_block(x, params)
    out = jax.block_until_ready(out)

    ref = _reference(x, params)
    assert out.shape == (N, C, H, W)
    # bf16 MXU inputs (f32 accumulation) -> compare against the f32 reference
    # with a bf16-appropriate tolerance.
    assert jnp.allclose(out, ref, atol=5e-2, rtol=5e-2), "mismatch vs JAX reference"

    print("KERNEL_OK")
</pallas_src>

<mosaic_0001>
module attributes {stable_mosaic.version = 11 : i64} {
  func.func @_eca_basic_block_kernel(%arg0: i32, %arg1: memref<1x4x256xf32, #tpu.memory_space<vmem>>, %arg2: memref<36x4xbf16, #tpu.memory_space<vmem>>, %arg3: memref<1x4xf32, #tpu.memory_space<vmem>>, %arg4: memref<1x4xf32, #tpu.memory_space<vmem>>, %arg5: memref<36x4xbf16, #tpu.memory_space<vmem>>, %arg6: memref<1x4xf32, #tpu.memory_space<vmem>>, %arg7: memref<1x4xf32, #tpu.memory_space<vmem>>, %arg8: memref<1x3xf32, #tpu.memory_space<vmem>>, %arg9: memref<1x4x256xf32, #tpu.memory_space<vmem>>) attributes {dimension_semantics = [#tpu.dimension_semantics<parallel>], iteration_bounds = array<i64: 2>, scalar_prefetch = 0 : i64, scratch_operands = 0 : i64, tpu.core_type = #tpu.core_type<tc>, window_params = [{transform_indices = @transform_0, window_bounds = array<i64: 1, 4, 256>}, {pipeline_mode = #tpu.pipeline_mode<synchronous>, transform_indices = @transform_1, window_bounds = array<i64: 36, 4>}, {pipeline_mode = #tpu.pipeline_mode<synchronous>, transform_indices = @transform_2, window_bounds = array<i64: 1, 4>}, {pipeline_mode = #tpu.pipeline_mode<synchronous>, transform_indices = @transform_3, window_bounds = array<i64: 1, 4>}, {pipeline_mode = #tpu.pipeline_mode<synchronous>, transform_indices = @transform_4, window_bounds = array<i64: 36, 4>}, {pipeline_mode = #tpu.pipeline_mode<synchronous>, transform_indices = @transform_5, window_bounds = array<i64: 1, 4>}, {pipeline_mode = #tpu.pipeline_mode<synchronous>, transform_indices = @transform_6, window_bounds = array<i64: 1, 4>}, {pipeline_mode = #tpu.pipeline_mode<synchronous>, transform_indices = @transform_7, window_bounds = array<i64: 1, 3>}, {transform_indices = @transform_8, window_bounds = array<i64: 1, 4, 256>}]} {
    %c0 = arith.constant 0 : index
    %c0_0 = arith.constant 0 : index
    %c0_1 = arith.constant 0 : index
    %0 = vector.load %arg1[%c0, %c0_0, %c0_1] : memref<1x4x256xf32, #tpu.memory_space<vmem>>, vector<1x4x256xf32>
    %1 = vector.shape_cast %0 : vector<1x4x256xf32> to vector<4x256xf32>
    %2 = tpu.transpose %1, [1, 0] : vector<4x256xf32> -> vector<256x4xf32>
    %3 = vector.shape_cast %2 : vector<256x4xf32> to vector<16x16x4xf32>
    %cst = arith.constant 0.000000e+00 : f32
    %4 = vector.broadcast %cst : f32 to vector<1x16x4xf32>
    %cst_2 = arith.constant 0.000000e+00 : f32
    %5 = vector.broadcast %cst_2 : f32 to vector<18x1x4xf32>
    %6 = tpu.concatenate %4, %3, %4 in 0 : vector<1x16x4xf32>, vector<16x16x4xf32>, vector<1x16x4xf32> -> vector<18x16x4xf32>
    %7 = tpu.concatenate %5, %6, %5 in 1 : vector<18x1x4xf32>, vector<18x16x4xf32>, vector<18x1x4xf32> -> vector<18x18x4xf32>
    %8 = vector.extract_strided_slice %7 {offsets = [0, 0, 0], sizes = [16, 16, 4], strides = [1, 1, 1]} : vector<18x18x4xf32> to vector<16x16x4xf32>
    %9 = arith.truncf %8 : vector<16x16x4xf32> to vector<16x16x4xbf16>
    %10 = vector.extract_strided_slice %7 {offsets = [0, 1, 0], sizes = [16, 16, 4], strides = [1, 1, 1]} : vector<18x18x4xf32> to vector<16x16x4xf32>
    %11 = arith.truncf %10 : vector<16x16x4xf32> to vector<16x16x4xbf16>
    %12 = vector.extract_strided_slice %7 {offsets = [0, 2, 0], sizes = [16, 16, 4], strides = [1, 1, 1]} : vector<18x18x4xf32> to vector<16x16x4xf32>
    %13 = arith.truncf %12 : vector<16x16x4xf32> to vector<16x16x4xbf16>
    %14 = vector.extract_strided_slice %7 {offsets = [1, 0, 0], sizes = [16, 16, 4], strides = [1, 1, 1]} : vector<18x18x4xf32> to vector<16x16x4xf32>
    %15 = arith.truncf %14 : vector<16x16x4xf32> to vector<16x16x4xbf16>
    %16 = vector.extract_strided_slice %7 {offsets = [1, 1, 0], sizes = [16, 16, 4], strides = [1, 1, 1]} : vector<18x18x4xf32> to vector<16x16x4xf32>
    %17 = arith.truncf %16 : vector<16x16x4xf32> to vector<16x16x4xbf16>
    %18 = vector.extract_strided_slice %7 {offsets = [1, 2, 0], sizes = [16, 16, 4], strides = [1, 1, 1]} : vector<18x18x4xf32> to vector<16x16x4xf32>
    %19 = arith.truncf %18 : vector<16x16x4xf32> to vector<16x16x4xbf16>
    %20 = vector.extract_strided_slice %7 {offsets = [2, 0, 0], sizes = [16, 16, 4], strides = [1, 1, 1]} : vector<18x18x4xf32> to vector<16x16x4xf32>
    %21 = arith.truncf %20 : vector<16x16x4xf32> to vector<16x16x4xbf16>
    %22 = vector.extract_strided_slice %7 {offsets = [2, 1, 0], sizes = [16, 16, 4], strides = [1, 1, 1]} : vector<18x18x4xf32> to vector<16x16x4xf32>
    %23 = arith.truncf %22 : vector<16x16x4xf32> to vector<16x16x4xbf16>
    %24 = vector.extract_strided_slice %7 {offsets = [2, 2, 0], sizes = [16, 16, 4], strides = [1, 1, 1]} : vector<18x18x4xf32> to vector<16x16x4xf32>
    %25 = arith.truncf %24 : vector<16x16x4xf32> to vector<16x16x4xbf16>
    %26 = tpu.concatenate %9, %11, %13, %15, %17, %19, %21, %23, %25 in 2 : vector<16x16x4xbf16>, vector<16x16x4xbf16>, vector<16x16x4xbf16>, vector<16x16x4xbf16>, vector<16x16x4xbf16>, vector<16x16x4xbf16>, vector<16x16x4xbf16>, vector<16x16x4xbf16>, vector<16x16x4xbf16> -> vector<16x16x36xbf16>
    %27 = vector.shape_cast %26 : vector<16x16x36xbf16> to vector<256x36xbf16>
    %c0_3 = arith.constant 0 : index
    %c0_4 = arith.constant 0 : index
    %28 = vector.load %arg2[%c0_3, %c0_4] : memref<36x4xbf16, #tpu.memory_space<vmem>>, vector<36x4xbf16>
    %cst_5 = arith.constant dense<0.000000e+00> : vector<256x4xf32>
    %29 = tpu.matmul %27, %28, %cst_5 {dimension_numbers = #tpu.dot_dimension_numbers<[1], [0], [0], [1], [0, 0, 1, 1], [], []>} : vector<256x36xbf16>, vector<36x4xbf16>, vector<256x4xf32> -> vector<256x4xf32>
    %c0_6 = arith.constant 0 : index
    %c0_7 = arith.constant 0 : index
    %30 = vector.load %arg3[%c0_6, %c0_7] : memref<1x4xf32, #tpu.memory_space<vmem>>, vector<1x4xf32>
    %31 = vector.broadcast %30 : vector<1x4xf32> to vector<256x4xf32>
    %32 = arith.mulf %29, %31 : vector<256x4xf32>
    %c0_8 = arith.constant 0 : index
    %c0_9 = arith.constant 0 : index
    %33 = vector.load %arg4[%c0_8, %c0_9] : memref<1x4xf32, #tpu.memory_space<vmem>>, vector<1x4xf32>
    %34 = vector.broadcast %33 : vector<1x4xf32> to vector<256x4xf32>
    %35 = arith.addf %32, %34 : vector<256x4xf32>
    %cst_10 = arith.constant 0.000000e+00 : f32
    %36 = vector.broadcast %cst_10 : f32 to vector<256x4xf32>
    %37 = arith.maximumf %35, %36 : vector<256x4xf32>
    %38 = vector.shape_cast %37 : vector<256x4xf32> to vector<16x16x4xf32>
    %cst_11 = arith.constant 0.000000e+00 : f32
    %39 = vector.broadcast %cst_11 : f32 to vector<1x16x4xf32>
    %cst_12 = arith.constant 0.000000e+00 : f32
    %40 = vector.broadcast %cst_12 : f32 to vector<18x1x4xf32>
    %41 = tpu.concatenate %39, %38, %39 in 0 : vector<1x16x4xf32>, vector<16x16x4xf32>, vector<1x16x4xf32> -> vector<18x16x4xf32>
    %42 = tpu.concatenate %40, %41, %40 in 1 : vector<18x1x4xf32>, vector<18x16x4xf32>, vector<18x1x4xf32> -> vector<18x18x4xf32>
    %43 = vector.extract_strided_slice %42 {offsets = [0, 0, 0], sizes = [16, 16, 4], strides = [1, 1, 1]} : vector<18x18x4xf32> to vector<16x16x4xf32>
    %44 = arith.truncf %43 : vector<16x16x4xf32> to vector<16x16x4xbf16>
    %45 = vector.extract_strided_slice %42 {offsets = [0, 1, 0], sizes = [16, 16, 4], strides = [1, 1, 1]} : vector<18x18x4xf32> to vector<16x16x4xf32>
    %46 = arith.truncf %45 : vector<16x16x4xf32> to vector<16x16x4xbf16>
    %47 = vector.extract_strided_slice %42 {offsets = [0, 2, 0], sizes = [16, 16, 4], strides = [1, 1, 1]} : vector<18x18x4xf32> to vector<16x16x4xf32>
    %48 = arith.truncf %47 : vector<16x16x4xf32> to vector<16x16x4xbf16>
    %49 = vector.extract_strided_slice %42 {offsets = [1, 0, 0], sizes = [16, 16, 4], strides = [1, 1, 1]} : vector<18x18x4xf32> to vector<16x16x4xf32>
    %50 = arith.truncf %49 : vector<16x16x4xf32> to vector<16x16x4xbf16>
    %51 = vector.extract_strided_slice %42 {offsets = [1, 1, 0], sizes = [16, 16, 4], strides = [1, 1, 1]} : vector<18x18x4xf32> to vector<16x16x4xf32>
    %52 = arith.truncf %51 : vector<16x16x4xf32> to vector<16x16x4xbf16>
    %53 = vector.extract_strided_slice %42 {offsets = [1, 2, 0], sizes = [16, 16, 4], strides = [1, 1, 1]} : vector<18x18x4xf32> to vector<16x16x4xf32>
    %54 = arith.truncf %53 : vector<16x16x4xf32> to vector<16x16x4xbf16>
    %55 = vector.extract_strided_slice %42 {offsets = [2, 0, 0], sizes = [16, 16, 4], strides = [1, 1, 1]} : vector<18x18x4xf32> to vector<16x16x4xf32>
    %56 = arith.truncf %55 : vector<16x16x4xf32> to vector<16x16x4xbf16>
    %57 = vector.extract_strided_slice %42 {offsets = [2, 1, 0], sizes = [16, 16, 4], strides = [1, 1, 1]} : vector<18x18x4xf32> to vector<16x16x4xf32>
    %58 = arith.truncf %57 : vector<16x16x4xf32> to vector<16x16x4xbf16>
    %59 = vector.extract_strided_slice %42 {offsets = [2, 2, 0], sizes = [16, 16, 4], strides = [1, 1, 1]} : vector<18x18x4xf32> to vector<16x16x4xf32>
    %60 = arith.truncf %59 : vector<16x16x4xf32> to vector<16x16x4xbf16>
    %61 = tpu.concatenate %44, %46, %48, %50, %52, %54, %56, %58, %60 in 2 : vector<16x16x4xbf16>, vector<16x16x4xbf16>, vector<16x16x4xbf16>, vector<16x16x4xbf16>, vector<16x16x4xbf16>, vector<16x16x4xbf16>, vector<16x16x4xbf16>, vector<16x16x4xbf16>, vector<16x16x4xbf16> -> vector<16x16x36xbf16>
    %62 = vector.shape_cast %61 : vector<16x16x36xbf16> to vector<256x36xbf16>
    %c0_13 = arith.constant 0 : index
    %c0_14 = arith.constant 0 : index
    %63 = vector.load %arg5[%c0_13, %c0_14] : memref<36x4xbf16, #tpu.memory_space<vmem>>, vector<36x4xbf16>
    %cst_15 = arith.constant dense<0.000000e+00> : vector<256x4xf32>
    %64 = tpu.matmul %62, %63, %cst_15 {dimension_numbers = #tpu.dot_dimension_numbers<[1], [0], [0], [1], [0, 0, 1, 1], [], []>} : vector<256x36xbf16>, vector<36x4xbf16>, vector<256x4xf32> -> vector<256x4xf32>
    %c0_16 = arith.constant 0 : index
    %c0_17 = arith.constant 0 : index
    %65 = vector.load %arg6[%c0_16, %c0_17] : memref<1x4xf32, #tpu.memory_space<vmem>>, vector<1x4xf32>
    %66 = vector.broadcast %65 : vector<1x4xf32> to vector<256x4xf32>
    %67 = arith.mulf %64, %66 : vector<256x4xf32>
    %c0_18 = arith.constant 0 : index
    %c0_19 = arith.constant 0 : index
    %68 = vector.load %arg7[%c0_18, %c0_19] : memref<1x4xf32, #tpu.memory_space<vmem>>, vector<1x4xf32>
    %69 = vector.broadcast %68 : vector<1x4xf32> to vector<256x4xf32>
    %70 = arith.addf %67, %69 : vector<256x4xf32>
    %cst_20 = arith.constant dense<0.000000e+00> : vector<4xf32>
    %71 = vector.multi_reduction <add>, %70, %cst_20 [0] : vector<256x4xf32> to vector<4xf32>
    %72 = vector.shape_cast %71 : vector<4xf32> to vector<1x4xf32>
    %cst_21 = arith.constant 3.906250e-03 : f32
    %73 = vector.broadcast %cst_21 : f32 to vector<1x4xf32>
    %74 = arith.mulf %72, %73 : vector<1x4xf32>
    %cst_22 = arith.constant 0.000000e+00 : f32
    %75 = vector.broadcast %cst_22 : f32 to vector<1x1xf32>
    %76 = tpu.concatenate %75, %74, %75 in 1 : vector<1x1xf32>, vector<1x4xf32>, vector<1x1xf32> -> vector<1x6xf32>
    %cst_23 = arith.constant 0.000000e+00 : f32
    %77 = vector.broadcast %cst_23 : f32 to vector<1x4xf32>
    %78 = vector.extract_strided_slice %76 {offsets = [0, 0], sizes = [1, 4], strides = [1, 1]} : vector<1x6xf32> to vector<1x4xf32>
    %c0_24 = arith.constant 0 : index
    %c0_25 = arith.constant 0 : index
    %79 = vector.load %arg8[%c0_24, %c0_25] : memref<1x3xf32, #tpu.memory_space<vmem>>, vector<1x1xf32>
    %80 = vector.broadcast %79 : vector<1x1xf32> to vector<1x4xf32>
    %81 = arith.mulf %78, %80 : vector<1x4xf32>
    %82 = arith.addf %77, %81 : vector<1x4xf32>
    %83 = vector.extract_strided_slice %76 {offsets = [0, 1], sizes = [1, 4], strides = [1, 1]} : vector<1x6xf32> to vector<1x4xf32>
    %c0_26 = arith.constant 0 : index
    %c1 = arith.constant 1 : index
    %84 = vector.load %arg8[%c0_26, %c1] : memref<1x3xf32, #tpu.memory_space<vmem>>, vector<1x1xf32>
    %85 = vector.broadcast %84 : vector<1x1xf32> to vector<1x4xf32>
    %86 = arith.mulf %83, %85 : vector<1x4xf32>
    %87 = arith.addf %82, %86 : vector<1x4xf32>
    %88 = vector.extract_strided_slice %76 {offsets = [0, 2], sizes = [1, 4], strides = [1, 1]} : vector<1x6xf32> to vector<1x4xf32>
    %c0_27 = arith.constant 0 : index
    %c2 = arith.constant 2 : index
    %89 = vector.load %arg8[%c0_27, %c2] : memref<1x3xf32, #tpu.memory_space<vmem>>, vector<1x1xf32>
    %90 = vector.broadcast %89 : vector<1x1xf32> to vector<1x4xf32>
    %91 = arith.mulf %88, %90 : vector<1x4xf32>
    %92 = arith.addf %87, %91 : vector<1x4xf32>
    %cst_28 = arith.constant 0.000000e+00 : f32
    %93 = vector.broadcast %cst_28 : f32 to vector<1x4xf32>
    %94 = arith.subf %93, %92 : vector<1x4xf32>
    %95 = math.exp %94 : vector<1x4xf32>
    %cst_29 = arith.constant 1.000000e+00 : f32
    %96 = vector.broadcast %cst_29 : f32 to vector<1x4xf32>
    %97 = arith.addf %96, %95 : vector<1x4xf32>
    %cst_30 = arith.constant 1.000000e+00 : f32
    %98 = vector.broadcast %cst_30 : f32 to vector<1x4xf32>
    %99 = arith.divf %98, %97 : vector<1x4xf32>
    %c0_31 = arith.constant 0 : index
    %c0_32 = arith.constant 0 : index
    %c0_33 = arith.constant 0 : index
    %100 = vector.load %arg1[%c0_31, %c0_32, %c0_33] : memref<1x4x256xf32, #tpu.memory_space<vmem>>, vector<1x4x256xf32>
    %101 = vector.shape_cast %100 : vector<1x4x256xf32> to vector<4x256xf32>
    %102 = tpu.transpose %101, [1, 0] : vector<4x256xf32> -> vector<256x4xf32>
    %103 = vector.broadcast %99 : vector<1x4xf32> to vector<256x4xf32>
    %104 = arith.mulf %70, %103 : vector<256x4xf32>
    %105 = arith.addf %104, %102 : vector<256x4xf32>
    %cst_34 = arith.constant 0.000000e+00 : f32
    %106 = vector.broadcast %cst_34 : f32 to vector<256x4xf32>
    %107 = arith.maximumf %105, %106 : vector<256x4xf32>
    %108 = tpu.transpose %107, [1, 0] : vector<256x4xf32> -> vector<4x256xf32>
    %c0_35 = arith.constant 0 : index
    %c0_36 = arith.constant 0 : index
    %c0_37 = arith.constant 0 : index
    %109 = vector.load %arg9[%c0_35, %c0_36, %c0_37] : memref<1x4x256xf32, #tpu.memory_space<vmem>>, vector<1x4x256xf32>
    %110 = vector.shape_cast %109 : vector<1x4x256xf32> to vector<4x256xf32>
    %111 = vector.shape_cast %108 : vector<4x256xf32> to vector<1x4x256xf32>
    tpu.vector_store %arg9[%c0_35, %c0_36, %c0_37], %111 {strides = array<i32>} : memref<1x4x256xf32, #tpu.memory_space<vmem>>, vector<1x4x256xf32>,
    return
  }
  func.func @transform_0(%arg0: i32) -> (i32, i32, i32) {
    %c0_i32 = arith.constant 0 : i32
    %c0_i32_0 = arith.constant 0 : i32
    %c0_i32_1 = arith.constant 0 : i32
    return %arg0, %c0_i32, %c0_i32_0 : i32, i32, i32
  }
  func.func @transform_1(%arg0: i32) -> (i32, i32) {
    %c0_i32 = arith.constant 0 : i32
    %c0_i32_0 = arith.constant 0 : i32
    %c0_i32_1 = arith.constant 0 : i32
    return %c0_i32, %c0_i32_0 : i32, i32
  }
  func.func @transform_2(%arg0: i32) -> (i32, i32) {
    %c0_i32 = arith.constant 0 : i32
    %c0_i32_0 = arith.constant 0 : i32
    %c0_i32_1 = arith.constant 0 : i32
    return %c0_i32, %c0_i32_0 : i32, i32
  }
  func.func @transform_3(%arg0: i32) -> (i32, i32) {
    %c0_i32 = arith.constant 0 : i32
    %c0_i32_0 = arith.constant 0 : i32
    %c0_i32_1 = arith.constant 0 : i32
    return %c0_i32, %c0_i32_0 : i32, i32
  }
  func.func @transform_4(%arg0: i32) -> (i32, i32) {
    %c0_i32 = arith.constant 0 : i32
    %c0_i32_0 = arith.constant 0 : i32
    %c0_i32_1 = arith.constant 0 : i32
    return %c0_i32, %c0_i32_0 : i32, i32
  }
  func.func @transform_5(%arg0: i32) -> (i32, i32) {
    %c0_i32 = arith.constant 0 : i32
    %c0_i32_0 = arith.constant 0 : i32
    %c0_i32_1 = arith.constant 0 : i32
    return %c0_i32, %c0_i32_0 : i32, i32
  }
  func.func @transform_6(%arg0: i32) -> (i32, i32) {
    %c0_i32 = arith.constant 0 : i32
    %c0_i32_0 = arith.constant 0 : i32
    %c0_i32_1 = arith.constant 0 : i32
    return %c0_i32, %c0_i32_0 : i32, i32
  }
  func.func @transform_7(%arg0: i32) -> (i32, i32) {
    %c0_i32 = arith.constant 0 : i32
    %c0_i32_0 = arith.constant 0 : i32
    %c0_i32_1 = arith.constant 0 : i32
    return %c0_i32, %c0_i32_0 : i32, i32
  }
  func.func @transform_8(%arg0: i32) -> (i32, i32, i32) {
    %c0_i32 = arith.constant 0 : i32
    %c0_i32_0 = arith.constant 0 : i32
    %c0_i32_1 = arith.constant 0 : i32
    return %arg0, %c0_i32, %c0_i32_0 : i32, i32, i32
  }
}

</mosaic_0001>

<bundles_post_ra>
// kernel: tpu_custom_call.1
= control target key start
LH: loop header
LB: loop body
LE: loop exit
PB: predicated region body
PF: predicated region fallthrough
CT: control target
= control target key end

     0   :  { %13 = vsyncpa [#allocation3], 0  ;;  %s5677_s0 = inlined_call_operand.vmem [shape: f32[2,4,256], index: 0, kind: input, shape index: {}]   ;;  %s5678_s1 = inlined_call_operand.vmem [shape: bf16[36,4], index: 1, kind: input, shape index: {}]   ;;  %s5679_s2 = inlined_call_operand.vmem [shape: f32[1,4], index: 2, kind: input, shape index: {}]   ;;  %s5680_s3 = inlined_call_operand.vmem [shape: f32[1,4], index: 3, kind: input, shape index: {}]   ;;  %s5681_s4 = inlined_call_operand.vmem [shape: bf16[36,4], index: 4, kind: input, shape index: {}]   ;;  %s5682_s5 = inlined_call_operand.vmem [shape: f32[1,4], index: 5, kind: input, shape index: {}]   ;;  %s5683_s6 = inlined_call_operand.vmem [shape: f32[1,4], index: 6, kind: input, shape index: {}]   ;;  %s5684_s7 = inlined_call_operand.vmem [shape: f32[1,3], index: 7, kind: input, shape index: {}]   ;;  %s5685_s8 = inlined_call_operand.hbm [shape: f32[2,4,256], index: 8, kind: output, shape index: {}]  }
   0x1   :  { %15 = vsyncpa [#allocation3 + $0x1], 0  ;;  %s3702_s27 = smov 0   ;;  %s3704_s28 = smov 0  }
   0x2   :  { %s3706_s29 = smov 0   ;;  %s3708_s30 = smov 0  }
   0x3 LB: > { %s3723_s9 = sadd.s32 4294967295, %s3639_s30   ;;  %s3334_s10 = sadd.s32 4294967294, %s3639_s30   ;;  %s3639_s30 = sphi %s3708_s30, %s5766_s30   ;;  %s3635_s29 = sphi %s3706_s29, %s5765_s29   ;;  %s3631_s28 = sphi %s3704_s28, %s5764_s28   ;;  %s3627_s27 = sphi %s3702_s27, %s5763_s27  }
   0x4   : > { %s3727_s11 = sadd.s32 1, %s3639_s30   ;;  %s201_s12 = sadd.s32 1, %s3635_s29 }
   0x5   : > { %s198_s13 = ssub.s32 %s3639_s30, %s3727_s11  ;;  %p211_p0 = scmp.ne.s32.totalorder %s3635_s29, %s3631_s28 }
   0x6   : > { %p199_p1 = scmp.eq.s32.totalorder %s198_s13, 0  ;;  %p212_p2 = scmp.eq.s32.totalorder %s3723_s9, 1 }
   0x7   : > { %p217_p3 = scmp.ne.s32.totalorder %s3631_s28, %s3627_s27  ;;  %p218_p4 = scmp.eq.s32.totalorder %s3334_s10, 1 }
   0x8   : > { %s3738_s14 = scalar_select %p199_p1, %s3635_s29, %s201_s12  }
   0x9   : > { %p3740_p5 = por %p212_p2, %p211_p0  ;;  %p3744_p6 = por %p218_p4, %p217_p3 }
   0xa   : > { %p3337_p7 = scmp.ge.s32.totalorder %s3639_s30, 1  ;;  %p265_p8 = scmp.lt.s32.totalorder %s3639_s30, 3 }
   0xc   : > { %p266_p9 = pnand %p3337_p7, %p265_p8 }
   0xe   : > { %269 = sbr.rel (%p266_p9) target bundleno = 1647 (0x66f), region = 52 }
  0x15   : > { %p299_p10 = scmp.lt.s32.totalorder %s3723_s9, 1  ;;  %vm406_vm0 = vcmask 1040384   ;;  %v3641_v0 = vmov 0.0   ;;  %vm832_vm1 = vcmask 1046528   ;;  %s3642_s22 = smov 8   ;;  %vm1439_vm3 = vcmask 1041408  }
  0x16   : > { %v407_v1 = vrot.slane %v3641_v0, 7  ;;  %vm575_vm2 = vsmask.f32 7424  ;;  %s3643_s23 = smov 4   ;;  %s3644_s24 = smov 12   ;;  %vm1122_vm4 = vcmask 31744  }
  0x17   : > { %s300_s17 = scalar_select %p299_p10, %s3723_s9, 1  ;;  %vm1155_vm5 = vcmask 64512   ;;  %vm1188_vm6 = vcmask 97280   ;;  %vm1221_vm7 = vcmask 130048   ;;  %vm1254_vm8 = vcmask 162816  }
  0x18   : > { %v507_v2 = vsel %vm406_vm0, 0.0, %v407_v1  ;;  %v524_v3 = vsel %vm406_vm0, %v407_v1, 0.0  ;;  %s3645_s25 = smov 20   ;;  %s3646_s26 = smov 16   ;;  %vm1287_vm9 = vcmask 195584   ;;  %vm1320_vm10 = vcmask 228352  }
  0x19   : > { %s3388_s18 = sshll.u32 %s300_s17, 3  ;;  %v3754_v4 = vpack.c.bf16 %v407_v1, %v507_v2  ;;  %v557_v5 = vpack.c.bf16 %v524_v3, %v524_v3  ;;  %s3647_s10 = smov 24   ;;  %vm1353_vm11 = vcmask 261120   ;;  %vm1406_vm12 = vcmask 293888  }
  0x1a   : > { %s303_s21 = scalar_lea.vmem %s5677_s0, %s3388_s18  ;;  %s3648_s12 = smov 32   ;;  %vm3041_vm13 = vcmask 7168   ;;  %vm3043_vm14 = vcmask 39936  }
  0x1b   : > { %v305_v6 = vld [vmem:[%s303_s21] sm:$0xff]  ;;  %v833_v7 = vrot.slane %v3754_v4, 1  ;;  %v834_v8 = vrot.slane %v557_v5, 1  ;;  %v577_v9 = vshrl.u32 %v3754_v4, 16  ;;  %v579_v10 = vshll.u32 %v3754_v4, 16  ;;  %s3649_s20 = smov 28  }
  0x1c   : > { %309 = vxpose.xlu0.b32.start.end [1/1] (short) %v305_v6, 128  ;;  %v584_v11 = vshll.u32 %v557_v5, 16  ;;  %v307_v17 = vcombine.high %v305_v6, %v305_v6  ;;  %s3655_s13 = smov 126   ;;  %s296_s17 = sand.u32 1, %s3631_s28  }
  0x1d   : > { %v3763_v12 = vsel %vm832_vm1, %v833_v7, %v834_v8  ;;  %v581_v13 = vrot.slane %v579_v10, 1  ;;  %s3338_s18 = sshll.u32 %s296_s17, 3  ;;  %s3389_s19 = sshll.u32 %s3723_s9, 7 }
  0x1e   : > { %881 = vrot.lane.b32.xlu1 %v3763_v12, %s3642_s22  ;;  %v586_v14 = vrot.slane %v584_v11, 1  ;;  %s298_s21 = scalar_lea.vmem [#allocation2], %s3338_s18  ;;  %s3656_s9 = smov [#allocation2]  }
  0x1f   : > { %v582_v15 = vor.u32 %v581_v13, %v577_v9 }
  0x21   : > { %v3768_v16 = vsel %vm575_vm2, %v582_v15, %v586_v14  ;;  %v3565_v14 = vld [vmem:[%s5678_s1] sm:$0xff]  }
  0x22   : > { %768 = vrot.lane.b32.xlu1 %v3768_v16, %s3643_s23  ;;  %3428 = vmatprep.subr.bf16.mxu0 %v3565_v14 }
  0x23   : > { %3429 = vmatpush3.bf16.msra.mxu0 %v3565_v14 }
  0x59   : > { %341 = vxpose.xlu0.b32.start.end [1/1] (short) %v307_v17, 128 }
  0x9c   : > { %v3772_v18 = vpop.trf.xlu0 }
  0x9d   : > { %v409_v19 = vrot.slane %v3772_v18, 7 }
  0x9f   : > { %v508_v22 = vsel %vm406_vm0, 0.0, %v409_v19 }
  0xa0   : > { %v3775_v20 = vpop.trf.xlu0 }
  0xa1   : > { %v410_v21 = vrot.slane %v3775_v20, 7 }
  0xa3   : > { %v411_v23 = vsel %vm406_vm0, %v409_v19, %v410_v21  ;;  %v525_v24 = vsel %vm406_vm0, %v410_v21, 0.0 }
  0xa4   : > { %v3781_v25 = vpack.c.bf16 %v411_v23, %v508_v22  ;;  %v558_v26 = vpack.c.bf16 %v525_v24, %v525_v24  ;;  %v3783_v27 = vpop.trf.xlu0  ;;  %v3566_v22 = vld [vmem:[%s5678_s1 + $0x8] sm:$0xff]  }
  0xa5   : > { %v412_v40 = vrot.slane %v3783_v27, 7  ;;  %3430 = vmatprep.subr.bf16.mxu0 %v3566_v22 }
  0xa6   : > { %914 = vrot.lane.b32.xlu1 %v3781_v25, %s3644_s24  ;;  %v836_v28 = vrot.slane %v3781_v25, 1  ;;  %v837_v29 = vrot.slane %v558_v26, 1  ;;  %v591_v30 = vshll.u32 %v3781_v25, 16  ;;  %v589_v34 = vshrl.u32 %v3781_v25, 16  ;;  %3431 = vmatpush3.bf16.msra.mxu0 %v3566_v22 }
  0xa7   : > { %v596_v35 = vshll.u32 %v558_v26, 16  ;;  %v509_v51 = vsel %vm406_vm0, 0.0, %v412_v40 }
  0xa8   : > { %v3789_v31 = vpop.trf.xlu0  ;;  %v838_v32 = vsel %vm832_vm1, %v836_v28, %v837_v29  ;;  %v593_v33 = vrot.slane %v591_v30, 1 }
  0xa9   : > { %v598_v39 = vrot.slane %v596_v35, 1  ;;  %v413_v42 = vrot.slane %v3789_v31, 7 }
  0xaa   : > { %883 = vrot.lane.b32.xlu1 %v838_v32, %s3642_s22  ;;  %v594_v38 = vor.u32 %v593_v33, %v589_v34 }
  0xab   : > { %v414_v52 = vsel %vm406_vm0, %v412_v40, %v413_v42  ;;  %v526_v53 = vsel %vm406_vm0, %v413_v42, 0.0 }
  0xac   : > { %v3794_v36 = vpop.trf.xlu0  ;;  %v599_v45 = vsel %vm575_vm2, %v594_v38, %v598_v39  ;;  %v3821_v57 = vpack.c.bf16 %v414_v52, %v509_v51  ;;  %v559_v61 = vpack.c.bf16 %v526_v53, %v526_v53 }
  0xad   : > { %5713 = vst [vmem:[#allocation5_spill] sm:$0xff] %v3794_v36  ;;  %v415_v37 = vrot.slane %v3794_v36, 7 }
  0xae   : > { %994 = vrot.lane.b32.xlu1 %v838_v32, %s3645_s25  ;;  %v839_v1 = vrot.slane %v3821_v57, 1  ;;  %v840_v2 = vrot.slane %v559_v61, 1  ;;  %v603_v3 = vshll.u32 %v3821_v57, 16  ;;  %v601_v7 = vshrl.u32 %v3821_v57, 16 }
  0xaf   : > { %v510_v43 = vsel %vm406_vm0, 0.0, %v415_v37  ;;  %v608_v9 = vshll.u32 %v559_v61, 16  ;;  %v3567_v32 = vld [vmem:[%s5678_s1 + $0x10] ss:$0 sps:$4 sm:$0x33]  }
  0xb0   : > { %v3799_v41 = vpop.trf.xlu0  ;;  %v3841_v6 = vsel %vm832_vm1, %v839_v1, %v840_v2  ;;  %v605_v8 = vrot.slane %v603_v3, 1  ;;  %3504 = vmatprep.subr.msk.bf16.mxu0 %vm1439_vm3, %v3567_v32  ;;  %v1441_v38 = vsel %vm1439_vm3, %v3567_v32, 0 }
  0xb1   : > { %5714 = vst [vmem:[#allocation6_spill] sm:$0xff] %v3799_v41  ;;  %v416_v44 = vrot.slane %v3799_v41, 7  ;;  %v610_v13 = vrot.slane %v608_v9, 1  ;;  %3433 = vmatpush3.bf16.msra.mxu0 %v1441_v38 }
  0xb2   : > { %770 = vrot.lane.b32.xlu1 %v599_v45, %s3643_s23  ;;  %v606_v11 = vor.u32 %v605_v8, %v601_v7 }
  0xb3   : > { %v417_v46 = vsel %vm406_vm0, %v415_v37, %v416_v44  ;;  %v527_v47 = vsel %vm406_vm0, %v416_v44, 0.0 }
  0xb4   : > { %v3808_v48 = vpack.c.bf16 %v417_v46, %v510_v43  ;;  %v3810_v49 = vpack.c.bf16 %v527_v47, %v527_v47  ;;  %v3812_v50 = vpop.trf.xlu0  ;;  %v611_v21 = vsel %vm575_vm2, %v606_v11, %v610_v13 }
  0xb5   : > { %5715 = vst [vmem:[#allocation7_spill] sm:$0xff] %v3812_v50 }
  0xb6   : > { %958 = vrot.lane.b32.xlu1 %v599_v45, %s3646_s26  ;;  %v613_v54 = vshrl.u32 %v3808_v48, 16  ;;  %v615_v55 = vshll.u32 %v3808_v48, 16  ;;  %v620_v56 = vshll.u32 %v3810_v49, 16  ;;  %v842_v46 = vrot.slane %v3808_v48, 1 }
  0xb7   : > { %v843_v47 = vrot.slane %v3810_v49, 1 }
  0xb8   : > { %v3823_v58 = vpop.trf.xlu0  ;;  %v617_v59 = vrot.slane %v615_v55, 1  ;;  %v622_v60 = vrot.slane %v620_v56, 1 }
  0xb9   : > { %5716 = vst [vmem:[#allocation8_spill] sm:$0xff] %v3823_v58 }
  0xba   : > { %916 = vrot.lane.b32.xlu1 %v3821_v57, %s3644_s24  ;;  %v618_v62 = vor.u32 %v617_v59, %v613_v54 }
  0xbc   : > { %v3827_v63 = vpop.trf.xlu0  ;;  %v3830_v0 = vsel %vm575_vm2, %v618_v62, %v622_v60  ;;  %v844_v62 = vsel %vm832_vm1, %v842_v46, %v843_v47 }
  0xbd   : > { %5717 = vst [vmem:[#allocation9_spill] sm:$0xff] %v3827_v63 }
  0xbe   : > { %1026 = vrot.lane.b32.xlu1 %v3821_v57, %s3647_s10  ;;  %774 = vrot.lane.b32.xlu0 %v3830_v0, %s3643_s23 }
  0xc0   : > { %v3838_v5 = vpop.trf.xlu0 }
  0xc1   : > { %5718 = vst [vmem:[#allocation10_spill] sm:$0xff] %v3838_v5 }
  0xc2   : > { %996 = vrot.lane.b32.xlu1 %v3841_v6, %s3645_s25 }
  0xc4   : > { %v3846_v10 = vpop.trf.xlu0 }
  0xc5   : > { %5719 = vst [vmem:[#allocation11_spill] sm:$0xff] %v3846_v10  ;;  %v424_v15 = vrot.slane %v3846_v10, 7 }
  0xc6   : > { %1090 = vrot.lane.b32.xlu1 %v3841_v6, %s3648_s12 }
  0xc7   : > { %v513_v23 = vsel %vm406_vm0, 0.0, %v424_v15 }
  0xc8   : > { %v3854_v17 = vpop.trf.xlu0 }
  0xc9   : > { %5720 = vst [vmem:[#allocation12_spill] sm:$0xff] %v3854_v17  ;;  %v425_v19 = vrot.slane %v3854_v17, 7 }
  0xca   : > { %960 = vrot.lane.b32.xlu1 %v611_v21, %s3646_s26 }
  0xcb   : > { %v426_v24 = vsel %vm406_vm0, %v424_v15, %v425_v19  ;;  %v530_v29 = vsel %vm406_vm0, %v425_v19, 0.0 }
  0xcc   : > { %v3864_v26 = vpop.trf.xlu0  ;;  %v3868_v30 = vpack.c.bf16 %v426_v24, %v513_v23  ;;  %v3876_v34 = vpack.c.bf16 %v530_v29, %v530_v29 }
  0xcd   : > { %5721 = vst [vmem:[#allocation13_spill] sm:$0xff] %v3864_v26  ;;  %v427_v28 = vrot.slane %v3864_v26, 7 }
  0xce   : > { %1058 = vrot.lane.b32.xlu1 %v611_v21, %s3649_s20  ;;  %v651_v39 = vshll.u32 %v3868_v30, 16  ;;  %v649_v51 = vshrl.u32 %v3868_v30, 16  ;;  %v656_v52 = vshll.u32 %v3876_v34, 16  ;;  %v851_v41 = vrot.slane %v3868_v30, 1 }
  0xcf   : > { %v514_v35 = vsel %vm406_vm0, 0.0, %v427_v28 }
  0xd0   : > { %v3874_v33 = vpop.trf.xlu0  ;;  %v653_v56 = vrot.slane %v651_v39, 1  ;;  %v658_v7 = vrot.slane %v656_v52, 1  ;;  %v419_v52 = vrot.slane %v3823_v58, 7 }
  0xd1   : > { %5722 = vst [vmem:[#allocation14_spill] sm:$0xff] %v3874_v33  ;;  %v428_v37 = vrot.slane %v3874_v33, 7 }
  0xd2   : > { %772 = vrot.lane.b32.xlu1 %v611_v21, %s3643_s23  ;;  %v654_v3 = vor.u32 %v653_v56, %v649_v51  ;;  %v418_v51 = vrot.slane %v3812_v50, 7 }
  0xd3   : > { %v429_v40 = vsel %vm406_vm0, %v427_v28, %v428_v37  ;;  %v531_v42 = vsel %vm406_vm0, %v428_v37, 0.0 }
  0xd4   : > { %v3886_v43 = vpack.c.bf16 %v429_v40, %v514_v35  ;;  %v564_v44 = vpack.c.bf16 %v531_v42, %v531_v42  ;;  %v3888_v45 = vpop.trf.xlu0  ;;  %v3918_v14 = vsel %vm575_vm2, %v654_v3, %v658_v7 }
  0xd5   : > { %5723 = vst [vmem:[#allocation15_spill] sm:$0xff] %v3888_v45  ;;  %v430_v59 = vrot.slane %v3888_v45, 7 }
  0xd6   : > { %1028 = vrot.lane.b32.xlu1 %v3808_v48, %s3647_s10  ;;  %1036 = vrot.lane.b32.xlu0 %v3886_v43, %s3647_s10  ;;  %v661_v53 = vshrl.u32 %v3886_v43, 16  ;;  %v663_v54 = vshll.u32 %v3886_v43, 16  ;;  %v668_v55 = vshll.u32 %v564_v44, 16  ;;  %v854_v23 = vrot.slane %v3886_v43, 1 }
  0xd7   : > { %v515_v8 = vsel %vm406_vm0, 0.0, %v430_v59  ;;  %v855_v24 = vrot.slane %v564_v44, 1 }
  0xd8   : > { %v665_v60 = vrot.slane %v663_v54, 1  ;;  %v670_v49 = vrot.slane %v668_v55, 1  ;;  %v3901_v61 = vpop.trf.xlu0 }
  0xd9   : > { %5724 = vst [vmem:[#allocation16_spill] sm:$0xff] %v3901_v61  ;;  %v431_v1 = vrot.slane %v3901_v61, 7  ;;  %v3937_v35 = vsel %vm832_vm1, %v854_v23, %v855_v24 }
  0xda   : > { %1092 = vrot.lane.b32.xlu1 %v844_v62, %s3648_s12  ;;  %v666_v2 = vor.u32 %v665_v60, %v661_v53 }
  0xdb   : > { %v432_v9 = vsel %vm406_vm0, %v430_v59, %v431_v1  ;;  %v532_v19 = vsel %vm406_vm0, %v431_v1, 0.0  ;;  %v420_v1 = vsel %vm406_vm0, %v418_v51, %v419_v52 }
  0xdc   : > { %v3909_v11 = vsel %vm575_vm2, %v666_v2, %v670_v49  ;;  %v3911_v13 = vpop.trf.xlu0  ;;  %v3920_v15 = vpack.c.bf16 %v432_v9, %v515_v8  ;;  %v565_v22 = vpack.c.bf16 %v532_v19, %v532_v19  ;;  %v511_v49 = vsel %vm406_vm0, 0.0, %v418_v51 }
  0xdd   : > { %1068 = vrot.lane.b32.xlu0 %v3909_v11, %s3649_s20  ;;  %v433_v29 = vrot.slane %v3911_v13, 7  ;;  %v528_v2 = vsel %vm406_vm0, %v419_v52, 0.0  ;;  %v3972_v9 = vpack.c.bf16 %v420_v1, %v511_v49 }
  0xde   : > { %1060 = vrot.lane.b32.xlu1 %v3830_v0, %s3649_s20  ;;  %v675_v28 = vshll.u32 %v3920_v15, 16  ;;  %v680_v38 = vshll.u32 %v565_v22, 16  ;;  %v857_v53 = vrot.slane %v3920_v15, 1  ;;  %v858_v56 = vrot.slane %v565_v22, 1 }
  0xdf   : > { %v516_v39 = vsel %vm406_vm0, 0.0, %v433_v29  ;;  %v561_v19 = vpack.c.bf16 %v528_v2, %v528_v2 }
  0xe0   : > { %v3923_v21 = vpop.trf.xlu0  ;;  %v677_v37 = vrot.slane %v675_v28, 1  ;;  %v682_v46 = vrot.slane %v680_v38, 1 }
  0xe1   : > { %780 = vrot.lane.b32.xlu0 %v3918_v14, %s3643_s23  ;;  %v434_v32 = vrot.slane %v3923_v21, 7  ;;  %v632_v51 = vshll.u32 %v561_v19, 16 }
  0xe2   : > { %885 = vrot.lane.b32.xlu1 %v3841_v6, %s3642_s22  ;;  %v673_v6 = vshrl.u32 %v3920_v15, 16 }
  0xe3   : > { %v435_v40 = vsel %vm406_vm0, %v433_v29, %v434_v32  ;;  %v533_v47 = vsel %vm406_vm0, %v434_v32, 0.0  ;;  %v845_v29 = vrot.slane %v3972_v9, 1  ;;  %v846_v32 = vrot.slane %v561_v19, 1 }
  0xe4   : > { %v3946_v42 = vpack.c.bf16 %v435_v40, %v516_v39  ;;  %v678_v44 = vor.u32 %v677_v37, %v673_v6  ;;  %v566_v54 = vpack.c.bf16 %v533_v47, %v533_v47  ;;  %v3959_v60 = vpop.trf.xlu0  ;;  %v627_v6 = vshll.u32 %v3972_v9, 16 }
  0xe5   : > { %782 = vrot.lane.b32.xlu0 %v3909_v11, %s3643_s23  ;;  %v436_v24 = vrot.slane %v3959_v60, 7  ;;  %v634_v1 = vrot.slane %v632_v51, 1 }
  0xe6   : > { %887 = vrot.lane.b32.xlu1 %v844_v62, %s3642_s22  ;;  %v3956_v55 = vsel %vm575_vm2, %v678_v44, %v682_v46  ;;  %v687_v59 = vshll.u32 %v3946_v42, 16  ;;  %v685_v3 = vshrl.u32 %v3946_v42, 16  ;;  %v692_v8 = vshll.u32 %v566_v54, 16 }
  0xe7   : > { %v517_v38 = vsel %vm406_vm0, 0.0, %v436_v24  ;;  %v3998_v44 = vsel %vm832_vm1, %v845_v29, %v846_v32  ;;  %v625_v46 = vshrl.u32 %v3972_v9, 16  ;;  %v629_v47 = vrot.slane %v627_v6, 1 }
  0xe8   : > { %v689_v7 = vrot.slane %v687_v59, 1  ;;  %v3978_v22 = vpop.trf.xlu0  ;;  %v422_v59 = vrot.slane %v3838_v5, 7 }
  0xe9   : > { %895 = vrot.lane.b32.xlu0 %v3937_v35, %s3642_s22  ;;  %5725 = vst [vmem:[#allocation17_spill] sm:$0xff] %v3978_v22  ;;  %v437_v28 = vrot.slane %v3978_v22, 7  ;;  %v630_v49 = vor.u32 %v629_v47, %v625_v46 }
  0xea   : > { %918 = vrot.lane.b32.xlu1 %v3808_v48, %s3644_s24  ;;  %v690_v23 = vor.u32 %v689_v7, %v685_v3  ;;  %v860_v7 = vrot.slane %v3946_v42, 1  ;;  %v529_v51 = vsel %vm406_vm0, %v422_v59, 0.0 }
  0xeb   : > { %v438_v39 = vsel %vm406_vm0, %v436_v24, %v437_v28  ;;  %v635_v29 = vsel %vm575_vm2, %v630_v49, %v634_v1 }
  0xec   : > { %v3993_v40 = vpop.trf.xlu0  ;;  %v4001_v52 = vpack.c.bf16 %v438_v39, %v517_v38 }
  0xed   : > { %928 = vrot.lane.b32.xlu0 %v3920_v15, %s3644_s24  ;;  %5726 = vst [vmem:[#allocation18_spill] sm:$0xff] %v3993_v40 }
  0xee   : > { %998 = vrot.lane.b32.xlu1 %v844_v62, %s3645_s25  ;;  %v3969_v62 = vsel %vm832_vm1, %v857_v53, %v858_v56  ;;  %v534_v53 = vsel %vm406_vm0, %v437_v28, 0.0  ;;  %v421_v56 = vrot.slane %v3827_v63, 7  ;;  %v699_v19 = vshll.u32 %v4001_v52, 16 }
  0xef   : > { %v567_v2 = vpack.c.bf16 %v534_v53, %v534_v53 }
  0xf0   : > { %v4012_v3 = vpop.trf.xlu0  ;;  %v512_v24 = vsel %vm406_vm0, 0.0, %v421_v56  ;;  %v423_v28 = vsel %vm406_vm0, %v421_v56, %v422_v59  ;;  %v701_v6 = vrot.slane %v699_v19, 1 }
  0xf1   : > { %972 = vrot.lane.b32.xlu0 %v3956_v55, %s3646_s26  ;;  %5727 = vst [vmem:[#allocation19_spill] sm:$0xff] %v4012_v3  ;;  %v704_v38 = vshll.u32 %v567_v2, 16  ;;  %v4030_v47 = vpack.c.bf16 %v423_v28, %v512_v24  ;;  %v4043_v24 = vpop.permute.xlu1 %881  ;;  %v864_v28 = vrot.slane %v567_v2, 1 }
  0xf2   : > { %962 = vrot.lane.b32.xlu1 %v3830_v0, %s3646_s26  ;;  %v694_v0 = vrot.slane %v692_v8, 1  ;;  %v861_v8 = vrot.slane %v566_v54, 1  ;;  %v697_v54 = vshrl.u32 %v4001_v52, 16 }
  0xf3   : > { %v706_v49 = vrot.slane %v704_v38, 1  ;;  %v639_v19 = vshll.u32 %v4030_v47, 16 }
  0xf4   : > { %v3989_v37 = vsel %vm575_vm2, %v690_v23, %v694_v0  ;;  %v439_v23 = vrot.slane %v3993_v40, 7  ;;  %v440_v0 = vrot.slane %v4012_v3, 7  ;;  %v4025_v32 = vsel %vm832_vm1, %v860_v7, %v861_v8 }
  0xf5   : > { %1008 = vrot.lane.b32.xlu0 %v3969_v62, %s3645_s25  ;;  %v702_v56 = vor.u32 %v701_v6, %v697_v54  ;;  %v562_v7 = vpack.c.bf16 %v529_v51, %v529_v51  ;;  %v863_v8 = vrot.slane %v4001_v52, 1  ;;  %v848_v6 = vrot.slane %v4030_v47, 1 }
  0xf6   : > { %920 = vrot.lane.b32.xlu1 %v3972_v9, %s3644_s24  ;;  %v518_v39 = vsel %vm406_vm0, 0.0, %v439_v23  ;;  %v441_v46 = vsel %vm406_vm0, %v439_v23, %v440_v0  ;;  %v535_v1 = vsel %vm406_vm0, %v440_v0, 0.0  ;;  %v4050_v0 = vpop.trf.xlu0 }
  0xf7   : > { %v4035_v53 = vpack.c.bf16 %v441_v46, %v518_v39  ;;  %v568_v23 = vpack.c.bf16 %v535_v1, %v535_v1  ;;  %v4047_v59 = vsel %vm575_vm2, %v702_v56, %v706_v49  ;;  %5728 = vst [vmem:[#allocation20_spill] sm:$0xff] %v4050_v0  ;;  %v849_v38 = vrot.slane %v562_v7, 1  ;;  %v4062_v49 = vpop.permute.xlu1 %768 }
  0xf8   : > { %v637_v39 = vshrl.u32 %v4030_v47, 16  ;;  %v641_v46 = vrot.slane %v639_v19, 1  ;;  %v644_v51 = vshll.u32 %v562_v7, 16  ;;  %v4059_v2 = vsel %vm832_vm1, %v863_v8, %v864_v28 }
  0xf9   : > { %1040 = vrot.lane.b32.xlu0 %v3946_v42, %s3647_s10  ;;  %v711_v54 = vshll.u32 %v4035_v53, 16  ;;  %v716_v1 = vshll.u32 %v568_v23, 16  ;;  %v4067_v61 = vsel %vm832_vm1, %v848_v6, %v849_v38  ;;  %v442_v33 = vrot.slane %v4050_v0, 7 }
  0xfa   : > { %1030 = vrot.lane.b32.xlu1 %v3972_v9, %s3647_s10  ;;  %v642_v19 = vor.u32 %v641_v46, %v637_v39  ;;  %v646_v7 = vrot.slane %v644_v51, 1  ;;  %v4069_v45 = vpop.trf.xlu0 }
  0xfb   : > { %v713_v56 = vrot.slane %v711_v54, 1  ;;  %5729 = vst [vmem:[#allocation21_spill] sm:$0xff] %v4069_v45  ;;  %v718_v28 = vrot.slane %v716_v1, 1  ;;  %v443_v54 = vrot.slane %v4069_v45, 7  ;;  %v519_v39 = vsel %vm406_vm0, 0.0, %v442_v33 }
  0xfc   : > { %v647_v6 = vsel %vm575_vm2, %v642_v19, %v646_v7  ;;  %v867_v7 = vrot.slane %v568_v23, 1 }
  0xfd   : > { %1072 = vrot.lane.b32.xlu0 %v3989_v37, %s3649_s20  ;;  %v444_v46 = vsel %vm406_vm0, %v442_v33, %v443_v54 }
  0xfe   : > { %1000 = vrot.lane.b32.xlu1 %v3998_v44, %s3645_s25  ;;  %v4086_v51 = vpop.trf.xlu0 }
  0xff   : > { %5730 = vst [vmem:[#allocation22_spill] sm:$0xff] %v4086_v51 }
 0x101   : > { %784 = vrot.lane.b32.xlu0 %v3956_v55, %s3643_s23 }
 0x102   : > { %1094 = vrot.lane.b32.xlu1 %v3998_v44, %s3648_s12 }
 0x105   : > { %786 = vrot.lane.b32.xlu0 %v3989_v37, %s3643_s23 }
 0x106   : > { %964 = vrot.lane.b32.xlu1 %v635_v29, %s3646_s26 }
 0x109   : > { %899 = vrot.lane.b32.xlu0 %v4025_v32, %s3642_s22 }
 0x10a   : > { %1062 = vrot.lane.b32.xlu1 %v635_v29, %s3649_s20 }
 0x10d   : > { %932 = vrot.lane.b32.xlu0 %v4001_v52, %s3644_s24 }
 0x10e   : > { %776 = vrot.lane.b32.xlu1 %v635_v29, %s3643_s23  ;;  %v709_v29 = vshrl.u32 %v4035_v53, 16 }
 0x110   : > { %v714_v8 = vor.u32 %v713_v56, %v709_v29  ;;  %v4092_v29 = vpack.c.bf16 %v444_v46, %v519_v39  ;;  %v536_v56 = vsel %vm406_vm0, %v443_v54, 0.0  ;;  %v445_v46 = vrot.slane %v4086_v51, 7 }
 0x111   : > { %976 = vrot.lane.b32.xlu0 %v4047_v59, %s3646_s26  ;;  %v569_v33 = vpack.c.bf16 %v536_v56, %v536_v56 }
 0x112   : > { %1032 = vrot.lane.b32.xlu1 %v4030_v47, %s3647_s10  ;;  %v4082_v38 = vsel %vm575_vm2, %v714_v8, %v718_v28  ;;  %v4100_v8 = vpop.trf.xlu0  ;;  %v866_v28 = vrot.slane %v4035_v53, 1  ;;  %v723_v39 = vshll.u32 %v4092_v29, 16  ;;  %v520_v5 = vsel %vm406_vm0, 0.0, %v445_v46 }
 0x113   : > { %5731 = vst [vmem:[#allocation23_spill] sm:$0xff] %v4100_v8  ;;  %v446_v54 = vrot.slane %v4100_v8, 7  ;;  %v728_v23 = vshll.u32 %v569_v33, 16 }
 0x114   : > { %v4115_v56 = vsel %vm832_vm1, %v866_v28, %v867_v7  ;;  %v725_v10 = vrot.slane %v723_v39, 1  ;;  %v870_v39 = vrot.slane %v569_v33, 1 }
 0x115   : > { %1012 = vrot.lane.b32.xlu0 %v4059_v2, %s3645_s25  ;;  %v447_v51 = vsel %vm406_vm0, %v445_v46, %v446_v54  ;;  %v730_v58 = vrot.slane %v728_v23, 1  ;;  %v537_v7 = vsel %vm406_vm0, %v446_v54, 0.0 }
 0x116   : > { %1096 = vrot.lane.b32.xlu1 %v4067_v61, %s3648_s12  ;;  %v4122_v63 = vpack.c.bf16 %v447_v51, %v520_v5  ;;  %v4131_v46 = vpack.c.bf16 %v537_v7, %v537_v7  ;;  %v869_v51 = vrot.slane %v4092_v29, 1  ;;  %v4140_v23 = vpop.trf.xlu0 }
 0x117   : > { %5732 = vst [vmem:[#allocation24_spill] sm:$0xff] %v4140_v23 }
 0x118   : > { %v4075_v26 = vpop.permute.xlu1 %914  ;;  %v740_v33 = vshll.u32 %v4131_v46, 16 }
 0x119   : > { %1044 = vrot.lane.b32.xlu0 %v4035_v53, %s3647_s10 }
 0x11a   : > { %1064 = vrot.lane.b32.xlu1 %v647_v6, %s3649_s20  ;;  %v4154_v0 = vpop.trf.xlu0  ;;  %v742_v3 = vrot.slane %v740_v33, 1 }
 0x11b   : > { %5733 = vst [vmem:[#allocation25_spill] sm:$0xff] %v4154_v0 }
 0x11c   : > { %v4088_v1 = vpop.permute.xlu1 %883 }
 0x11d   : > { %1076 = vrot.lane.b32.xlu0 %v4082_v38, %s3649_s20 }
 0x11e   : > { %778 = vrot.lane.b32.xlu1 %v647_v6, %s3643_s23  ;;  %v4181_v40 = vpop.trf.xlu0 }
 0x11f   : > { %5734 = vst [vmem:[#allocation26_spill] sm:$0xff] %v4181_v40 }
 0x120   : > { %v4096_v19 = vpop.permute.xlu1 %994 }
 0x121   : > { %788 = vrot.lane.b32.xlu0 %v4047_v59, %s3643_s23 }
 0x122   : > { %889 = vrot.lane.b32.xlu1 %v3998_v44, %s3642_s22  ;;  %v721_v44 = vshrl.u32 %v4092_v29, 16 }
 0x124   : > { %v4108_v17 = vpop.permute.xlu1 %770  ;;  %v726_v45 = vor.u32 %v725_v10, %v721_v44  ;;  %v735_v10 = vshll.u32 %v4122_v63, 16  ;;  %v4147_v44 = vsel %vm832_vm1, %v869_v51, %v870_v39  ;;  %v448_v39 = vrot.slane %v4140_v23, 7 }
 0x125   : > { %790 = vrot.lane.b32.xlu0 %v4082_v38, %s3643_s23  ;;  %v449_v51 = vrot.slane %v4154_v0, 7 }
 0x126   : > { %891 = vrot.lane.b32.xlu1 %v4067_v61, %s3642_s22  ;;  %v4136_v5 = vsel %vm575_vm2, %v726_v45, %v730_v58  ;;  %v733_v58 = vshrl.u32 %v4122_v63, 16  ;;  %v737_v45 = vrot.slane %v735_v10, 1  ;;  %v521_v0 = vsel %vm406_vm0, 0.0, %v448_v39 }
 0x127   : > { %v450_v23 = vsel %vm406_vm0, %v448_v39, %v449_v51  ;;  %v873_v39 = vrot.slane %v4131_v46, 1 }
 0x128   : > { %v959_v8 = vpop.permute.xlu1 %958  ;;  %v738_v50 = vor.u32 %v737_v45, %v733_v58  ;;  %v852_v58 = vrot.slane %v3876_v34, 1 }
 0x129   : > { %903 = vrot.lane.b32.xlu0 %v4115_v56, %s3642_s22 }
 0x12a   : > { %922 = vrot.lane.b32.xlu1 %v4030_v47, %s3644_s24 }
 0x12c   : > { %v4127_v28 = vpop.permute.xlu1 %916 }
 0x12d   : > { %936 = vrot.lane.b32.xlu0 %v4092_v29, %s3644_s24 }
 0x12e   : > { %924 = vrot.lane.b32.xlu1 %v3868_v30, %s3644_s24 }
 0x130   : > { %v1027_v54 = vpop.permute.xlu1 %1026 }
 0x131   : > { %980 = vrot.lane.b32.xlu0 %v4136_v5, %s3646_s26 }
 0x132   : > { %966 = vrot.lane.b32.xlu1 %v647_v6, %s3646_s26  ;;  %v1124_v6 = vsel %vm1122_vm4, %v3754_v4, %v4062_v49  ;;  %v4174_v49 = vsel %vm575_vm2, %v738_v50, %v742_v3  ;;  %v853_v50 = vsel %vm832_vm1, %v851_v41, %v852_v58 }
 0x133   : > { %v4169_v33 = vsel %vm1155_vm5, %v1124_v6, %v4043_v24 }
 0x134   : > { %v4150_v7 = vpop.permute.xlu1 %996  ;;  %v1190_v45 = vsel %vm1188_vm6, %v4169_v33, %v4075_v26  ;;  %v538_v26 = vsel %vm406_vm0, %v449_v51, 0.0  ;;  %v451_v51 = vrot.slane %v4181_v40, 7 }
 0x135   : > { %1016 = vrot.lane.b32.xlu0 %v4147_v44, %s3645_s25  ;;  %v1223_v34 = vsel %vm1221_vm7, %v1190_v45, %v959_v8  ;;  %v571_v41 = vpack.c.bf16 %v538_v26, %v538_v26 }
 0x136   : > { %968 = vrot.lane.b32.xlu1 %v3918_v14, %s3646_s26  ;;  %v1256_v3 = vsel %vm1254_vm8, %v1223_v34, %v4096_v19 }
 0x137   : > { %v1289_v8 = vsel %vm1287_vm9, %v1256_v3, %v1027_v54  ;;  %v752_v34 = vshll.u32 %v571_v41, 16  ;;  %v876_v40 = vrot.slane %v571_v41, 1 }
 0x138   : > { %v1091_v10 = vpop.permute.xlu1 %1090 }
 0x139   : > { %1048 = vrot.lane.b32.xlu0 %v4122_v63, %s3647_s10 }
 0x13a   : > { %1002 = vrot.lane.b32.xlu1 %v4067_v61, %s3645_s25  ;;  %v4187_v61 = vpack.c.bf16 %v450_v23, %v521_v0  ;;  %v4198_v0 = vpop.trf.xlu0  ;;  %v872_v23 = vrot.slane %v4122_v63, 1 }
 0x13b   : > { %5735 = vst [vmem:[#allocation27_spill] sm:$0xff] %v4198_v0  ;;  %v452_v46 = vrot.slane %v4198_v0, 7 }
 0x13c   : > { %v961_v24 = vpop.permute.xlu1 %960  ;;  %v747_v54 = vshll.u32 %v4187_v61, 16  ;;  %v745_v26 = vshrl.u32 %v4187_v61, 16 }
 0x13d   : > { %1080 = vrot.lane.b32.xlu0 %v4174_v49, %s3649_s20 }
 0x13e   : > { %1004 = vrot.lane.b32.xlu1 %v853_v50, %s3645_s25  ;;  %v749_v3 = vrot.slane %v747_v54, 1  ;;  %v539_v54 = vsel %vm406_vm0, %v452_v46, 0.0 }
 0x140   : > { %v1059_v6 = vpop.permute.xlu1 %1058 }
 0x141   : > { %v1322_v45 = vsel %vm1320_vm10, %v1289_v8, %v1059_v6  ;;  %792 = vrot.lane.b32.xlu0 %v4136_v5, %s3643_s23  ;;  %v522_v8 = vsel %vm406_vm0, 0.0, %v451_v51  ;;  %v1126_v6 = vsel %vm1122_vm4, %v3781_v25, %v4108_v17 }
 0x142   : > { %1034 = vrot.lane.b32.xlu1 %v3868_v30, %s3647_s10  ;;  %v1355_v19 = vsel %vm1353_vm11, %v1322_v45, %v1091_v10  ;;  %v4215_v10 = vsel %vm832_vm1, %v872_v23, %v873_v39  ;;  %v453_v45 = vsel %vm406_vm0, %v451_v51, %v452_v46  ;;  %v750_v39 = vor.u32 %v749_v3, %v745_v26 }
 0x143   : > { %3434 = vmatprep.mubr.msk.bf16.mxu0 %vm1406_vm12, %v1355_v19  ;;  %v4225_v0 = vpack.c.bf16 %v453_v45, %v522_v8  ;;  %v754_v23 = vrot.slane %v752_v34, 1  ;;  %v875_v8 = vrot.slane %v4187_v61, 1  ;;  %v572_v45 = vpack.c.bf16 %v539_v54, %v539_v54  ;;  %v4243_v34 = vpop.trf.xlu0 }
 0x144   : > { %v4208_v58 = vpop.permute.xlu1 %772  ;;  %5736 = vst [vmem:[#allocation28_spill] sm:$0xff] %v4243_v34 }
 0x145   : > { %794 = vrot.lane.b32.xlu0 %v4174_v49, %s3643_s23  ;;  %v759_v46 = vshll.u32 %v4225_v0, 16  ;;  %v4252_v3 = vsel %vm832_vm1, %v875_v8, %v876_v40 }
 0x146   : > { %1066 = vrot.lane.b32.xlu1 %v3918_v14, %s3649_s20  ;;  %v1159_v14 = vsel %vm1155_vm5, %v1126_v6, %v4088_v1  ;;  %v4240_v1 = vsel %vm575_vm2, %v750_v39, %v754_v23  ;;  %v764_v6 = vshll.u32 %v572_v45, 16  ;;  %v757_v39 = vshrl.u32 %v4225_v0, 16 }
 0x147   : > { %v1192_v25 = vsel %vm1188_vm6, %v1159_v14, %v4127_v28  ;;  %v761_v23 = vrot.slane %v759_v46, 1 }
 0x148   : > { %v1029_v19 = vpop.permute.xlu1 %1028  ;;  %v1225_v17 = vsel %vm1221_vm7, %v1192_v25, %v961_v24  ;;  %v766_v54 = vrot.slane %v764_v6, 1 }
 0x149   : > { %907 = vrot.lane.b32.xlu0 %v4215_v10, %s3642_s22  ;;  %v1258_v28 = vsel %vm1254_vm8, %v1225_v17, %v4150_v7  ;;  %v762_v40 = vor.u32 %v761_v23, %v757_v39  ;;  %v878_v23 = vrot.slane %v4225_v0, 1 }
 0x14a   : > { %1098 = vrot.lane.b32.xlu1 %v853_v50, %s3648_s12  ;;  %v1291_v24 = vsel %vm1287_vm9, %v1258_v28, %v1029_v19  ;;  %v4258_v19 = vpop.trf.xlu0 }
 0x14b   : > { %5737 = vst [vmem:[#allocation29_spill] sm:$0xff] %v4258_v19  ;;  %v455_v25 = vrot.slane %v4258_v19, 7 }
 0x14c   : > { %v1093_v51 = vpop.permute.xlu1 %1092 }
 0x14d   : > { %940 = vrot.lane.b32.xlu0 %v4187_v61, %s3644_s24 }
 0x14e   : > { %1100 = vrot.lane.b32.xlu1 %v3937_v35, %s3648_s12  ;;  %v4277_v28 = vpop.permute.xlu0 %774 }
 0x150   : > { %v1061_v41 = vpop.permute.xlu1 %1060 }
 0x151   : > { %v1324_v26 = vsel %vm1320_vm10, %v1291_v24, %v1061_v41  ;;  %984 = vrot.lane.b32.xlu0 %v4240_v1, %s3646_s26 }
 0x152   : > { %893 = vrot.lane.b32.xlu1 %v853_v50, %s3642_s22  ;;  %v1357_v14 = vsel %vm1353_vm11, %v1324_v26, %v1093_v51  ;;  %v454_v50 = vrot.slane %v4243_v34, 7  ;;  %v4273_v51 = vsel %vm575_vm2, %v762_v40, %v766_v54  ;;  %v4286_v26 = vpop.permute.xlu0 %1036 }
 0x153   : > { %3435 = vmatmul.mubr.msk.bf16.vlgmr.msra.gmra.mrb[0].mxu0 %vm1406_vm12, %v1357_v14  ;;  %v879_v14 = vrot.slane %v572_v45, 1 }
 0x154   : > { %v886_v7 = vpop.permute.xlu1 %885  ;;  %v523_v8 = vsel %vm406_vm0, 0.0, %v454_v50  ;;  %v456_v46 = vsel %vm406_vm0, %v454_v50, %v455_v25 }
 0x155   : > { %1020 = vrot.lane.b32.xlu0 %v4252_v3, %s3645_s25  ;;  %v4281_v41 = vpack.c.bf16 %v456_v46, %v523_v8  ;;  %v4301_v45 = vsel %vm832_vm1, %v878_v23, %v879_v14 }
 0x156   : > { %926 = vrot.lane.b32.xlu1 %v3886_v43, %s3644_s24  ;;  %v4294_v50 = vpop.permute.xlu0 %1068 }
 0x157   : > { %v949_v40 = vshll.u32 %v4281_v41, 16  ;;  %v991_v23 = vrot.slane %v4281_v41, 1 }
 0x158   : > { %v4266_v17 = vpop.permute.xlu1 %887 }
 0x159   : > { %1052 = vrot.lane.b32.xlu0 %v4225_v0, %s3647_s10  ;;  %v951_v8 = vrot.slane %v949_v40, 1 }
 0x15a   : > { %970 = vrot.lane.b32.xlu1 %v3909_v11, %s3646_s26  ;;  %v540_v11 = vsel %vm406_vm0, %v455_v25, 0.0  ;;  %v947_v25 = vshrl.u32 %v4281_v41, 16  ;;  %v4308_v34 = vpop.permute.xlu0 %780 }
 0x15b   : > { %v574_v39 = vpack.c.bf16 %v540_v11, %v540_v11 }
 0x15c   : > { %v919_v24 = vpop.permute.xlu1 %918  ;;  %v952_v11 = vor.u32 %v951_v8, %v947_v25 }
 0x15d   : > { %1084 = vrot.lane.b32.xlu0 %v4273_v51, %s3649_s20 }
 0x15e   : > { %1006 = vrot.lane.b32.xlu1 %v3937_v35, %s3645_s25  ;;  %v954_v35 = vshll.u32 %v574_v39, 16  ;;  %v4318_v22 = vpop.permute.xlu0 %782 }
 0x160   : > { %v999_v6 = vpop.permute.xlu1 %998  ;;  %v956_v19 = vrot.slane %v954_v35, 1 }
 0x161   : > { %796 = vrot.lane.b32.xlu0 %v4240_v1, %s3643_s23 }
 0x162   : > { %1038 = vrot.lane.b32.xlu1 %v3920_v15, %s3647_s10  ;;  %v4315_v14 = vsel %vm575_vm2, %v952_v11, %v956_v19  ;;  %v1128_v19 = vsel %vm1122_vm4, %v3821_v57, %v4208_v58  ;;  %v4335_v8 = vpop.permute.xlu0 %895 }
 0x163   : > { %v1161_v25 = vsel %vm1155_vm5, %v1128_v19, %v886_v7 }
 0x164   : > { %v963_v54 = vpop.permute.xlu1 %962 }
 0x165   : > { %798 = vrot.lane.b32.xlu0 %v4273_v51, %s3643_s23 }
 0x166   : > { %1070 = vrot.lane.b32.xlu1 %v3956_v55, %s3649_s20  ;;  %v992_v55 = vrot.slane %v574_v39, 1 }
 0x168   : > { %v921_v46 = vpop.permute.xlu1 %920  ;;  %v4325_v35 = vsel %vm832_vm1, %v991_v23, %v992_v55  ;;  %v4345_v23 = vpop.permute.xlu0 %928 }
 0x169   : > { %911 = vrot.lane.b32.xlu0 %v4301_v45, %s3642_s22 }
 0x16a   : > { %1102 = vrot.lane.b32.xlu1 %v3969_v62, %s3648_s12 }
 0x16c   : > { %v1031_v36 = vpop.permute.xlu1 %1030 }
 0x16d   : > { %944 = vrot.lane.b32.xlu0 %v4281_v41, %s3644_s24 }
 0x16e   : > { %1104 = vrot.lane.b32.xlu1 %v4025_v32, %s3648_s12 }
 0x170   : > { %v1001_v40 = vpop.permute.xlu1 %1000 }
 0x171   : > { %988 = vrot.lane.b32.xlu0 %v4315_v14, %s3646_s26 }
 0x172   : > { %897 = vrot.lane.b32.xlu1 %v3969_v62, %s3642_s22  ;;  %v1194_v62 = vsel %vm1188_vm6, %v1161_v25, %v919_v24 }
 0x173   : > { %v1227_v11 = vsel %vm1221_vm7, %v1194_v62, %v963_v54 }
 0x174   : > { %v1095_v39 = vpop.permute.xlu1 %1094  ;;  %v1260_v57 = vsel %vm1254_vm8, %v1227_v11, %v999_v6 }
 0x175   : > { %1024 = vrot.lane.b32.xlu0 %v4325_v35, %s3645_s25  ;;  %v1293_v58 = vsel %vm1287_vm9, %v1260_v57, %v1031_v36  ;;  %v4358_v36 = vpop.permute.xlu0 %972 }
 0x176   : > { %930 = vrot.lane.b32.xlu1 %v3946_v42, %s3644_s24 }
 0x178   : > { %v965_v55 = vpop.permute.xlu1 %964 }
 0x179   : > { %1056 = vrot.lane.b32.xlu0 %v3754_v4, %s3647_s10 }
 0x17a   : > { %974 = vrot.lane.b32.xlu1 %v3989_v37, %s3646_s26 }
 0x17c   : > { %v1063_v7 = vpop.permute.xlu1 %1062 }
 0x17d   : > { %v1326_v19 = vsel %vm1320_vm10, %v1293_v58, %v1063_v7  ;;  %1088 = vrot.lane.b32.xlu0 %v3768_v16, %s3649_s20  ;;  %v1130_v16 = vsel %vm1122_vm4, %v3808_v48, %v4277_v28 }
 0x17e   : > { %1010 = vrot.lane.b32.xlu1 %v4025_v32, %s3645_s25  ;;  %v1359_v4 = vsel %vm1353_vm11, %v1326_v19, %v1095_v39  ;;  %v1163_v32 = vsel %vm1155_vm5, %v1130_v16, %v4266_v17  ;;  %v4369_v39 = vpop.permute.xlu0 %1008 }
 0x17f   : > { %3438 = vmatprep.mubr.msk.bf16.mxu0 %vm1406_vm12, %v1359_v4  ;;  %v1196_v6 = vsel %vm1188_vm6, %v1163_v32, %v921_v46 }
 0x180   : > { %v777_v37 = vpop.permute.xlu1 %776 }
 0x181   : > { %1120 = vrot.lane.b32.xlu0 %v3763_v12, %s3648_s12  ;;  %v1229_v12 = vsel %vm1221_vm7, %v1196_v6, %v965_v55 }
 0x182   : > { %1042 = vrot.lane.b32.xlu1 %v4001_v52, %s3647_s10  ;;  %v1262_v25 = vsel %vm1254_vm8, %v1229_v12, %v1001_v40  ;;  %v4379_v46 = vpop.permute.xlu0 %1040 }
 0x184   : > { %v1033_v24 = vpop.permute.xlu1 %1032 }
 0x185   : > { %v1295_v48 = vsel %vm1287_vm9, %v1262_v25, %v1033_v24 }
 0x186   : > { %1074 = vrot.lane.b32.xlu1 %v4047_v59, %s3649_s20  ;;  %v4384_v40 = vpop.permute.xlu0 %1072 }
 0x188   : > { %v1097_v54 = vpop.permute.xlu1 %1096 }
 0x18a   : > { %1106 = vrot.lane.b32.xlu1 %v4059_v2, %s3648_s12  ;;  %v4390_v57 = vpop.permute.xlu0 %784 }
 0x18c   : > { %v1065_v28 = vpop.permute.xlu1 %1064 }
 0x18d   : > { %v1328_v17 = vsel %vm1320_vm10, %v1295_v48, %v1065_v28 }
 0x18e   : > { %1108 = vrot.lane.b32.xlu1 %v4115_v56, %s3648_s12  ;;  %v1361_v59 = vsel %vm1353_vm11, %v1328_v17, %v1097_v54  ;;  %v4394_v19 = vpop.permute.xlu0 %786 }
 0x18f   : > { %3439 = vmatmul.mubr.msk.bf16.gmra.mrb[4].mxu0 %vm1406_vm12, %v1361_v59 }
 0x190   : > { %v779_v62 = vpop.permute.xlu1 %778 }
 0x191   : > { %v1134_v12 = vsel %vm1122_vm4, %v4030_v47, %v779_v62 }
 0x192   : > { %901 = vrot.lane.b32.xlu1 %v4059_v2, %s3642_s22  ;;  %v4400_v4 = vpop.permute.xlu0 %899 }
 0x194   : > { %v890_v11 = vpop.permute.xlu1 %889 }
 0x196   : > { %934 = vrot.lane.b32.xlu1 %v4035_v53, %s3644_s24  ;;  %v4404_v16 = vpop.permute.xlu0 %932 }
 0x198   : > { %v892_v55 = vpop.permute.xlu1 %891 }
 0x199   : > { %v1167_v25 = vsel %vm1155_vm5, %v1134_v12, %v892_v55 }
 0x19a   : > { %978 = vrot.lane.b32.xlu1 %v4082_v38, %s3646_s26  ;;  %v4410_v32 = vpop.permute.xlu0 %976 }
 0x19c   : > { %v923_v58 = vpop.permute.xlu1 %922 }
 0x19e   : > { %1014 = vrot.lane.b32.xlu1 %v4115_v56, %s3645_s25  ;;  %v4422_v17 = vpop.permute.xlu0 %1012 }
 0x1a0   : > { %v925_v7 = vpop.permute.xlu1 %924 }
 0x1a2   : > { %1046 = vrot.lane.b32.xlu1 %v4092_v29, %s3647_s10 }
 0x1a4   : > { %v967_v2 = vpop.permute.xlu1 %966 }
 0x1a6   : > { %1078 = vrot.lane.b32.xlu1 %v4136_v5, %s3649_s20  ;;  %v1132_v5 = vsel %vm1122_vm4, %v3972_v9, %v777_v37 }
 0x1a7   : > { %v1165_v54 = vsel %vm1155_vm5, %v1132_v5, %v890_v11 }
 0x1a8   : > { %v969_v24 = vpop.permute.xlu1 %968  ;;  %v1198_v48 = vsel %vm1188_vm6, %v1165_v54, %v923_v58 }
 0x1a9   : > { %v1231_v59 = vsel %vm1221_vm7, %v1198_v48, %v967_v2  ;;  %v4438_v2 = vpop.permute.xlu0 %1044 }
 0x1aa   : > { %1110 = vrot.lane.b32.xlu1 %v4147_v44, %s3648_s12 }
 0x1ac   : > { %v1003_v38 = vpop.permute.xlu1 %1002 }
 0x1ad   : > { %v1264_v47 = vsel %vm1254_vm8, %v1231_v59, %v1003_v38 }
 0x1ae   : > { %1112 = vrot.lane.b32.xlu1 %v4215_v10, %s3648_s12 }
 0x1b0   : > { %v1005_v56 = vpop.permute.xlu1 %1004 }
 0x1b2   : > { %905 = vrot.lane.b32.xlu1 %v4147_v44, %s3642_s22  ;;  %v1200_v44 = vsel %vm1188_vm6, %v1167_v25, %v925_v7 }
 0x1b3   : > { %v1233_v9 = vsel %vm1221_vm7, %v1200_v44, %v969_v24 }
 0x1b4   : > { %v1035_v6 = vpop.permute.xlu1 %1034  ;;  %v1266_v37 = vsel %vm1254_vm8, %v1233_v9, %v1005_v56  ;;  %v4446_v56 = vpop.permute.xlu0 %1076 }
 0x1b5   : > { %v1297_v62 = vsel %vm1287_vm9, %v1264_v47, %v1035_v6  ;;  %v1299_v58 = vsel %vm1287_vm9, %v1266_v37, %v4286_v26 }
 0x1b6   : > { %938 = vrot.lane.b32.xlu1 %v4122_v63, %s3644_s24 }
 0x1b8   : > { %v1067_v28 = vpop.permute.xlu1 %1066  ;;  %v4452_v6 = vpop.permute.xlu0 %788 }
 0x1b9   : > { %v1330_v11 = vsel %vm1320_vm10, %v1297_v62, %v1067_v28 }
 0x1ba   : > { %982 = vrot.lane.b32.xlu1 %v4174_v49, %s3646_s26  ;;  %v1332_v49 = vsel %vm1320_vm10, %v1299_v58, %v4294_v50 }
 0x1bc   : > { %v1099_v55 = vpop.permute.xlu1 %1098  ;;  %v4456_v12 = vpop.permute.xlu0 %790 }
 0x1bd   : > { %v1363_v7 = vsel %vm1353_vm11, %v1330_v11, %v1099_v55 }
 0x1be   : > { %1018 = vrot.lane.b32.xlu1 %v4215_v10, %s3645_s25  ;;  %3442 = vmatprep.mubr.msk.bf16.mxu0 %vm1406_vm12, %v1363_v7 }
 0x1c0   : > { %v1101_v24 = vpop.permute.xlu1 %1100  ;;  %v4465_v25 = vpop.permute.xlu0 %903 }
 0x1c1   : > { %v1365_v38 = vsel %vm1353_vm11, %v1332_v49, %v1101_v24 }
 0x1c2   : > { %1050 = vrot.lane.b32.xlu1 %v4187_v61, %s3647_s10  ;;  %3443 = vmatmul.mubr.msk.bf16.gmra.mrb[8].mxu0 %vm1406_vm12, %v1365_v38 }
 0x1c4   : > { %v894_v26 = vpop.permute.xlu1 %893 }
 0x1c6   : > { %1082 = vrot.lane.b32.xlu1 %v4240_v1, %s3649_s20  ;;  %v1136_v1 = vsel %vm1122_vm4, %v3868_v30, %v4308_v34 }
 0x1c7   : > { %v1169_v48 = vsel %vm1155_vm5, %v1136_v1, %v894_v26 }
 0x1c8   : > { %v927_v10 = vpop.permute.xlu1 %926 }
 0x1c9   : > { %v1202_v44 = vsel %vm1188_vm6, %v1169_v48, %v927_v10 }
 0x1ca   : > { %1114 = vrot.lane.b32.xlu1 %v4252_v3, %s3648_s12 }
 0x1cc   : > { %v971_v50 = vpop.permute.xlu1 %970 }
 0x1cd   : > { %v1235_v59 = vsel %vm1221_vm7, %v1202_v44, %v971_v50 }
 0x1ce   : > { %1116 = vrot.lane.b32.xlu1 %v4301_v45, %s3648_s12 }
 0x1d0   : > { %v1007_v5 = vpop.permute.xlu1 %1006 }
 0x1d1   : > { %v1268_v9 = vsel %vm1254_vm8, %v1235_v59, %v1007_v5 }
 0x1d2   : > { %909 = vrot.lane.b32.xlu1 %v4252_v3, %s3642_s22  ;;  %v1138_v3 = vsel %vm1122_vm4, %v3886_v43, %v4318_v22  ;;  %v4484_v43 = vpop.permute.xlu0 %936 }
 0x1d3   : > { %v1171_v30 = vsel %vm1155_vm5, %v1138_v3, %v4335_v8 }
 0x1d4   : > { %v1039_v54 = vpop.permute.xlu1 %1038  ;;  %v1204_v47 = vsel %vm1188_vm6, %v1171_v30, %v4345_v23 }
 0x1d5   : > { %v1301_v34 = vsel %vm1287_vm9, %v1268_v9, %v1039_v54  ;;  %v1237_v11 = vsel %vm1221_vm7, %v1204_v47, %v4358_v36 }
 0x1d6   : > { %942 = vrot.lane.b32.xlu1 %v4225_v0, %s3644_s24 }
 0x1d8   : > { %v1071_v28 = vpop.permute.xlu1 %1070 }
 0x1d9   : > { %v1334_v37 = vsel %vm1320_vm10, %v1301_v34, %v1071_v28 }
 0x1da   : > { %986 = vrot.lane.b32.xlu1 %v4273_v51, %s3646_s26  ;;  %v1270_v51 = vsel %vm1254_vm8, %v1237_v11, %v4369_v39  ;;  %v981_v39 = vpop.permute.xlu0 %980 }
 0x1db   : > { %v1303_v8 = vsel %vm1287_vm9, %v1270_v51, %v4379_v46 }
 0x1dc   : > { %v1103_v62 = vpop.permute.xlu1 %1102  ;;  %v1336_v23 = vsel %vm1320_vm10, %v1303_v8, %v4384_v40 }
 0x1dd   : > { %v1367_v22 = vsel %vm1353_vm11, %v1334_v37, %v1103_v62 }
 0x1de   : > { %1022 = vrot.lane.b32.xlu1 %v4301_v45, %s3645_s25  ;;  %3446 = vmatprep.mubr.msk.bf16.mxu0 %vm1406_vm12, %v1367_v22  ;;  %v1017_v7 = vpop.permute.xlu0 %1016 }
 0x1e0   : > { %v1105_v55 = vpop.permute.xlu1 %1104 }
 0x1e1   : > { %v1369_v36 = vsel %vm1353_vm11, %v1336_v23, %v1105_v55  ;;  %v1146_v55 = vsel %vm1122_vm4, %v4035_v53, %v4456_v12 }
 0x1e2   : > { %1054 = vrot.lane.b32.xlu1 %v4281_v41, %s3647_s10  ;;  %3447 = vmatmul.mubr.msk.bf16.gmra.mrb[12].mxu0 %vm1406_vm12, %v1369_v36  ;;  %v1049_v40 = vpop.permute.xlu0 %1048  ;;  %v1140_v41 = vsel %vm1122_vm4, %v3920_v15, %v4390_v57 }
 0x1e4   : > { %v898_v58 = vpop.permute.xlu1 %897 }
 0x1e5   : > { %v1173_v26 = vsel %vm1155_vm5, %v1140_v41, %v898_v58  ;;  %v1179_v58 = vsel %vm1155_vm5, %v1146_v55, %v4465_v25 }
 0x1e6   : > { %1086 = vrot.lane.b32.xlu1 %v4315_v14, %s3649_s20  ;;  %v1081_v38 = vpop.permute.xlu0 %1080 }
 0x1e8   : > { %v931_v45 = vpop.permute.xlu1 %930 }
 0x1e9   : > { %v1206_v10 = vsel %vm1188_vm6, %v1173_v26, %v931_v45 }
 0x1ea   : > { %1118 = vrot.lane.b32.xlu1 %v4325_v35, %s3648_s12  ;;  %v1142_v35 = vsel %vm1122_vm4, %v3946_v42, %v4394_v19  ;;  %v4516_v1 = vpop.permute.xlu0 %792 }
 0x1eb   : > { %v1175_v54 = vsel %vm1155_vm5, %v1142_v35, %v4400_v4 }
 0x1ec   : > { %v975_v46 = vpop.permute.xlu1 %974  ;;  %v1208_v57 = vsel %vm1188_vm6, %v1175_v54, %v4404_v16 }
 0x1ed   : > { %v1239_v14 = vsel %vm1221_vm7, %v1206_v10, %v975_v46  ;;  %v1241_v28 = vsel %vm1221_vm7, %v1208_v57, %v4410_v32 }
 0x1ee   : > { %v1274_v19 = vsel %vm1254_vm8, %v1241_v28, %v4422_v17  ;;  %v4532_v3 = vpop.permute.xlu0 %794 }
 0x1ef   : > { %v1307_v4 = vsel %vm1287_vm9, %v1274_v19, %v4438_v2 }
 0x1f0   : > { %v1011_v24 = vpop.permute.xlu1 %1010  ;;  %v1340_v59 = vsel %vm1320_vm10, %v1307_v4, %v4446_v56  ;;  %v1144_v56 = vsel %vm1122_vm4, %v4001_v52, %v4452_v6  ;;  %v1212_v6 = vsel %vm1188_vm6, %v1179_v58, %v4484_v43 }
 0x1f1   : > { %v1272_v5 = vsel %vm1254_vm8, %v1239_v14, %v1011_v24  ;;  %v1245_v24 = vsel %vm1221_vm7, %v1212_v6, %v981_v39  ;;  %v4573_v39 = vld [vmem:[%s5679_s2] ss:$0 sm:$0xff] }
 0x1f2   : > { %v4536_v30 = vpop.permute.xlu0 %907  ;;  %v1278_v41 = vsel %vm1254_vm8, %v1245_v24, %v1017_v7 }
 0x1f3   : > { %v1311_v53 = vsel %vm1287_vm9, %v1278_v41, %v1049_v40  ;;  %v4580_v40 = vld [vmem:[%s5680_s3] ss:$0 sm:$0xff] }
 0x1f4   : > { %v1043_v49 = vpop.permute.xlu1 %1042  ;;  %v1344_v25 = vsel %vm1320_vm10, %v1311_v53, %v1081_v38 }
 0x1f5   : > { %v1305_v15 = vsel %vm1287_vm9, %v1272_v5, %v1043_v49 }
 0x1f6   : > { %v4538_v47 = vpop.permute.xlu0 %940 }
 0x1f8   : > { %v1075_v50 = vpop.permute.xlu1 %1074 }
 0x1f9   : > { %v1338_v48 = vsel %vm1320_vm10, %v1305_v15, %v1075_v50 }
 0x1fa   : > { %v4540_v62 = vpop.permute.xlu0 %984 }
 0x1fc   : > { %v1107_v44 = vpop.permute.xlu1 %1106 }
 0x1fd   : > { %v1371_v42 = vsel %vm1353_vm11, %v1338_v48, %v1107_v44 }
 0x1fe   : > { %3450 = vmatprep.mubr.msk.bf16.mxu0 %vm1406_vm12, %v1371_v42  ;;  %v4547_v8 = vpop.permute.xlu0 %1020 }
 0x200   : > { %v1109_v16 = vpop.permute.xlu1 %1108 }
 0x201   : > { %v1373_v9 = vsel %vm1353_vm11, %v1340_v59, %v1109_v16 }
 0x202   : > { %3451 = vmatmul.mubr.msk.bf16.gmra.mrb[16].mxu0 %vm1406_vm12, %v1373_v9  ;;  %v4565_v12 = vpop.permute.xlu0 %1052 }
 0x204   : > { %v902_v32 = vpop.permute.xlu1 %901 }
 0x205   : > { %v1177_v11 = vsel %vm1155_vm5, %v1144_v56, %v902_v32 }
 0x206   : > { %v4575_v7 = vpop.permute.xlu0 %1084 }
 0x208   : > { %v935_v34 = vpop.permute.xlu1 %934 }
 0x209   : > { %v1210_v22 = vsel %vm1188_vm6, %v1177_v11, %v935_v34 }
 0x20a   : > { %v4588_v42 = vpop.permute.xlu0 %796 }
 0x20c   : > { %v979_v17 = vpop.permute.xlu1 %978 }
 0x20d   : > { %v1243_v23 = vsel %vm1221_vm7, %v1210_v22, %v979_v17 }
 0x20e   : > { %v4592_v22 = vpop.permute.xlu0 %798 }
 0x210   : > { %v1015_v37 = vpop.permute.xlu1 %1014 }
 0x211   : > { %v1276_v36 = vsel %vm1254_vm8, %v1243_v23, %v1015_v37 }
 0x214   : > { %v1047_v2 = vpop.permute.xlu1 %1046 }
 0x215   : > { %v1309_v52 = vsel %vm1287_vm9, %v1276_v36, %v1047_v2 }
 0x218   : > { %v1079_v51 = vpop.permute.xlu1 %1078 }
 0x219   : > { %v1342_v45 = vsel %vm1320_vm10, %v1309_v52, %v1079_v51 }
 0x21c   : > { %v1111_v46 = vpop.permute.xlu1 %1110 }
 0x21d   : > { %v1375_v49 = vsel %vm1353_vm11, %v1342_v45, %v1111_v46 }
 0x21e   : > { %3454 = vmatprep.mubr.msk.bf16.mxu0 %vm1406_vm12, %v1375_v49 }
 0x220   : > { %v1113_v26 = vpop.permute.xlu1 %1112 }
 0x221   : > { %v1377_v43 = vsel %vm1353_vm11, %v1344_v25, %v1113_v26  ;;  %v1148_v25 = vsel %vm1122_vm4, %v4092_v29, %v4516_v1 }
 0x222   : > { %3455 = vmatmul.mubr.msk.bf16.gmra.mrb[20].mxu0 %vm1406_vm12, %v1377_v43 }
 0x224   : > { %v906_v10 = vpop.permute.xlu1 %905 }
 0x226   : > { %v3436_v50 = vpop.f32.mrb[0].mxu0 }
 0x227   : > { %v1613_v38 = vmul.f32 %v3436_v50, %v4573_v39  ;;  %v1477_v14 = vpop.f32.mrb[1].mxu0  ;;  %v912_v50 = vpop.permute.xlu0 %911 }
 0x228   : > { %v1611_v35 = vmul.f32 %v4573_v39, %v1477_v14  ;;  %v3437_v5 = vpop.f32.mrb[2].mxu0  ;;  %v939_v54 = vpop.permute.xlu1 %938 }
 0x229   : > { %v1652_v15 = vadd.f32 %v4580_v40, %v1613_v38  ;;  %v1614_v57 = vmul.f32 %v3437_v5, %v4573_v39  ;;  %v1480_v48 = vpop.f32.mrb[3].mxu0  ;;  %v1181_v38 = vsel %vm1155_vm5, %v1148_v25, %v906_v10  ;;  %v1150_v10 = vsel %vm1122_vm4, %v4122_v63, %v4532_v3 }
 0x22a   : > { %v1650_v44 = vadd.f32 %v4580_v40, %v1611_v35  ;;  %v1612_v28 = vmul.f32 %v4573_v39, %v1480_v48  ;;  %v1214_v5 = vsel %vm1188_vm6, %v1181_v38, %v939_v54  ;;  %v1183_v54 = vsel %vm1155_vm5, %v1150_v10, %v4536_v30 }
 0x22b   : > { %v1684_v19 = vmax.f32 %v1652_v15, 0.0  ;;  %v1653_v4 = vadd.f32 %v4580_v40, %v1614_v57  ;;  %v945_v3 = vpop.permute.xlu0 %944  ;;  %v1152_v25 = vsel %vm1122_vm4, %v4187_v61, %v4588_v42 }
 0x22c   : > { %v1682_v59 = vmax.f32 %v1650_v44, 0.0  ;;  %v1651_v16 = vadd.f32 %v4580_v40, %v1612_v28  ;;  %v983_v9 = vpop.permute.xlu1 %982 }
 0x22d   : > { %v1749_v32 = vrot.slane %v1684_v19, 7  ;;  %v1685_v34 = vmax.f32 %v1653_v4, 0.0  ;;  %v1247_v1 = vsel %vm1221_vm7, %v1214_v5, %v983_v9 }
 0x22e   : > { %v1746_v17 = vrot.slane %v1682_v59, 7  ;;  %v1683_v37 = vmax.f32 %v1651_v16, 0.0  ;;  %v1216_v59 = vsel %vm1188_vm6, %v1183_v54, %v4538_v47 }
 0x22f   : > { %v1750_v2 = vrot.slane %v1685_v34, 7  ;;  %v1843_v51 = vsel %vm406_vm0, 0.0, %v1749_v32  ;;  %v1249_v63 = vsel %vm1221_vm7, %v1216_v59, %v4540_v62 }
 0x230   : > { %v1747_v56 = vrot.slane %v1683_v37, 7  ;;  %v1019_v11 = vpop.permute.xlu1 %1018  ;;  %v1842_v23 = vsel %vm406_vm0, 0.0, %v1746_v17  ;;  %v1282_v34 = vsel %vm1254_vm8, %v1249_v63, %v4547_v8  ;;  %v989_v8 = vpop.permute.xlu0 %988 }
 0x231   : > { %v1751_v55 = vsel %vm406_vm0, %v1749_v32, %v1750_v2  ;;  %v1859_v36 = vsel %vm406_vm0, %v1750_v2, 0.0  ;;  %v1280_v44 = vsel %vm1254_vm8, %v1247_v1, %v1019_v11  ;;  %v1315_v47 = vsel %vm1287_vm9, %v1282_v34, %v4565_v12 }
 0x232   : > { %v4598_v58 = vpack.c.bf16 %v1751_v55, %v1843_v51  ;;  %v1890_v52 = vpack.c.bf16 %v1859_v36, %v1859_v36  ;;  %v1748_v6 = vsel %vm406_vm0, %v1746_v17, %v1747_v56  ;;  %v1858_v45 = vsel %vm406_vm0, %v1747_v56, 0.0 }
 0x233   : > { %v4602_v46 = vpack.c.bf16 %v1748_v6, %v1842_v23  ;;  %v1889_v24 = vpack.c.bf16 %v1858_v45, %v1858_v45  ;;  %v1348_v2 = vsel %vm1320_vm10, %v1315_v47, %v4575_v7 }
 0x234   : > { %v2150_v49 = vrot.slane %v1890_v52, 1  ;;  %v1051_v41 = vpop.permute.xlu1 %1050  ;;  %2334 = vrot.lane.b32.xlu1 %v4598_v58, %s3647_s10  ;;  %2224 = vrot.lane.b32.xlu0 %v4598_v58, %s3644_s24  ;;  %v2149_v53 = vrot.slane %v4598_v58, 1  ;;  %v1921_v43 = vshll.u32 %v4598_v58, 16  ;;  %v1926_v29 = vshll.u32 %v1890_v52, 16  ;;  %v1025_v36 = vpop.permute.xlu0 %1024 }
 0x235   : > { %v2147_v14 = vrot.slane %v1889_v24, 1  ;;  %v2146_v35 = vrot.slane %v4602_v46, 1  ;;  %v1919_v48 = vshrl.u32 %v4598_v58, 16  ;;  %v1313_v28 = vsel %vm1287_vm9, %v1280_v44, %v1051_v41 }
 0x236   : > { %v2151_v26 = vsel %vm832_vm1, %v2149_v53, %v2150_v49  ;;  %v1923_v57 = vrot.slane %v1921_v43, 1  ;;  %v1928_v32 = vrot.slane %v1926_v29, 1  ;;  %v1909_v37 = vshll.u32 %v4602_v46, 16 }
 0x237   : > { %v2148_v19 = vsel %vm832_vm1, %v2146_v35, %v2147_v14  ;;  %v1914_v12 = vshll.u32 %v1889_v24, 16  ;;  %v1907_v23 = vshrl.u32 %v4602_v46, 16 }
 0x238   : > { %v1083_v15 = vpop.permute.xlu1 %1082  ;;  %2222 = vrot.lane.b32.xlu1 %v4602_v46, %s3644_s24  ;;  %2304 = vrot.lane.b32.xlu0 %v2151_v26, %s3645_s25  ;;  %v1924_v4 = vor.u32 %v1923_v57, %v1919_v48  ;;  %v1911_v11 = vrot.slane %v1909_v37, 1  ;;  %v4657_v49 = vpop.permute.xlu0 %1056 }
 0x239   : > { %v1346_v16 = vsel %vm1320_vm10, %v1313_v28, %v1083_v15  ;;  %v1916_v52 = vrot.slane %v1914_v12, 1 }
 0x23a   : > { %v1929_v17 = vsel %vm575_vm2, %v1924_v4, %v1928_v32  ;;  %v1912_v7 = vor.u32 %v1911_v11, %v1907_v23 }
 0x23c   : > { %v1115_v9 = vpop.permute.xlu1 %1114  ;;  %2394 = vrot.lane.b32.xlu1 %v2151_v26, %s3648_s12  ;;  %2191 = vrot.lane.b32.xlu0 %v2148_v19, %s3642_s22  ;;  %v1917_v6 = vsel %vm575_vm2, %v1912_v7, %v1916_v52  ;;  %v4660_v24 = vpop.permute.xlu0 %1088 }
 0x23d   : > { %v1379_v30 = vsel %vm1353_vm11, %v1346_v16, %v1115_v9 }
 0x23e   : > { %3458 = vmatprep.mubr.msk.bf16.mxu0 %vm1406_vm12, %v1379_v30 }
 0x240   : > { %v1117_v62 = vpop.permute.xlu1 %1116  ;;  %2193 = vrot.lane.b32.xlu1 %v2151_v26, %s3642_s22  ;;  %2268 = vrot.lane.b32.xlu0 %v1929_v17, %s3646_s26  ;;  %v1154_v26 = vsel %vm1122_vm4, %v4225_v0, %v4592_v22  ;;  %v4676_v42 = vpop.permute.xlu0 %1120 }
 0x241   : > { %v1381_v56 = vsel %vm1353_vm11, %v1348_v2, %v1117_v62  ;;  %v1187_v38 = vsel %vm1155_vm5, %v1154_v26, %v912_v50 }
 0x242   : > { %3459 = vmatmul.mubr.msk.bf16.gmra.mrb[24].mxu0 %vm1406_vm12, %v1381_v56  ;;  %v1220_v5 = vsel %vm1188_vm6, %v1187_v38, %v945_v3 }
 0x243   : > { %v1253_v57 = vsel %vm1221_vm7, %v1220_v5, %v989_v8 }
 0x244   : > { %v910_v51 = vpop.permute.xlu1 %909  ;;  %2302 = vrot.lane.b32.xlu1 %v2148_v19, %s3645_s25  ;;  %2088 = vrot.lane.b32.xlu0 %v1929_v17, %s3643_s23  ;;  %v1286_v61 = vsel %vm1254_vm8, %v1253_v57, %v1025_v36 }
 0x245   : > { %v1185_v43 = vsel %vm1155_vm5, %v1152_v25, %v910_v51  ;;  %v1319_v22 = vsel %vm1287_vm9, %v1286_v61, %v4657_v49 }
 0x246   : > { %v1352_v48 = vsel %vm1320_vm10, %v1319_v22, %v4660_v24 }
 0x247   : > { %v1385_v44 = vsel %vm1353_vm11, %v1352_v48, %v4676_v42 }
 0x248   : > { %v943_v55 = vpop.permute.xlu1 %942  ;;  %2364 = vrot.lane.b32.xlu1 %v1929_v17, %s3649_s20 }
 0x249   : > { %v1218_v14 = vsel %vm1188_vm6, %v1185_v43, %v943_v55 }
 0x24c   : > { %v987_v45 = vpop.permute.xlu1 %986  ;;  %2086 = vrot.lane.b32.xlu1 %v1917_v6, %s3643_s23 }
 0x24d   : > { %v1251_v15 = vsel %vm1221_vm7, %v1218_v14, %v987_v45  ;;  %v3568_v45 = vld [vmem:[%s5681_s4] sm:$0xff]  }
 0x24e   : > { %3466 = vmatprep.subr.bf16.mxu1 %v3568_v45 }
 0x24f   : > { %3467 = vmatpush3.bf16.msra.mxu1 %v3568_v45 }
 0x250   : > { %v1023_v41 = vpop.permute.xlu1 %1022  ;;  %2266 = vrot.lane.b32.xlu1 %v1917_v6, %s3646_s26 }
 0x251   : > { %v1284_v29 = vsel %vm1254_vm8, %v1251_v15, %v1023_v41 }
 0x254   : > { %v1055_v53 = vpop.permute.xlu1 %1054 }
 0x255   : > { %v1317_v0 = vsel %vm1287_vm9, %v1284_v29, %v1055_v53  ;;  %v3569_v29 = vld [vmem:[%s5681_s4 + $0x8] sm:$0xff]  }
 0x256   : > { %3468 = vmatprep.subr.bf16.mxu1 %v3569_v29 }
 0x257   : > { %3469 = vmatpush3.bf16.msra.mxu1 %v3569_v29 }
 0x258   : > { %v1087_v35 = vpop.permute.xlu1 %1086 }
 0x259   : > { %v1350_v50 = vsel %vm1320_vm10, %v1317_v0, %v1087_v35 }
 0x25c   : > { %v1119_v1 = vpop.permute.xlu1 %1118 }
 0x25d   : > { %v1383_v10 = vsel %vm1353_vm11, %v1350_v50, %v1119_v1  ;;  %v3570_v1 = vld [vmem:[%s5681_s4 + $0x10] ss:$0 sps:$4 sm:$0x33]  }
 0x25e   : > { %3462 = vmatprep.mubr.msk.bf16.mxu0 %vm1406_vm12, %v1383_v10  ;;  %3505 = vmatprep.subr.msk.bf16.mxu1 %vm1439_vm3, %v3570_v1 }
 0x25f   : > { %3463 = vmatmul.mubr.msk.bf16.gmra.mrb[28].mxu0 %vm1406_vm12, %v1385_v44  ;;  %v2726_v44 = vsel %vm1439_vm3, %v3570_v1, 0 }
 0x260   : > { %3471 = vmatpush3.bf16.msra.mxu1 %v2726_v44 }
 0x262   : > { %v3440_v54 = vpop.f32.mrb[4].mxu0 }
 0x263   : > { %v1617_v28 = vmul.f32 %v3440_v54, %v4573_v39  ;;  %v1493_v19 = vpop.f32.mrb[5].mxu0 }
 0x264   : > { %v1615_v4 = vmul.f32 %v4573_v39, %v1493_v19  ;;  %v3441_v59 = vpop.f32.mrb[6].mxu0 }
 0x265   : > { %v1656_v16 = vadd.f32 %v4580_v40, %v1617_v28  ;;  %v1618_v9 = vmul.f32 %v3441_v59, %v4573_v39  ;;  %v1496_v63 = vpop.f32.mrb[7].mxu0 }
 0x266   : > { %v1654_v3 = vadd.f32 %v4580_v40, %v1615_v4  ;;  %v1616_v30 = vmul.f32 %v4573_v39, %v1496_v63 }
 0x267   : > { %v1688_v32 = vmax.f32 %v1656_v16, 0.0  ;;  %v1657_v34 = vadd.f32 %v4580_v40, %v1618_v9 }
 0x268   : > { %v1686_v47 = vmax.f32 %v1654_v3, 0.0  ;;  %v1655_v17 = vadd.f32 %v4580_v40, %v1616_v30 }
 0x269   : > { %v1755_v37 = vrot.slane %v1688_v32, 7  ;;  %v1689_v2 = vmax.f32 %v1657_v34, 0.0 }
 0x26a   : > { %v1752_v62 = vrot.slane %v1686_v47, 7  ;;  %v1687_v56 = vmax.f32 %v1655_v17, 0.0 }
 0x26b   : > { %v1756_v8 = vrot.slane %v1689_v2, 7  ;;  %v1845_v51 = vsel %vm406_vm0, 0.0, %v1755_v37 }
 0x26c   : > { %v1753_v11 = vrot.slane %v1687_v56, 7  ;;  %v1844_v7 = vsel %vm406_vm0, 0.0, %v1752_v62 }
 0x26d   : > { %v1757_v12 = vsel %vm406_vm0, %v1755_v37, %v1756_v8  ;;  %v1861_v23 = vsel %vm406_vm0, %v1756_v8, 0.0 }
 0x26e   : > { %v4701_v55 = vpack.c.bf16 %v1757_v12, %v1845_v51  ;;  %v1754_v36 = vsel %vm406_vm0, %v1752_v62, %v1753_v11  ;;  %v1892_v52 = vpack.c.bf16 %v1861_v23, %v1861_v23  ;;  %v1860_v41 = vsel %vm406_vm0, %v1753_v11, 0.0 }
 0x26f   : > { %v4704_v6 = vpack.c.bf16 %v1754_v36, %v1844_v7  ;;  %v1891_v25 = vpack.c.bf16 %v1860_v41, %v1860_v41 }
 0x270   : > { %2338 = vrot.lane.b32.xlu1 %v4701_v55, %s3647_s10  ;;  %2228 = vrot.lane.b32.xlu0 %v4701_v55, %s3644_s24  ;;  %v2156_v53 = vrot.slane %v1892_v52, 1  ;;  %v2155_v26 = vrot.slane %v4701_v55, 1  ;;  %v1945_v43 = vshll.u32 %v4701_v55, 16  ;;  %v1950_v15 = vshll.u32 %v1892_v52, 16 }
 0x271   : > { %v2153_v38 = vrot.slane %v1891_v25, 1  ;;  %v2152_v35 = vrot.slane %v4704_v6, 1  ;;  %v1943_v57 = vshrl.u32 %v4701_v55, 16  ;;  %v1933_v22 = vshll.u32 %v4704_v6, 16 }
 0x272   : > { %v2157_v14 = vsel %vm832_vm1, %v2155_v26, %v2156_v53  ;;  %v1947_v5 = vrot.slane %v1945_v43, 1  ;;  %v1952_v50 = vrot.slane %v1950_v15, 1  ;;  %v1938_v54 = vshll.u32 %v1891_v25, 16 }
 0x273   : > { %v2154_v61 = vsel %vm832_vm1, %v2152_v35, %v2153_v38  ;;  %v1935_v10 = vrot.slane %v1933_v22, 1  ;;  %v1931_v28 = vshrl.u32 %v4704_v6, 16 }
 0x274   : > { %2226 = vrot.lane.b32.xlu1 %v4704_v6, %s3644_s24  ;;  %2336 = vrot.lane.b32.xlu0 %v4704_v6, %s3647_s10  ;;  %v1948_v0 = vor.u32 %v1947_v5, %v1943_v57  ;;  %v1940_v4 = vrot.slane %v1938_v54, 1 }
 0x275   : > { %v1936_v19 = vor.u32 %v1935_v10, %v1931_v28 }
 0x276   : > { %v1953_v48 = vsel %vm575_vm2, %v1948_v0, %v1952_v50 }
 0x277   : > { %v1941_v59 = vsel %vm575_vm2, %v1936_v19, %v1940_v4 }
 0x278   : > { %2398 = vrot.lane.b32.xlu1 %v2157_v14, %s3648_s12  ;;  %2308 = vrot.lane.b32.xlu0 %v2157_v14, %s3645_s25 }
 0x27c   : > { %2197 = vrot.lane.b32.xlu1 %v2157_v14, %s3642_s22  ;;  %2195 = vrot.lane.b32.xlu0 %v2154_v61, %s3642_s22 }
 0x280   : > { %2396 = vrot.lane.b32.xlu1 %v2154_v61, %s3648_s12  ;;  %2272 = vrot.lane.b32.xlu0 %v1953_v48, %s3646_s26 }
 0x284   : > { %2306 = vrot.lane.b32.xlu1 %v2154_v61, %s3645_s25  ;;  %2092 = vrot.lane.b32.xlu0 %v1953_v48, %s3643_s23 }
 0x288   : > { %2368 = vrot.lane.b32.xlu1 %v1953_v48, %s3649_s20  ;;  %2366 = vrot.lane.b32.xlu0 %v1941_v59, %s3649_s20 }
 0x28c   : > { %2270 = vrot.lane.b32.xlu1 %v1941_v59, %s3646_s26  ;;  %2090 = vrot.lane.b32.xlu0 %v1941_v59, %s3643_s23 }
 0x295   : > { %v3444_v16 = vpop.f32.mrb[8].mxu0 }
 0x296   : > { %v1621_v9 = vmul.f32 %v3444_v16, %v4573_v39  ;;  %v1509_v63 = vpop.f32.mrb[9].mxu0 }
 0x297   : > { %v1619_v3 = vmul.f32 %v4573_v39, %v1509_v63  ;;  %v3445_v30 = vpop.f32.mrb[10].mxu0 }
 0x298   : > { %v1660_v32 = vadd.f32 %v4580_v40, %v1621_v9  ;;  %v1622_v34 = vmul.f32 %v3445_v30, %v4573_v39  ;;  %v1512_v47 = vpop.f32.mrb[11].mxu0 }
 0x299   : > { %v1658_v17 = vadd.f32 %v4580_v40, %v1619_v3  ;;  %v1620_v37 = vmul.f32 %v4573_v39, %v1512_v47 }
 0x29a   : > { %v1692_v2 = vmax.f32 %v1660_v32, 0.0  ;;  %v1661_v62 = vadd.f32 %v4580_v40, %v1622_v34 }
 0x29b   : > { %v1690_v56 = vmax.f32 %v1658_v17, 0.0  ;;  %v1659_v8 = vadd.f32 %v4580_v40, %v1620_v37 }
 0x29c   : > { %v1761_v11 = vrot.slane %v1692_v2, 7  ;;  %v1693_v51 = vmax.f32 %v1661_v62, 0.0 }
 0x29d   : > { %v1758_v12 = vrot.slane %v1690_v56, 7  ;;  %v1691_v23 = vmax.f32 %v1659_v8, 0.0 }
 0x29e   : > { %v1762_v7 = vrot.slane %v1693_v51, 7  ;;  %v1847_v52 = vsel %vm406_vm0, 0.0, %v1761_v11 }
 0x29f   : > { %v1759_v36 = vrot.slane %v1691_v23, 7  ;;  %v1846_v53 = vsel %vm406_vm0, 0.0, %v1758_v12 }
 0x2a0   : > { %v1763_v45 = vsel %vm406_vm0, %v1761_v11, %v1762_v7  ;;  %v1863_v41 = vsel %vm406_vm0, %v1762_v7, 0.0 }
 0x2a1   : > { %v4760_v25 = vpack.c.bf16 %v1763_v45, %v1847_v52  ;;  %v1760_v26 = vsel %vm406_vm0, %v1758_v12, %v1759_v36  ;;  %v1894_v43 = vpack.c.bf16 %v1863_v41, %v1863_v41  ;;  %v1862_v14 = vsel %vm406_vm0, %v1759_v36, 0.0 }
 0x2a2   : > { %v4763_v38 = vpack.c.bf16 %v1760_v26, %v1846_v53  ;;  %v1893_v5 = vpack.c.bf16 %v1862_v14, %v1862_v14 }
 0x2a3   : > { %2342 = vrot.lane.b32.xlu1 %v4760_v25, %s3647_s10  ;;  %2232 = vrot.lane.b32.xlu0 %v4760_v25, %s3644_s24  ;;  %v2162_v35 = vrot.slane %v1894_v43, 1  ;;  %v2161_v57 = vrot.slane %v4760_v25, 1  ;;  %v1969_v29 = vshll.u32 %v4760_v25, 16  ;;  %v1974_v48 = vshll.u32 %v1894_v43, 16 }
 0x2a4   : > { %v2159_v61 = vrot.slane %v1893_v5, 1  ;;  %v2158_v50 = vrot.slane %v4763_v38, 1  ;;  %v1967_v10 = vshrl.u32 %v4760_v25, 16  ;;  %v1957_v19 = vshll.u32 %v4763_v38, 16 }
 0x2a5   : > { %v2163_v22 = vsel %vm832_vm1, %v2161_v57, %v2162_v35  ;;  %v1971_v1 = vrot.slane %v1969_v29, 1  ;;  %v1976_v4 = vrot.slane %v1974_v48, 1  ;;  %v1962_v63 = vshll.u32 %v1893_v5, 16 }
 0x2a6   : > { %v4770_v15 = vpop.permute.xlu1 %2334  ;;  %v2160_v54 = vsel %vm832_vm1, %v2158_v50, %v2159_v61  ;;  %v1959_v9 = vrot.slane %v1957_v19, 1  ;;  %v1955_v3 = vshrl.u32 %v4763_v38, 16 }
 0x2a7   : > { %2230 = vrot.lane.b32.xlu1 %v4763_v38, %s3644_s24  ;;  %2340 = vrot.lane.b32.xlu0 %v4763_v38, %s3647_s10  ;;  %v1972_v28 = vor.u32 %v1971_v1, %v1967_v10  ;;  %v1964_v11 = vrot.slane %v1962_v63, 1 }
 0x2a8   : > { %v1960_v17 = vor.u32 %v1959_v9, %v1955_v3 }
 0x2a9   : > { %v1977_v16 = vsel %vm575_vm2, %v1972_v28, %v1976_v4 }
 0x2aa   : > { %v2223_v0 = vpop.permute.xlu1 %2222  ;;  %v1965_v52 = vsel %vm575_vm2, %v1960_v17, %v1964_v11 }
 0x2ab   : > { %2402 = vrot.lane.b32.xlu1 %v2163_v22, %s3648_s12  ;;  %2312 = vrot.lane.b32.xlu0 %v2163_v22, %s3645_s25  ;;  %v2485_v10 = vsel %vm1188_vm6, %v4169_v33, %v2223_v0  ;;  %v4832_v0 = vpop.permute.xlu0 %2224 }
 0x2ae   : > { %v4783_v44 = vpop.permute.xlu1 %2394 }
 0x2af   : > { %2201 = vrot.lane.b32.xlu1 %v2163_v22, %s3642_s22  ;;  %2199 = vrot.lane.b32.xlu0 %v2160_v54, %s3642_s22 }
 0x2b2   : > { %v4789_v59 = vpop.permute.xlu1 %2193 }
 0x2b3   : > { %2400 = vrot.lane.b32.xlu1 %v2160_v54, %s3648_s12  ;;  %2276 = vrot.lane.b32.xlu0 %v1977_v16, %s3646_s26 }
 0x2b5   : > { %v3448_v30 = vpop.f32.mrb[12].mxu0 }
 0x2b6   : > { %v1625_v32 = vmul.f32 %v3448_v30, %v4573_v39  ;;  %v2303_v34 = vpop.permute.xlu1 %2302  ;;  %v1525_v47 = vpop.f32.mrb[13].mxu0 }
 0x2b7   : > { %v1623_v37 = vmul.f32 %v4573_v39, %v1525_v47  ;;  %2310 = vrot.lane.b32.xlu1 %v2160_v54, %s3645_s25  ;;  %v3449_v2 = vpop.f32.mrb[14].mxu0  ;;  %2096 = vrot.lane.b32.xlu0 %v1977_v16, %s3643_s23 }
 0x2b8   : > { %v1664_v62 = vadd.f32 %v4580_v40, %v1625_v32  ;;  %v1626_v56 = vmul.f32 %v3449_v2, %v4573_v39  ;;  %v1528_v8 = vpop.f32.mrb[15].mxu0 }
 0x2b9   : > { %v1662_v51 = vadd.f32 %v4580_v40, %v1623_v37  ;;  %v1624_v12 = vmul.f32 %v4573_v39, %v1528_v8 }
 0x2ba   : > { %v1696_v23 = vmax.f32 %v1664_v62, 0.0  ;;  %v1665_v7 = vadd.f32 %v4580_v40, %v1626_v56  ;;  %v2365_v36 = vpop.permute.xlu1 %2364  ;;  %v4848_v62 = vpop.permute.xlu0 %2304 }
 0x2bb   : > { %v1694_v45 = vmax.f32 %v1662_v51, 0.0  ;;  %v1663_v41 = vadd.f32 %v4580_v40, %v1624_v12  ;;  %2372 = vrot.lane.b32.xlu1 %v1977_v16, %s3649_s20  ;;  %2370 = vrot.lane.b32.xlu0 %v1965_v52, %s3649_s20 }
 0x2bc   : > { %v1767_v53 = vrot.slane %v1696_v23, 7  ;;  %v1697_v26 = vmax.f32 %v1665_v7, 0.0 }
 0x2bd   : > { %v1764_v43 = vrot.slane %v1694_v45, 7  ;;  %v1695_v14 = vmax.f32 %v1663_v41, 0.0 }
 0x2be   : > { %v1768_v35 = vrot.slane %v1697_v26, 7  ;;  %v4808_v5 = vpop.permute.xlu1 %2086  ;;  %v1849_v29 = vsel %vm406_vm0, 0.0, %v1767_v53  ;;  %v4855_v23 = vpop.permute.xlu0 %2191 }
 0x2bf   : > { %v1765_v57 = vrot.slane %v1695_v14, 7  ;;  %2274 = vrot.lane.b32.xlu1 %v1965_v52, %s3646_s26  ;;  %2094 = vrot.lane.b32.xlu0 %v1965_v52, %s3643_s23  ;;  %v1848_v50 = vsel %vm406_vm0, 0.0, %v1764_v43 }
 0x2c0   : > { %v1769_v61 = vsel %vm406_vm0, %v1767_v53, %v1768_v35  ;;  %v1865_v22 = vsel %vm406_vm0, %v1768_v35, 0.0 }
 0x2c1   : > { %v4816_v1 = vpack.c.bf16 %v1769_v61, %v1849_v29  ;;  %v1766_v48 = vsel %vm406_vm0, %v1764_v43, %v1765_v57  ;;  %v1896_v54 = vpack.c.bf16 %v1865_v22, %v1865_v22  ;;  %v1864_v28 = vsel %vm406_vm0, %v1765_v57, 0.0 }
 0x2c2   : > { %v4822_v19 = vpack.c.bf16 %v1766_v48, %v1848_v50  ;;  %v2267_v4 = vpop.permute.xlu1 %2266  ;;  %v1895_v63 = vpack.c.bf16 %v1864_v28, %v1864_v28  ;;  %v4865_v57 = vpop.permute.xlu0 %2268 }
 0x2c3   : > { %v2517_v16 = vsel %vm1221_vm7, %v2485_v10, %v2267_v4  ;;  %2346 = vrot.lane.b32.xlu1 %v4816_v1, %s3647_s10  ;;  %2236 = vrot.lane.b32.xlu0 %v4816_v1, %s3644_s24  ;;  %v2168_v3 = vrot.slane %v1896_v54, 1  ;;  %v2167_v32 = vrot.slane %v4816_v1, 1  ;;  %v1993_v47 = vshll.u32 %v4816_v1, 16 }
 0x2c4   : > { %v2549_v9 = vsel %vm1254_vm8, %v2517_v16, %v2303_v34  ;;  %v2164_v37 = vrot.slane %v4822_v19, 1  ;;  %v1998_v56 = vshll.u32 %v1896_v54, 16  ;;  %v1991_v8 = vshrl.u32 %v4816_v1, 16 }
 0x2c5   : > { %v2581_v33 = vsel %vm1287_vm9, %v2549_v9, %v4770_v15  ;;  %v2165_v15 = vrot.slane %v1895_v63, 1  ;;  %v2169_v17 = vsel %vm832_vm1, %v2167_v32, %v2168_v3  ;;  %v1995_v2 = vrot.slane %v1993_v47, 1 }
 0x2c6   : > { %v2612_v30 = vsel %vm1320_vm10, %v2581_v33, %v2365_v36  ;;  %v1981_v51 = vshll.u32 %v4822_v19, 16  ;;  %v2000_v12 = vrot.slane %v1998_v56, 1  ;;  %v1986_v52 = vshll.u32 %v1895_v63, 16  ;;  %v4876_v32 = vpop.permute.xlu0 %2088 }
 0x2c7   : > { %2234 = vrot.lane.b32.xlu1 %v4822_v19, %s3644_s24  ;;  %2344 = vrot.lane.b32.xlu0 %v4822_v19, %s3647_s10  ;;  %v2643_v34 = vsel %vm1353_vm11, %v2612_v30, %v4783_v44  ;;  %v2166_v11 = vsel %vm832_vm1, %v2164_v37, %v2165_v15  ;;  %v1996_v44 = vor.u32 %v1995_v2, %v1991_v8  ;;  %v1979_v45 = vshrl.u32 %v4822_v19, 16 }
 0x2c8   : > { %3472 = vmatprep.mubr.msk.bf16.mxu1 %vm1406_vm12, %v2643_v34  ;;  %v1983_v36 = vrot.slane %v1981_v51, 1  ;;  %v1988_v50 = vrot.slane %v1986_v52, 1 }
 0x2c9   : > { %v2001_v7 = vsel %vm575_vm2, %v1996_v44, %v2000_v12 }
 0x2ca   : > { %v1984_v43 = vor.u32 %v1983_v36, %v1979_v45 }
 0x2cb   : > { %2406 = vrot.lane.b32.xlu1 %v2169_v17, %s3648_s12  ;;  %2316 = vrot.lane.b32.xlu0 %v2169_v17, %s3645_s25 }
 0x2cc   : > { %v1989_v4 = vsel %vm575_vm2, %v1984_v43, %v1988_v50 }
 0x2cf   : > { %2205 = vrot.lane.b32.xlu1 %v2169_v17, %s3642_s22  ;;  %2203 = vrot.lane.b32.xlu0 %v2166_v11, %s3642_s22 }
 0x2d3   : > { %2404 = vrot.lane.b32.xlu1 %v2166_v11, %s3648_s12  ;;  %2280 = vrot.lane.b32.xlu0 %v2001_v7, %s3646_s26 }
 0x2d5   : > { %v3452_v41 = vpop.f32.mrb[16].mxu0 }
 0x2d6   : > { %v1629_v53 = vmul.f32 %v3452_v41, %v4573_v39  ;;  %v1541_v26 = vpop.f32.mrb[17].mxu0 }
 0x2d7   : > { %v1627_v14 = vmul.f32 %v4573_v39, %v1541_v26  ;;  %2314 = vrot.lane.b32.xlu1 %v2166_v11, %s3645_s25  ;;  %v3453_v35 = vpop.f32.mrb[18].mxu0  ;;  %2100 = vrot.lane.b32.xlu0 %v2001_v7, %s3643_s23 }
 0x2d8   : > { %v1668_v29 = vadd.f32 %v4580_v40, %v1629_v53  ;;  %v1630_v61 = vmul.f32 %v3453_v35, %v4573_v39  ;;  %v1544_v22 = vpop.f32.mrb[19].mxu0 }
 0x2d9   : > { %v1666_v48 = vadd.f32 %v4580_v40, %v1627_v14  ;;  %v1628_v10 = vmul.f32 %v4573_v39, %v1544_v22 }
 0x2da   : > { %v1700_v54 = vmax.f32 %v1668_v29, 0.0  ;;  %v1669_v28 = vadd.f32 %v4580_v40, %v1630_v61 }
 0x2db   : > { %v1698_v16 = vmax.f32 %v1666_v48, 0.0  ;;  %v1667_v9 = vadd.f32 %v4580_v40, %v1628_v10  ;;  %2376 = vrot.lane.b32.xlu1 %v2001_v7, %s3649_s20  ;;  %2374 = vrot.lane.b32.xlu0 %v1989_v4, %s3649_s20  ;;  %v2425_v10 = vsel %vm1122_vm4, %v4602_v46, %v4808_v5 }
 0x2dc   : > { %v1773_v63 = vrot.slane %v1700_v54, 7  ;;  %v1701_v33 = vmax.f32 %v1669_v28, 0.0 }
 0x2dd   : > { %v1770_v3 = vrot.slane %v1698_v16, 7  ;;  %v1699_v30 = vmax.f32 %v1667_v9, 0.0 }
 0x2de   : > { %v1774_v47 = vrot.slane %v1701_v33, 7  ;;  %v1851_v15 = vsel %vm406_vm0, 0.0, %v1773_v63  ;;  %v2455_v33 = vsel %vm1155_vm5, %v2425_v10, %v4855_v23 }
 0x2df   : > { %v1771_v34 = vrot.slane %v1699_v30, 7  ;;  %2278 = vrot.lane.b32.xlu1 %v1989_v4, %s3646_s26  ;;  %2098 = vrot.lane.b32.xlu0 %v1989_v4, %s3643_s23  ;;  %v1850_v2 = vsel %vm406_vm0, 0.0, %v1770_v3 }
 0x2e0   : > { %v1775_v17 = vsel %vm406_vm0, %v1773_v63, %v1774_v47  ;;  %v1867_v37 = vsel %vm406_vm0, %v1774_v47, 0.0  ;;  %v2487_v47 = vsel %vm1188_vm6, %v2455_v33, %v4832_v0 }
 0x2e1   : > { %v4884_v56 = vpack.c.bf16 %v1775_v17, %v1851_v15  ;;  %v1772_v8 = vsel %vm406_vm0, %v1770_v3, %v1771_v34  ;;  %v1898_v11 = vpack.c.bf16 %v1867_v37, %v1867_v37  ;;  %v1866_v7 = vsel %vm406_vm0, %v1771_v34, 0.0 }
 0x2e2   : > { %v4887_v44 = vpack.c.bf16 %v1772_v8, %v1850_v2  ;;  %v4889_v51 = vpop.permute.xlu1 %2338  ;;  %v4891_v12 = vpop.permute.xlu0 %2228  ;;  %v1897_v52 = vpack.c.bf16 %v1866_v7, %v1866_v7 }
 0x2e3   : > { %2350 = vrot.lane.b32.xlu1 %v4884_v56, %s3647_s10  ;;  %2240 = vrot.lane.b32.xlu0 %v4884_v56, %s3644_s24  ;;  %v2174_v36 = vrot.slane %v1898_v11, 1  ;;  %v2173_v53 = vrot.slane %v4884_v56, 1  ;;  %v2017_v26 = vshll.u32 %v4884_v56, 16  ;;  %v2022_v50 = vshll.u32 %v1898_v11, 16 }
 0x2e4   : > { %v2171_v43 = vrot.slane %v1897_v52, 1  ;;  %v2170_v61 = vrot.slane %v4887_v44, 1  ;;  %v2015_v48 = vshrl.u32 %v4884_v56, 16  ;;  %v2005_v9 = vshll.u32 %v4887_v44, 16 }
 0x2e5   : > { %v2175_v29 = vsel %vm832_vm1, %v2173_v53, %v2174_v36  ;;  %v2019_v22 = vrot.slane %v2017_v26, 1  ;;  %v2024_v63 = vrot.slane %v2022_v50, 1  ;;  %v2010_v34 = vshll.u32 %v1897_v52, 16 }
 0x2e6   : > { %v4898_v45 = vpop.permute.xlu1 %2226  ;;  %v2337_v41 = vpop.permute.xlu0 %2336  ;;  %v2172_v4 = vsel %vm832_vm1, %v2170_v61, %v2171_v43  ;;  %v2007_v5 = vrot.slane %v2005_v9, 1  ;;  %v2003_v15 = vshrl.u32 %v4887_v44, 16  ;;  %v2519_v11 = vsel %vm1221_vm7, %v2487_v47, %v4865_v57 }
 0x2e7   : > { %2238 = vrot.lane.b32.xlu1 %v4887_v44, %s3644_s24  ;;  %2348 = vrot.lane.b32.xlu0 %v4887_v44, %s3647_s10  ;;  %v2020_v16 = vor.u32 %v2019_v22, %v2015_v48  ;;  %v2012_v43 = vrot.slane %v2010_v34, 1  ;;  %v2551_v22 = vsel %vm1254_vm8, %v2519_v11, %v4848_v62 }
 0x2e8   : > { %v2008_v8 = vor.u32 %v2007_v5, %v2003_v15 }
 0x2e9   : > { %v2025_v46 = vsel %vm575_vm2, %v2020_v16, %v2024_v63  ;;  %v2583_v16 = vsel %vm1287_vm9, %v2551_v22, %v2337_v41 }
 0x2ea   : > { %v4906_v14 = vpop.permute.xlu1 %2398  ;;  %v4908_v35 = vpop.permute.xlu0 %2308 }
 0x2eb   : > { %2410 = vrot.lane.b32.xlu1 %v2175_v29, %s3648_s12  ;;  %2320 = vrot.lane.b32.xlu0 %v2175_v29, %s3645_s25 }
 0x2ee   : > { %v4918_v54 = vpop.permute.xlu1 %2197  ;;  %v4920_v28 = vpop.permute.xlu0 %2195 }
 0x2ef   : > { %2209 = vrot.lane.b32.xlu1 %v2175_v29, %s3642_s22  ;;  %2207 = vrot.lane.b32.xlu0 %v2172_v4, %s3642_s22  ;;  %v2427_v29 = vsel %vm1122_vm4, %v4598_v58, %v4876_v32 }
 0x2f0   : > { %v2457_v32 = vsel %vm1155_vm5, %v2427_v29, %v4789_v59 }
 0x2f1   : > { %v2489_v41 = vsel %vm1188_vm6, %v2457_v32, %v4898_v45 }
 0x2f2   : > { %v2397_v3 = vpop.permute.xlu1 %2396  ;;  %v4928_v30 = vpop.permute.xlu0 %2272 }
 0x2f3   : > { %2408 = vrot.lane.b32.xlu1 %v2172_v4, %s3648_s12  ;;  %2284 = vrot.lane.b32.xlu0 %v2025_v46, %s3646_s26 }
 0x2f5   : > { %v3456_v17 = vpop.f32.mrb[20].mxu0 }
 0x2f6   : > { %v1633_v37 = vmul.f32 %v3456_v17, %v4573_v39  ;;  %v2307_v23 = vpop.permute.xlu1 %2306  ;;  %v1557_v2 = vpop.f32.mrb[21].mxu0 }
 0x2f7   : > { %v1631_v7 = vmul.f32 %v4573_v39, %v1557_v2  ;;  %v4940_v36 = vpop.permute.xlu0 %2092  ;;  %2318 = vrot.lane.b32.xlu1 %v2172_v4, %s3645_s25  ;;  %v3457_v53 = vpop.f32.mrb[22].mxu0  ;;  %2104 = vrot.lane.b32.xlu0 %v2025_v46, %s3643_s23  ;;  %v2013_v4 = vsel %vm575_vm2, %v2008_v8, %v2012_v43 }
 0x2f8   : > { %v1672_v0 = vadd.f32 %v4580_v40, %v1633_v37  ;;  %v1634_v52 = vmul.f32 %v3457_v53, %v4573_v39  ;;  %v1560_v26 = vpop.f32.mrb[23].mxu0 }
 0x2f9   : > { %v1670_v57 = vadd.f32 %v4580_v40, %v1631_v7  ;;  %v1632_v61 = vmul.f32 %v4573_v39, %v1560_v26 }
 0x2fa   : > { %v1704_v50 = vmax.f32 %v1672_v0, 0.0  ;;  %v1673_v48 = vadd.f32 %v4580_v40, %v1634_v52  ;;  %v2369_v10 = vpop.permute.xlu1 %2368 }
 0x2fb   : > { %v1702_v9 = vmax.f32 %v1670_v57, 0.0  ;;  %v1671_v63 = vadd.f32 %v4580_v40, %v1632_v61  ;;  %v2367_v33 = vpop.permute.xlu0 %2366  ;;  %2380 = vrot.lane.b32.xlu1 %v2025_v46, %s3649_s20  ;;  %2378 = vrot.lane.b32.xlu0 %v2013_v4, %s3649_s20 }
 0x2fc   : > { %v1779_v39 = vrot.slane %v1704_v50, 7  ;;  %v1705_v58 = vmax.f32 %v1673_v48, 0.0  ;;  %v2614_v62 = vsel %vm1320_vm10, %v2583_v16, %v2367_v33 }
 0x2fd   : > { %v1776_v5 = vrot.slane %v1702_v9, 7  ;;  %v1703_v47 = vmax.f32 %v1671_v63, 0.0  ;;  %v2645_v34 = vsel %vm1353_vm11, %v2614_v62, %v2397_v3 }
 0x2fe   : > { %v1780_v40 = vrot.slane %v1705_v58, 7  ;;  %3473 = vmatmul.mubr.msk.bf16.vlgmr.msra.gmra.mrb[0].mxu1 %vm1406_vm12, %v2645_v34  ;;  %v2271_v46 = vpop.permute.xlu1 %2270  ;;  %v1853_v15 = vsel %vm406_vm0, 0.0, %v1779_v39 }
 0x2ff   : > { %v1777_v17 = vrot.slane %v1703_v47, 7  ;;  %v2521_v37 = vsel %vm1221_vm7, %v2489_v41, %v2271_v46  ;;  %2282 = vrot.lane.b32.xlu1 %v2013_v4, %s3646_s26  ;;  %2102 = vrot.lane.b32.xlu0 %v2013_v4, %s3643_s23  ;;  %v1852_v59 = vsel %vm406_vm0, 0.0, %v1776_v5  ;;  %v2091_v62 = vpop.permute.xlu0 %2090 }
 0x300   : > { %v1781_v3 = vsel %vm406_vm0, %v1779_v39, %v1780_v40  ;;  %v1869_v2 = vsel %vm406_vm0, %v1780_v40, 0.0  ;;  %v2553_v45 = vsel %vm1254_vm8, %v2521_v37, %v2307_v23  ;;  %v5017_v40 = vld [vmem:[%s5679_s2] ss:$0 sm:$0xff] }
 0x301   : > { %v4974_v8 = vpack.c.bf16 %v1781_v3, %v1853_v15  ;;  %v1900_v11 = vpack.c.bf16 %v1869_v2, %v1869_v2  ;;  %v1778_v7 = vsel %vm406_vm0, %v1776_v5, %v1777_v17  ;;  %v1868_v53 = vsel %vm406_vm0, %v1777_v17, 0.0  ;;  %v5029_v2 = vld [vmem:[%s5680_s3] ss:$0 sm:$0xff] }
 0x302   : > { %v4978_v0 = vpack.c.bf16 %v1778_v7, %v1852_v59  ;;  %v1899_v52 = vpack.c.bf16 %v1868_v53, %v1868_v53  ;;  %v2585_v26 = vsel %vm1287_vm9, %v2553_v45, %v4889_v51 }
 0x303   : > { %2354 = vrot.lane.b32.xlu1 %v4974_v8, %s3647_s10  ;;  %2244 = vrot.lane.b32.xlu0 %v4974_v8, %s3644_s24  ;;  %v2616_v23 = vsel %vm1320_vm10, %v2585_v26, %v2369_v10  ;;  %v2180_v29 = vrot.slane %v1900_v11, 1  ;;  %v2179_v22 = vrot.slane %v4974_v8, 1  ;;  %v2041_v51 = vshll.u32 %v4974_v8, 16 }
 0x304   : > { %v2647_v43 = vsel %vm1353_vm11, %v2616_v23, %v4906_v14  ;;  %v2177_v57 = vrot.slane %v1899_v52, 1  ;;  %v2176_v61 = vrot.slane %v4978_v0, 1  ;;  %v2029_v10 = vshll.u32 %v4978_v0, 16 }
 0x305   : > { %3476 = vmatprep.mubr.msk.bf16.mxu1 %vm1406_vm12, %v2647_v43  ;;  %v4999_v14 = vsel %vm832_vm1, %v2179_v22, %v2180_v29  ;;  %v2043_v48 = vrot.slane %v2041_v51, 1  ;;  %v2046_v4 = vshll.u32 %v1900_v11, 16  ;;  %v2039_v16 = vshrl.u32 %v4974_v8, 16 }
 0x306   : > { %v2178_v50 = vsel %vm832_vm1, %v2176_v61, %v2177_v57  ;;  %v2031_v63 = vrot.slane %v2029_v10, 1  ;;  %v2034_v33 = vshll.u32 %v1899_v52, 16  ;;  %v2027_v58 = vshrl.u32 %v4978_v0, 16 }
 0x307   : > { %2242 = vrot.lane.b32.xlu1 %v4978_v0, %s3644_s24  ;;  %2352 = vrot.lane.b32.xlu0 %v4978_v0, %s3647_s10  ;;  %v2044_v9 = vor.u32 %v2043_v48, %v2039_v16  ;;  %v2048_v39 = vrot.slane %v2046_v4, 1 }
 0x308   : > { %v2032_v5 = vor.u32 %v2031_v63, %v2027_v58  ;;  %v2036_v47 = vrot.slane %v2034_v33, 1  ;;  %v2429_v63 = vsel %vm1122_vm4, %v4704_v6, %v2091_v62 }
 0x309   : > { %v2049_v32 = vsel %vm575_vm2, %v2044_v9, %v2048_v39  ;;  %v2459_v6 = vsel %vm1155_vm5, %v2429_v63, %v4920_v28 }
 0x30a   : > { %v2037_v37 = vsel %vm575_vm2, %v2032_v5, %v2036_v47 }
 0x30b   : > { %2412 = vrot.lane.b32.xlu1 %v2178_v50, %s3648_s12  ;;  %2324 = vrot.lane.b32.xlu0 %v4999_v14, %s3645_s25 }
 0x30f   : > { %2322 = vrot.lane.b32.xlu1 %v2178_v50, %s3645_s25  ;;  %2211 = vrot.lane.b32.xlu0 %v2178_v50, %s3642_s22 }
 0x313   : > { %2384 = vrot.lane.b32.xlu1 %v2049_v32, %s3649_s20  ;;  %2288 = vrot.lane.b32.xlu0 %v2049_v32, %s3646_s26 }
 0x315   : > { %v5012_v34 = vpop.permute.xlu1 %2342  ;;  %v3460_v41 = vpop.f32.mrb[24].mxu0 }
 0x316   : > { %v1637_v46 = vmul.f32 %v5017_v40, %v3460_v41  ;;  %v5020_v15 = vpop.permute.xlu0 %2232  ;;  %v1573_v17 = vpop.f32.mrb[25].mxu0 }
 0x317   : > { %v1635_v59 = vmul.f32 %v5017_v40, %v1573_v17  ;;  %2286 = vrot.lane.b32.xlu1 %v2037_v37, %s3646_s26  ;;  %v3461_v3 = vpop.f32.mrb[26].mxu0  ;;  %2382 = vrot.lane.b32.xlu0 %v2037_v37, %s3649_s20 }
 0x318   : > { %v1676_v45 = vadd.f32 %v5029_v2, %v1637_v46  ;;  %v1638_v11 = vmul.f32 %v5017_v40, %v3461_v3  ;;  %v1576_v7 = vpop.f32.mrb[27].mxu0 }
 0x319   : > { %v1674_v53 = vadd.f32 %v5029_v2, %v1635_v59  ;;  %v1636_v52 = vmul.f32 %v5017_v40, %v1576_v7  ;;  %v5035_v26 = vpop.permute.xlu1 %2230 }
 0x31a   : > { %v1708_v23 = vmax.f32 %v1676_v45, 0.0  ;;  %v1677_v43 = vadd.f32 %v5029_v2, %v1638_v11  ;;  %v2341_v29 = vpop.permute.xlu0 %2340 }
 0x31b   : > { %v1706_v57 = vmax.f32 %v1674_v53, 0.0  ;;  %v1675_v61 = vadd.f32 %v5029_v2, %v1636_v52  ;;  %2414 = vrot.lane.b32.xlu1 %v4999_v14, %s3648_s12  ;;  %2106 = vrot.lane.b32.xlu0 %v2037_v37, %s3643_s23  ;;  %v2491_v52 = vsel %vm1188_vm6, %v2459_v6, %v4891_v12  ;;  %v2431_v12 = vsel %vm1122_vm4, %v4701_v55, %v4940_v36 }
 0x31c   : > { %v1785_v22 = vrot.slane %v1708_v23, 7  ;;  %v1709_v51 = vmax.f32 %v1677_v43, 0.0  ;;  %v2461_v55 = vsel %vm1155_vm5, %v2431_v12, %v4918_v54 }
 0x31d   : > { %v1782_v50 = vrot.slane %v1706_v57, 7  ;;  %v1707_v48 = vmax.f32 %v1675_v61, 0.0  ;;  %v5042_v10 = vpop.permute.xlu1 %2402  ;;  %v2493_v36 = vsel %vm1188_vm6, %v2461_v55, %v5035_v26 }
 0x31e   : > { %v1786_v4 = vrot.slane %v1709_v51, 7  ;;  %v5044_v16 = vpop.permute.xlu0 %2312  ;;  %v1855_v33 = vsel %vm406_vm0, 0.0, %v1785_v22 }
 0x31f   : > { %v1783_v9 = vrot.slane %v1707_v48, 7  ;;  %2108 = vrot.lane.b32.xlu0 %v2049_v32, %s3643_s23  ;;  %v1854_v58 = vsel %vm406_vm0, 0.0, %v1782_v50 }
 0x320   : > { %v1787_v39 = vsel %vm406_vm0, %v1785_v22, %v1786_v4  ;;  %v2523_v22 = vsel %vm1221_vm7, %v2491_v52, %v4928_v30  ;;  %v1871_v48 = vsel %vm406_vm0, %v1786_v4, 0.0 }
 0x321   : > { %v5052_v5 = vpack.c.bf16 %v1787_v39, %v1855_v33  ;;  %v1784_v47 = vsel %vm406_vm0, %v1782_v50, %v1783_v9  ;;  %v1870_v41 = vsel %vm406_vm0, %v1783_v9, 0.0  ;;  %v5056_v46 = vpop.permute.xlu1 %2201  ;;  %v2555_v9 = vsel %vm1254_vm8, %v2523_v22, %v4908_v35 }
 0x322   : > { %v5058_v17 = vpack.c.bf16 %v1784_v47, %v1854_v58  ;;  %v1901_v32 = vpack.c.bf16 %v1870_v41, %v1870_v41  ;;  %v5060_v37 = vpop.permute.xlu0 %2199  ;;  %v2587_v30 = vsel %vm1287_vm9, %v2555_v9, %v2341_v29  ;;  %v5094_v58 = vpack.c.bf16 %v1871_v48, %v1871_v48 }
 0x324   : > { %v2183_v62 = vrot.slane %v1901_v32, 1  ;;  %2356 = vrot.lane.b32.xlu0 %v5058_v17, %s3647_s10  ;;  %v2182_v59 = vrot.slane %v5058_v17, 1  ;;  %v2058_v3 = vshll.u32 %v1901_v32, 16  ;;  %v2053_v11 = vshll.u32 %v5058_v17, 16 }
 0x325   : > { %v2401_v45 = vpop.permute.xlu1 %2400  ;;  %v2051_v28 = vshrl.u32 %v5058_v17, 16 }
 0x326   : > { %v5068_v7 = vpop.permute.xlu0 %2276  ;;  %v2184_v53 = vsel %vm832_vm1, %v2182_v59, %v2183_v62  ;;  %v2055_v23 = vrot.slane %v2053_v11, 1  ;;  %v2060_v61 = vrot.slane %v2058_v3, 1  ;;  %v2070_v59 = vshll.u32 %v5094_v58, 16 }
 0x327   : > { %2416 = vrot.lane.b32.xlu1 %v2184_v53, %s3648_s12 }
 0x328   : > { %v2056_v57 = vor.u32 %v2055_v23, %v2051_v28 }
 0x329   : > { %v2311_v43 = vpop.permute.xlu1 %2310 }
 0x32a   : > { %v5077_v51 = vpop.permute.xlu0 %2096  ;;  %v2061_v50 = vsel %vm575_vm2, %v2056_v57, %v2060_v61  ;;  %v2063_v57 = vshrl.u32 %v5052_v5, 16 }
 0x32b   : > { %2213 = vrot.lane.b32.xlu1 %v4999_v14, %s3642_s22  ;;  %2386 = vrot.lane.b32.xlu0 %v2061_v50, %s3649_s20  ;;  %v2065_v14 = vshll.u32 %v5052_v5, 16 }
 0x32d   : > { %v2373_v63 = vpop.permute.xlu1 %2372  ;;  %v2067_v62 = vrot.slane %v2065_v14, 1  ;;  %v2072_v14 = vrot.slane %v2070_v59, 1 }
 0x32e   : > { %v2371_v33 = vpop.permute.xlu0 %2370 }
 0x32f   : > { %v2618_v39 = vsel %vm1320_vm10, %v2587_v30, %v2371_v33  ;;  %2246 = vrot.lane.b32.xlu1 %v5058_v17, %s3644_s24  ;;  %2110 = vrot.lane.b32.xlu0 %v2061_v50, %s3643_s23  ;;  %v2068_v9 = vor.u32 %v2067_v62, %v2063_v57 }
 0x330   : > { %v2649_v35 = vsel %vm1353_vm11, %v2618_v39, %v2401_v45 }
 0x331   : > { %3477 = vmatmul.mubr.msk.bf16.gmra.mrb[4].mxu1 %vm1406_vm12, %v2649_v35  ;;  %v2275_v29 = vpop.permute.xlu1 %2274 }
 0x332   : > { %v2525_v4 = vsel %vm1221_vm7, %v2493_v36, %v2275_v29  ;;  %v2095_v47 = vpop.permute.xlu0 %2094  ;;  %v3464_v41 = vpop.f32.mrb[28].mxu0  ;;  %v2185_v29 = vrot.slane %v5052_v5, 1 }
 0x333   : > { %v2557_v32 = vsel %vm1254_vm8, %v2525_v4, %v2311_v43  ;;  %v1641_v6 = vmul.f32 %v5017_v40, %v3464_v41  ;;  %2290 = vrot.lane.b32.xlu1 %v2061_v50, %s3646_s26  ;;  %v1589_v54 = vpop.f32.mrb[29].mxu0  ;;  %2215 = vrot.lane.b32.xlu0 %v2184_v53, %s3642_s22 }
 0x334   : > { %v2589_v26 = vsel %vm1287_vm9, %v2557_v32, %v5012_v34  ;;  %v1639_v3 = vmul.f32 %v5017_v40, %v1589_v54  ;;  %v3465_v45 = vpop.f32.mrb[30].mxu0 }
 0x335   : > { %v1680_v11 = vadd.f32 %v5029_v2, %v1641_v6  ;;  %v1642_v52 = vmul.f32 %v5017_v40, %v3465_v45  ;;  %v5114_v28 = vpop.permute.xlu1 %2346  ;;  %v1592_v23 = vpop.f32.mrb[31].mxu0  ;;  %v2620_v43 = vsel %vm1320_vm10, %v2589_v26, %v2373_v63 }
 0x336   : > { %v1678_v61 = vadd.f32 %v5029_v2, %v1639_v3  ;;  %v1640_v34 = vmul.f32 %v5017_v40, %v1592_v23  ;;  %v5120_v22 = vpop.permute.xlu0 %2236  ;;  %v2651_v50 = vsel %vm1353_vm11, %v2620_v43, %v5042_v10  ;;  %v2433_v43 = vsel %vm1122_vm4, %v4763_v38, %v2095_v47 }
 0x337   : > { %v1712_v12 = vmax.f32 %v1680_v11, 0.0  ;;  %v1681_v48 = vadd.f32 %v5029_v2, %v1642_v52  ;;  %2326 = vrot.lane.b32.xlu1 %v2184_v53, %s3645_s25  ;;  %3480 = vmatprep.mubr.msk.bf16.mxu1 %vm1406_vm12, %v2651_v50  ;;  %v2186_v53 = vrot.slane %v5094_v58, 1  ;;  %v2463_v47 = vsel %vm1155_vm5, %v2433_v43, %v5060_v37 }
 0x338   : > { %v1710_v63 = vmax.f32 %v1678_v61, 0.0  ;;  %v1679_v30 = vadd.f32 %v5029_v2, %v1640_v34  ;;  %2248 = vrot.lane.b32.xlu0 %v5052_v5, %s3644_s24  ;;  %v2073_v2 = vsel %vm575_vm2, %v2068_v9, %v2072_v14  ;;  %v2435_v43 = vsel %vm1122_vm4, %v4760_v25, %v5077_v51 }
 0x339   : > { %v1791_v40 = vrot.slane %v1712_v12, 7  ;;  %v1713_v33 = vmax.f32 %v1681_v48, 0.0  ;;  %v5130_v39 = vpop.permute.xlu1 %2234  ;;  %v2187_v23 = vsel %vm832_vm1, %v2185_v29, %v2186_v53 }
 0x33a   : > { %v1788_v10 = vrot.slane %v1710_v63, 7  ;;  %v1711_v55 = vmax.f32 %v1679_v30, 0.0  ;;  %v5132_v35 = vpop.permute.xlu0 %2344 }
 0x33b   : > { %v1792_v36 = vrot.slane %v1713_v33, 7  ;;  %2358 = vrot.lane.b32.xlu1 %v5052_v5, %s3647_s10  ;;  %v1857_v41 = vsel %vm406_vm0, 0.0, %v1791_v40 }
 0x33c   : > { %v1789_v4 = vrot.slane %v1711_v55, 7  ;;  %2292 = vrot.lane.b32.xlu0 %v2073_v2, %s3646_s26  ;;  %v1856_v32 = vsel %vm406_vm0, 0.0, %v1788_v10 }
 0x33d   : > { %v1793_v6 = vsel %vm406_vm0, %v1791_v40, %v1792_v36  ;;  %v1873_v54 = vsel %vm406_vm0, %v1792_v36, 0.0  ;;  %v5144_v58 = vpop.permute.xlu1 %2406 }
 0x33e   : > { %v5146_v62 = vpack.c.bf16 %v1793_v6, %v1857_v41  ;;  %v1905_v59 = vpack.c.bf16 %v1873_v54, %v1873_v54  ;;  %v1790_v26 = vsel %vm406_vm0, %v1788_v10, %v1789_v4  ;;  %v1872_v3 = vsel %vm406_vm0, %v1789_v4, 0.0  ;;  %v5150_v45 = vpop.permute.xlu0 %2316 }
 0x33f   : > { %v5152_v11 = vpack.c.bf16 %v1790_v26, %v1856_v32  ;;  %v1903_v52 = vpack.c.bf16 %v1872_v3, %v1872_v3  ;;  %2388 = vrot.lane.b32.xlu1 %v2073_v2, %s3649_s20  ;;  %v2495_v54 = vsel %vm1188_vm6, %v2463_v47, %v5020_v15 }
 0x340   : > { %v2262_v57 = vshll.u32 %v1905_v59, 16  ;;  %v2300_v61 = vrot.slane %v1905_v59, 1  ;;  %2328 = vrot.lane.b32.xlu0 %v2187_v23, %s3645_s25  ;;  %v2257_v34 = vshll.u32 %v5146_v62, 16  ;;  %v2255_v9 = vshrl.u32 %v5146_v62, 16 }
 0x341   : > { %v2082_v50 = vshll.u32 %v1903_v52, 16  ;;  %v2189_v12 = vrot.slane %v1903_v52, 1  ;;  %v5160_v48 = vpop.permute.xlu1 %2205  ;;  %v2188_v30 = vrot.slane %v5152_v11, 1  ;;  %v2077_v40 = vshll.u32 %v5152_v11, 16 }
 0x342   : > { %v5163_v63 = vpop.permute.xlu0 %2203  ;;  %v2259_v33 = vrot.slane %v2257_v34, 1  ;;  %v2299_v38 = vrot.slane %v5146_v62, 1  ;;  %v2075_v14 = vshrl.u32 %v5152_v11, 16  ;;  %v2264_v53 = vrot.slane %v2262_v57, 1 }
 0x343   : > { %2418 = vrot.lane.b32.xlu1 %v2187_v23, %s3648_s12  ;;  %v2079_v10 = vrot.slane %v2077_v40, 1  ;;  %v2190_v41 = vsel %vm832_vm1, %v2188_v30, %v2189_v12  ;;  %v2084_v6 = vrot.slane %v2082_v50, 1  ;;  %v2527_v3 = vsel %vm1221_vm7, %v2495_v54, %v5068_v7 }
 0x344   : > { %2360 = vrot.lane.b32.xlu0 %v5152_v11, %s3647_s10  ;;  %v2260_v55 = vor.u32 %v2259_v33, %v2255_v9  ;;  %v2301_v36 = vsel %vm832_vm1, %v2299_v38, %v2300_v61  ;;  %v2559_v15 = vsel %vm1254_vm8, %v2527_v3, %v5044_v16  ;;  %v2465_v7 = vsel %vm1155_vm5, %v2435_v43, %v5056_v46 }
 0x345   : > { %v2405_v29 = vpop.permute.xlu1 %2404  ;;  %v2080_v32 = vor.u32 %v2079_v10, %v2075_v14  ;;  %v2591_v61 = vsel %vm1287_vm9, %v2559_v15, %v5132_v35  ;;  %v2497_v16 = vsel %vm1188_vm6, %v2465_v7, %v5130_v39 }
 0x346   : > { %v2281_v4 = vpop.permute.xlu0 %2280  ;;  %v2265_v37 = vsel %vm575_vm2, %v2260_v55, %v2264_v53 }
 0x347   : > { %2420 = vrot.lane.b32.xlu1 %v2190_v41, %s3648_s12  ;;  %v2085_v59 = vsel %vm575_vm2, %v2080_v32, %v2084_v6 }
 0x348   : > { %2390 = vrot.lane.b32.xlu0 %v2085_v59, %s3649_s20 }
 0x349   : > { %v2315_v26 = vpop.permute.xlu1 %2314 }
 0x34a   : > { %v2101_v52 = vpop.permute.xlu0 %2100 }
 0x34b   : > { %2217 = vrot.lane.b32.xlu1 %v2187_v23, %s3642_s22 }
 0x34c   : > { %2112 = vrot.lane.b32.xlu0 %v2073_v2, %s3643_s23 }
 0x34d   : > { %v2377_v57 = vpop.permute.xlu1 %2376 }
 0x34e   : > { %v2375_v34 = vpop.permute.xlu0 %2374 }
 0x34f   : > { %v2622_v50 = vsel %vm1320_vm10, %v2591_v61, %v2375_v34  ;;  %2250 = vrot.lane.b32.xlu1 %v5152_v11, %s3644_s24 }
 0x350   : > { %v2653_v25 = vsel %vm1353_vm11, %v2622_v50, %v2405_v29  ;;  %2114 = vrot.lane.b32.xlu0 %v2085_v59, %s3643_s23 }
 0x351   : > { %3481 = vmatmul.mubr.msk.bf16.gmra.mrb[8].mxu1 %vm1406_vm12, %v2653_v25  ;;  %v2279_v51 = vpop.permute.xlu1 %2278 }
 0x352   : > { %v2529_v35 = vsel %vm1221_vm7, %v2497_v16, %v2279_v51  ;;  %v2099_v2 = vpop.permute.xlu0 %2098 }
 0x353   : > { %v2561_v23 = vsel %vm1254_vm8, %v2529_v35, %v2315_v26  ;;  %2294 = vrot.lane.b32.xlu1 %v2085_v59, %s3646_s26 }
 0x354   : > { %v2593_v46 = vsel %vm1287_vm9, %v2561_v23, %v5114_v28  ;;  %2219 = vrot.lane.b32.xlu0 %v2190_v41, %s3642_s22  ;;  %s3275_s22 = sshll.u32 %s298_s21, 4  ;;  %s5637_s22 = int_to_ptr.vmem [resolvable:$true] %s3275_s22 }
 0x355   : > { %v2351_v12 = vpop.permute.xlu1 %2350  ;;  %v2624_v39 = vsel %vm1320_vm10, %v2593_v46, %v2377_v57 }
 0x356   : > { %v2241_v9 = vpop.permute.xlu0 %2240  ;;  %v2655_v30 = vsel %vm1353_vm11, %v2624_v39, %v5144_v58  ;;  %v2437_v58 = vsel %vm1122_vm4, %v4822_v19, %v2099_v2  ;;  %v2439_v19 = vsel %vm1122_vm4, %v4816_v1, %v2101_v52 }
 0x357   : > { %2330 = vrot.lane.b32.xlu1 %v2190_v41, %s3645_s25  ;;  %3484 = vmatprep.mubr.msk.bf16.mxu1 %vm1406_vm12, %v2655_v30  ;;  %v2467_v10 = vsel %vm1155_vm5, %v2437_v58, %v5163_v63  ;;  %v2469_v59 = vsel %vm1155_vm5, %v2439_v19, %v5160_v48 }
 0x358   : > { %2252 = vrot.lane.b32.xlu0 %v5146_v62, %s3644_s24  ;;  %v2499_v53 = vsel %vm1188_vm6, %v2467_v10, %v5120_v22 }
 0x359   : > { %v2239_v40 = vpop.permute.xlu1 %2238  ;;  %v2531_v41 = vsel %vm1221_vm7, %v2499_v53, %v2281_v4 }
 0x35a   : > { %v2349_v33 = vpop.permute.xlu0 %2348  ;;  %v2501_v4 = vsel %vm1188_vm6, %v2469_v59, %v2239_v40 }
 0x35b   : > { %2362 = vrot.lane.b32.xlu1 %v5146_v62, %s3647_s10  ;;  %s3577_s10 = scalar_lea.vmem %s5637_s22, 128 }
 0x35c   : > { %2296 = vrot.lane.b32.xlu0 %v2265_v37, %s3646_s26  ;;  %s3261_s26 = scalar_lea.sflag [#allocation3], %s296_s17  ;;  %p3578_p11 = scmp.ne.s32.totalorder %s5637_s22, %s3577_s10 }
 0x35d   : > { %v2411_v28 = vpop.permute.xlu1 %2410 }
 0x35e   : > { %v2321_v38 = vpop.permute.xlu0 %2320  ;;  %p3579_p12 = pnand %p3578_p11, %p3740_p5 }
 0x35f   : > { %2422 = vrot.lane.b32.xlu1 %v2301_v36, %s3648_s12  ;;  %s3653_s12 = smov 1  }
 0x360   : > { %2332 = vrot.lane.b32.xlu0 %v2301_v36, %s3645_s25  ;;  %v2563_v36 = vsel %vm1254_vm8, %v2531_v41, %v5150_v45  ;;  %s5635_s25 = scalar_lea.hbm %s5685_s8, %s3389_s19  ;;  %p3580_p13 = pneg %p3579_p12 }
 0x361   : > { %v2210_v47 = vpop.permute.xlu1 %2209  ;;  %v2595_v63 = vsel %vm1287_vm9, %v2563_v36, %v2349_v33 }
 0x362   : > { %v2208_v14 = vpop.permute.xlu0 %2207 }
 0x364   : > { %2392 = vrot.lane.b32.xlu0 %v2265_v37, %s3649_s20  ;;  %s3654_s20 = smov 127  }
 0x365   : > { %v2409_v55 = vpop.permute.xlu1 %2408 }
 0x366   : > { %v2285_v62 = vpop.permute.xlu0 %2284 }
 0x369   : > { %v2319_v29 = vpop.permute.xlu1 %2318 }
 0x36a   : > { %v2105_v32 = vpop.permute.xlu0 %2104 }
 0x36b   : > { %v2443_v23 = vsel %vm1122_vm4, %v4884_v56, %v2105_v32 }
 0x36c   : > { %v2473_v30 = vsel %vm1155_vm5, %v2443_v23, %v2210_v47 }
 0x36d   : > { %v2381_v6 = vpop.permute.xlu1 %2380 }
 0x36e   : > { %v2379_v54 = vpop.permute.xlu0 %2378 }
 0x36f   : > { %v2626_v37 = vsel %vm1320_vm10, %v2595_v63, %v2379_v54 }
 0x370   : > { %v2657_v22 = vsel %vm1353_vm11, %v2626_v37, %v2409_v55 }
 0x371   : > { %3485 = vmatmul.mubr.msk.bf16.gmra.mrb[12].mxu1 %vm1406_vm12, %v2657_v22  ;;  %v2283_v26 = vpop.permute.xlu1 %2282 }
 0x372   : > { %v2533_v1 = vsel %vm1221_vm7, %v2501_v4, %v2283_v26  ;;  %v2103_v3 = vpop.permute.xlu0 %2102 }
 0x373   : > { %v2565_v45 = vsel %vm1254_vm8, %v2533_v1, %v2319_v29  ;;  %v2441_v50 = vsel %vm1122_vm4, %v4887_v44, %v2103_v3 }
 0x374   : > { %v2597_v52 = vsel %vm1287_vm9, %v2565_v45, %v2351_v12  ;;  %v2471_v16 = vsel %vm1155_vm5, %v2441_v50, %v2208_v14 }
 0x375   : > { %v2355_v43 = vpop.permute.xlu1 %2354  ;;  %v2628_v15 = vsel %vm1320_vm10, %v2597_v52, %v2381_v6  ;;  %v2503_v2 = vsel %vm1188_vm6, %v2471_v16, %v2241_v9 }
 0x376   : > { %v2245_v57 = vpop.permute.xlu0 %2244  ;;  %v2659_v48 = vsel %vm1353_vm11, %v2628_v15, %v2411_v28  ;;  %v2535_v12 = vsel %vm1221_vm7, %v2503_v2, %v2285_v62 }
 0x377   : > { %3488 = vmatprep.mubr.msk.bf16.mxu1 %vm1406_vm12, %v2659_v48  ;;  %v2567_v44 = vsel %vm1254_vm8, %v2535_v12, %v2321_v38 }
 0x379   : > { %v2243_v61 = vpop.permute.xlu1 %2242 }
 0x37a   : > { %v2353_v34 = vpop.permute.xlu0 %2352  ;;  %v2505_v40 = vsel %vm1188_vm6, %v2473_v30, %v2243_v61 }
 0x37b   : > { %v2599_v28 = vsel %vm1287_vm9, %v2567_v44, %v2353_v34 }
 0x37d   : > { %v2413_v7 = vpop.permute.xlu1 %2412 }
 0x37e   : > { %v2325_v25 = vpop.permute.xlu0 %2324 }
 0x381   : > { %v2323_v51 = vpop.permute.xlu1 %2322 }
 0x382   : > { %v2212_v35 = vpop.permute.xlu0 %2211 }
 0x385   : > { %v2385_v46 = vpop.permute.xlu1 %2384 }
 0x386   : > { %v2289_v39 = vpop.permute.xlu0 %2288 }
 0x389   : > { %v2287_v33 = vpop.permute.xlu1 %2286 }
 0x38a   : > { %v2537_v58 = vsel %vm1221_vm7, %v2505_v40, %v2287_v33  ;;  %v2383_v14 = vpop.permute.xlu0 %2382 }
 0x38b   : > { %v2569_v9 = vsel %vm1254_vm8, %v2537_v58, %v2323_v51  ;;  %v2630_v56 = vsel %vm1320_vm10, %v2599_v28, %v2383_v14 }
 0x38c   : > { %v2661_v10 = vsel %vm1353_vm11, %v2630_v56, %v2413_v7  ;;  %v2601_v55 = vsel %vm1287_vm9, %v2569_v9, %v2355_v43 }
 0x38d   : > { %3489 = vmatmul.mubr.msk.bf16.gmra.mrb[16].mxu1 %vm1406_vm12, %v2661_v10  ;;  %v2415_v47 = vpop.permute.xlu1 %2414  ;;  %v2632_v62 = vsel %vm1320_vm10, %v2601_v55, %v2385_v46 }
 0x38e   : > { %v2663_v38 = vsel %vm1353_vm11, %v2632_v62, %v2415_v47  ;;  %v2107_v53 = vpop.permute.xlu0 %2106 }
 0x38f   : > { %3492 = vmatprep.mubr.msk.bf16.mxu1 %vm1406_vm12, %v2663_v38  ;;  %v2445_v29 = vsel %vm1122_vm4, %v4978_v0, %v2107_v53 }
 0x390   : > { %v2475_v41 = vsel %vm1155_vm5, %v2445_v29, %v2212_v35 }
 0x391   : > { %v2507_v19 = vsel %vm1188_vm6, %v2475_v41, %v2245_v57 }
 0x392   : > { %v2109_v32 = vpop.permute.xlu0 %2108  ;;  %v2539_v6 = vsel %vm1221_vm7, %v2507_v19, %v2289_v39 }
 0x393   : > { %v2571_v54 = vsel %vm1254_vm8, %v2539_v6, %v2325_v25  ;;  %v2447_v48 = vsel %vm1122_vm4, %v4974_v8, %v2109_v32 }
 0x396   : > { %v2357_v63 = vpop.permute.xlu0 %2356 }
 0x397   : > { %v2603_v59 = vsel %vm1287_vm9, %v2571_v54, %v2357_v63 }
 0x399   : > { %v2417_v36 = vpop.permute.xlu1 %2416 }
 0x39d   : > { %v2214_v37 = vpop.permute.xlu1 %2213  ;;  %v2387_v22 = vpop.permute.xlu0 %2386 }
 0x39e   : > { %v2634_v4 = vsel %vm1320_vm10, %v2603_v59, %v2387_v22  ;;  %v2477_v61 = vsel %vm1155_vm5, %v2447_v48, %v2214_v37 }
 0x39f   : > { %v2665_v26 = vsel %vm1353_vm11, %v2634_v4, %v2417_v36 }
 0x3a0   : > { %3493 = vmatmul.mubr.msk.bf16.gmra.mrb[20].mxu1 %vm1406_vm12, %v2665_v26 }
 0x3a1   : > { %v2247_v0 = vpop.permute.xlu1 %2246  ;;  %v2111_v1 = vpop.permute.xlu0 %2110 }
 0x3a2   : > { %v2509_v34 = vsel %vm1188_vm6, %v2477_v61, %v2247_v0  ;;  %v2449_v23 = vsel %vm1122_vm4, %v5058_v17, %v2111_v1 }
 0x3a5   : > { %v2291_v3 = vpop.permute.xlu1 %2290  ;;  %v2216_v45 = vpop.permute.xlu0 %2215 }
 0x3a6   : > { %v2541_v7 = vsel %vm1221_vm7, %v2509_v34, %v2291_v3  ;;  %v2479_v12 = vsel %vm1155_vm5, %v2449_v23, %v2216_v45 }
 0x3a9   : > { %v2327_v52 = vpop.permute.xlu1 %2326 }
 0x3aa   : > { %v2249_v43 = vpop.permute.xlu0 %2248  ;;  %v2573_v16 = vsel %vm1254_vm8, %v2541_v7, %v2327_v52 }
 0x3ab   : > { %v2511_v39 = vsel %vm1188_vm6, %v2479_v12, %v2249_v43 }
 0x3ad   : > { %v2359_v15 = vpop.permute.xlu1 %2358 }
 0x3ae   : > { %v2293_v57 = vpop.permute.xlu0 %2292  ;;  %v2605_v51 = vsel %vm1287_vm9, %v2573_v16, %v2359_v15 }
 0x3af   : > { %v2543_v30 = vsel %vm1221_vm7, %v2511_v39, %v2293_v57  ;;  %v5330_v39 = vld [vmem:[%s5682_s5] ss:$0 sm:$0xff] }
 0x3b1   : > { %v2389_v50 = vpop.permute.xlu1 %2388 }
 0x3b2   : > { %v2329_v25 = vpop.permute.xlu0 %2328  ;;  %v2636_v35 = vsel %vm1320_vm10, %v2605_v51, %v2389_v50  ;;  %v3650_v51 = vmov 1  }
 0x3b3   : > { %v2575_v44 = vsel %vm1254_vm8, %v2543_v30, %v2329_v25  ;;  %3560 = vset.pattern.permute.xlu0 %v3650_v51 }
 0x3b5   : > { %v2419_v2 = vpop.permute.xlu1 %2418 }
 0x3b6   : > { %v2667_v8 = vsel %vm1353_vm11, %v2636_v35, %v2419_v2  ;;  %v2361_v46 = vpop.permute.xlu0 %2360  ;;  %v3045_v35 = vld [vmem:[%s5684_s7] sm:$0x1]  ;;  %v3651_v2 = vmov 2  }
 0x3b7   : > { %3496 = vmatprep.mubr.msk.bf16.mxu1 %vm1406_vm12, %v2667_v8  ;;  %v2607_v33 = vsel %vm1287_vm9, %v2575_v44, %v2361_v46  ;;  %3561 = vset.pattern.permute.xlu1 %v3651_v2  ;;  %v5337_v44 = vld [vmem:[%s5683_s6] ss:$0 sm:$0xff] }
 0x3b8   : > { %3058 = vperm.xlu0 %3560, %v3045_v35   ;;  %3072 = vperm.xlu1 %3561, %v3045_v35  }
 0x3b9   : > { %v2421_v40 = vpop.permute.xlu1 %2420 }
 0x3ba   : > { %v2391_v28 = vpop.permute.xlu0 %2390 }
 0x3bb   : > { %v2638_v58 = vsel %vm1320_vm10, %v2607_v33, %v2391_v28 }
 0x3bc   : > { %v2669_v14 = vsel %vm1353_vm11, %v2638_v58, %v2421_v40 }
 0x3bd   : > { %v2218_v17 = vpop.permute.xlu1 %2217  ;;  %3497 = vmatmul.mubr.msk.bf16.gmra.mrb[24].mxu1 %vm1406_vm12, %v2669_v14 }
 0x3be   : > { %v2113_v9 = vpop.permute.xlu0 %2112 }
 0x3bf   : > { %v2451_v53 = vsel %vm1122_vm4, %v5052_v5, %v2113_v9 }
 0x3c0   : > { %v2481_v32 = vsel %vm1155_vm5, %v2451_v53, %v2218_v17 }
 0x3c1   : > { %v2251_v56 = vpop.permute.xlu1 %2250 }
 0x3c2   : > { %v2115_v10 = vpop.permute.xlu0 %2114  ;;  %v2513_v4 = vsel %vm1188_vm6, %v2481_v32, %v2251_v56 }
 0x3c3   : > { %v2453_v41 = vsel %vm1122_vm4, %v5152_v11, %v2115_v10 }
 0x3c5   : > { %v2295_v55 = vpop.permute.xlu1 %2294 }
 0x3c6   : > { %v2220_v47 = vpop.permute.xlu0 %2219  ;;  %v2545_v11 = vsel %vm1221_vm7, %v2513_v4, %v2295_v55 }
 0x3c7   : > { %v2483_v19 = vsel %vm1155_vm5, %v2453_v41, %v2220_v47 }
 0x3c9   : > { %v2331_v38 = vpop.permute.xlu1 %2330 }
 0x3ca   : > { %v2253_v62 = vpop.permute.xlu0 %2252  ;;  %v2577_v1 = vsel %vm1254_vm8, %v2545_v11, %v2331_v38 }
 0x3cb   : > { %v2515_v6 = vsel %vm1188_vm6, %v2483_v19, %v2253_v62 }
 0x3cd   : > { %v2363_v63 = vpop.permute.xlu1 %2362 }
 0x3ce   : > { %v2297_v29 = vpop.permute.xlu0 %2296  ;;  %v2609_v3 = vsel %vm1287_vm9, %v2577_v1, %v2363_v63 }
 0x3cf   : > { %v2547_v37 = vsel %vm1221_vm7, %v2515_v6, %v2297_v29 }
 0x3d1   : > { %v3474_v36 = vpop.f32.mrb[0].mxu1  ;;  %v2423_v43 = vpop.permute.xlu1 %2422 }
 0x3d2   : > { %v2762_v54 = vpop.f32.mrb[1].mxu1  ;;  %v2333_v22 = vpop.permute.xlu0 %2332  ;;  %v2898_v28 = vmul.f32 %v3474_v36, %v5330_v39 }
 0x3d3   : > { %v3475_v59 = vpop.f32.mrb[2].mxu1  ;;  %v2579_v5 = vsel %vm1254_vm8, %v2547_v37, %v2333_v22  ;;  %v2896_v40 = vmul.f32 %v5330_v39, %v2762_v54 }
 0x3d4   : > { %v2765_v26 = vpop.f32.mrb[3].mxu1  ;;  %v2610_v0 = vsel %vm1287_vm9, %v2579_v5, %v4657_v49  ;;  %v5349_v14 = vadd.f32 %v5337_v44, %v2898_v28  ;;  %v2899_v56 = vmul.f32 %v3475_v59, %v5330_v39 }
 0x3d5   : > { %v2641_v52 = vsel %vm1320_vm10, %v2610_v0, %v4660_v24  ;;  %v2897_v30 = vmul.f32 %v5330_v39, %v2765_v26  ;;  %v5344_v58 = vadd.f32 %v5337_v44, %v2896_v40 }
 0x3d6   : > { %v2393_v45 = vpop.permute.xlu0 %2392  ;;  %v2672_v48 = vsel %vm1353_vm11, %v2641_v52, %v4676_v42  ;;  %v3652_v42 = vmov 0   ;;  %v2970_v47 = vsel %vm1122_vm4, %v5349_v14, 0.0  ;;  %v5358_v62 = vadd.f32 %v5337_v44, %v2899_v56 }
 0x3d7   : > { %v2640_v15 = vsel %vm1320_vm10, %v2609_v3, %v2393_v45  ;;  %3562 = vset.pattern.permute.xlu0 %v3652_v42  ;;  %v5340_v33 = vadd.f32 %v5337_v44, %v2897_v30  ;;  %v2967_v9 = vsel %vm1122_vm4, %v5344_v58, 0.0 }
 0x3d8   : > { %v2671_v57 = vsel %vm1353_vm11, %v2640_v15, %v2423_v43  ;;  %3048 = vperm.xlu0 %3562, %v3045_v35   ;;  %v2972_v41 = vsel %vm1122_vm4, %v5358_v62, 0.0 }
 0x3d9   : > { %3500 = vmatprep.mubr.msk.bf16.mxu1 %vm1406_vm12, %v2671_v57  ;;  %v2968_v17 = vsel %vm1122_vm4, %v5340_v33, 0.0 }
 0x3da   : > { %3501 = vmatmul.mubr.msk.bf16.gmra.mrb[28].mxu1 %vm1406_vm12, %v2672_v48  ;;  %v2969_v55 = vadd.f32 %v2968_v17, %v2967_v9 }
 0x3dc   : > { %v2971_v29 = vadd.f32 %v2970_v47, %v2969_v55 }
 0x3de   : > { %v2973_v36 = vadd.f32 %v2972_v41, %v2971_v29 }
 0x404   : > { %v3478_v49 = vpop.f32.mrb[4].mxu1 }
 0x405   : > { %v2778_v61 = vpop.f32.mrb[5].mxu1  ;;  %v2902_v6 = vmul.f32 %v3478_v49, %v5330_v39 }
 0x406   : > { %v3479_v34 = vpop.f32.mrb[6].mxu1  ;;  %v2900_v10 = vmul.f32 %v5330_v39, %v2778_v61 }
 0x407   : > { %v2781_v50 = vpop.f32.mrb[7].mxu1  ;;  %v5375_v5 = vadd.f32 %v5337_v44, %v2902_v6  ;;  %v2903_v26 = vmul.f32 %v3479_v34, %v5330_v39 }
 0x408   : > { %v5361_v38 = vadd.f32 %v5337_v44, %v2900_v10  ;;  %v2901_v53 = vmul.f32 %v5330_v39, %v2781_v50 }
 0x409   : > { %v2978_v1 = vsel %vm1122_vm4, %v5375_v5, 0.0  ;;  %v5382_v3 = vadd.f32 %v5337_v44, %v2903_v26 }
 0x40a   : > { %v2974_v32 = vsel %vm1122_vm4, %v5361_v38, 0.0  ;;  %v5369_v19 = vadd.f32 %v5337_v44, %v2901_v53 }
 0x40b   : > { %v2975_v54 = vadd.f32 %v2974_v32, %v2973_v36  ;;  %v2980_v15 = vsel %vm1122_vm4, %v5382_v3, 0.0 }
 0x40c   : > { %v2976_v59 = vsel %vm1122_vm4, %v5369_v19, 0.0 }
 0x40d   : > { %v2977_v0 = vadd.f32 %v2976_v59, %v2975_v54 }
 0x40f   : > { %v2979_v43 = vadd.f32 %v2978_v1, %v2977_v0 }
 0x411   : > { %v2981_v49 = vadd.f32 %v2980_v15, %v2979_v43 }
 0x424   : > { %v3482_v7 = vpop.f32.mrb[8].mxu1 }
 0x425   : > { %v2794_v25 = vpop.f32.mrb[9].mxu1  ;;  %v2906_v61 = vmul.f32 %v3482_v7, %v5330_v39 }
 0x426   : > { %v3483_v16 = vpop.f32.mrb[10].mxu1  ;;  %v2904_v11 = vmul.f32 %v5330_v39, %v2794_v25 }
 0x427   : > { %v2797_v24 = vpop.f32.mrb[11].mxu1  ;;  %v5399_v25 = vadd.f32 %v5337_v44, %v2906_v61 }
 0x428   : > { %v5385_v45 = vadd.f32 %v5337_v44, %v2904_v11  ;;  %v2905_v52 = vmul.f32 %v5330_v39, %v2797_v24  ;;  %v2907_v24 = vmul.f32 %v3483_v16, %v5330_v39 }
 0x429   : > { %v2986_v40 = vsel %vm1122_vm4, %v5399_v25, 0.0 }
 0x42a   : > { %v2982_v57 = vsel %vm1122_vm4, %v5385_v45, 0.0  ;;  %v5393_v48 = vadd.f32 %v5337_v44, %v2905_v52  ;;  %v5406_v28 = vadd.f32 %v5337_v44, %v2907_v24 }
 0x42b   : > { %v2983_v34 = vadd.f32 %v2982_v57, %v2981_v49 }
 0x42c   : > { %v2984_v50 = vsel %vm1122_vm4, %v5393_v48, 0.0  ;;  %v2988_v16 = vsel %vm1122_vm4, %v5406_v28, 0.0 }
 0x42d   : > { %v2985_v35 = vadd.f32 %v2984_v50, %v2983_v34 }
 0x42f   : > { %v2987_v56 = vadd.f32 %v2986_v40, %v2985_v35 }
 0x431   : > { %v2989_v47 = vadd.f32 %v2988_v16, %v2987_v56 }
 0x444   : > { %v5323_v23 = vpop.f32.mrb[12].mxu1 }
 0x445   : > { %v2810_v8 = vpop.f32.mrb[13].mxu1  ;;  %v2910_v53 = vmul.f32 %v5323_v23, %v5330_v39 }
 0x446   : > { %v5325_v46 = vpop.f32.mrb[14].mxu1  ;;  %v2908_v51 = vmul.f32 %v5330_v39, %v2810_v8 }
 0x447   : > { %v2813_v12 = vpop.f32.mrb[15].mxu1  ;;  %v5424_v41 = vadd.f32 %v5337_v44, %v2910_v53  ;;  %v2911_v32 = vmul.f32 %v5325_v46, %v5330_v39 }
 0x448   : > { %v5409_v7 = vadd.f32 %v5337_v44, %v2908_v51  ;;  %v2909_v17 = vmul.f32 %v5330_v39, %v2813_v12 }
 0x449   : > { %v2994_v54 = vsel %vm1122_vm4, %v5424_v41, 0.0  ;;  %v5432_v59 = vadd.f32 %v5337_v44, %v2911_v32 }
 0x44a   : > { %v2990_v8 = vsel %vm1122_vm4, %v5409_v7, 0.0  ;;  %v5417_v55 = vadd.f32 %v5337_v44, %v2909_v17 }
 0x44b   : > { %v2991_v29 = vadd.f32 %v2990_v8, %v2989_v47  ;;  %v2996_v0 = vsel %vm1122_vm4, %v5432_v59, 0.0 }
 0x44c   : > { %v2992_v12 = vsel %vm1122_vm4, %v5417_v55, 0.0 }
 0x44d   : > { %v2993_v6 = vadd.f32 %v2992_v12, %v2991_v29 }
 0x44f   : > { %v2995_v11 = vadd.f32 %v2994_v54, %v2993_v6 }
 0x451   : > { %v2997_v1 = vadd.f32 %v2996_v0, %v2995_v11 }
 0x460   : > { %v3490_v63 = vpop.f32.mrb[16].mxu1 }
 0x461   : > { %v2826_v37 = vpop.f32.mrb[17].mxu1  ;;  %v2914_v52 = vmul.f32 %v3490_v63, %v5330_v39 }
 0x462   : > { %v3491_v22 = vpop.f32.mrb[18].mxu1  ;;  %v2912_v36 = vmul.f32 %v5330_v39, %v2826_v37 }
 0x463   : > { %v2829_v4 = vpop.f32.mrb[19].mxu1  ;;  %v5449_v57 = vadd.f32 %v5337_v44, %v2914_v52 }
 0x464   : > { %v5435_v23 = vadd.f32 %v5337_v44, %v2912_v36  ;;  %v2913_v26 = vmul.f32 %v5330_v39, %v2829_v4  ;;  %v2915_v4 = vmul.f32 %v3491_v22, %v5330_v39 }
 0x465   : > { %v3002_v50 = vsel %vm1122_vm4, %v5449_v57, 0.0 }
 0x466   : > { %v2998_v46 = vsel %vm1122_vm4, %v5435_v23, 0.0  ;;  %v5443_v37 = vadd.f32 %v5337_v44, %v2913_v26  ;;  %v5456_v24 = vadd.f32 %v5337_v44, %v2915_v4 }
 0x467   : > { %v2999_v43 = vadd.f32 %v2998_v46, %v2997_v1 }
 0x468   : > { %v3000_v15 = vsel %vm1122_vm4, %v5443_v37, 0.0  ;;  %v3004_v22 = vsel %vm1122_vm4, %v5456_v24, 0.0 }
 0x469   : > { %v3001_v61 = vadd.f32 %v3000_v15, %v2999_v43 }
 0x46b   : > { %v3003_v40 = vadd.f32 %v3002_v50, %v3001_v61 }
 0x46d   : > { %v3005_v8 = vadd.f32 %v3004_v22, %v3003_v40 }
 0x473   : > { %v3494_v42 = vpop.f32.mrb[20].mxu1 }
 0x474   : > { %v2842_v30 = vpop.f32.mrb[21].mxu1  ;;  %v2918_v47 = vmul.f32 %v3494_v42, %v5330_v39 }
 0x475   : > { %v3495_v9 = vpop.f32.mrb[22].mxu1  ;;  %v2916_v49 = vmul.f32 %v5330_v39, %v2842_v30 }
 0x476   : > { %v2845_v10 = vpop.f32.mrb[23].mxu1  ;;  %v5473_v29 = vadd.f32 %v5337_v44, %v2918_v47  ;;  %v2919_v12 = vmul.f32 %v3495_v9, %v5330_v39 }
 0x477   : > { %v5459_v63 = vadd.f32 %v5337_v44, %v2916_v49  ;;  %v2917_v51 = vmul.f32 %v5330_v39, %v2845_v10 }
 0x478   : > { %v3010_v6 = vsel %vm1122_vm4, %v5473_v29, 0.0  ;;  %v5480_v54 = vadd.f32 %v5337_v44, %v2919_v12 }
 0x479   : > { %v3006_v30 = vsel %vm1122_vm4, %v5459_v63, 0.0  ;;  %v5467_v16 = vadd.f32 %v5337_v44, %v2917_v51 }
 0x47a   : > { %v3007_v53 = vadd.f32 %v3006_v30, %v3005_v8  ;;  %v3012_v0 = vsel %vm1122_vm4, %v5480_v54, 0.0 }
 0x47b   : > { %v3008_v10 = vsel %vm1122_vm4, %v5467_v16, 0.0 }
 0x47c   : > { %v3009_v36 = vadd.f32 %v3008_v10, %v3007_v53 }
 0x47e   : > { %v3011_v11 = vadd.f32 %v3010_v6, %v3009_v36 }
 0x480   : > { %v3013_v1 = vadd.f32 %v3012_v0, %v3011_v11 }
 0x490   : > { %v3498_v34 = vpop.f32.mrb[24].mxu1 }
 0x491   : > { %v2858_v35 = vpop.f32.mrb[25].mxu1  ;;  %v2922_v52 = vmul.f32 %v3498_v34, %v5330_v39 }
 0x492   : > { %v3499_v17 = vpop.f32.mrb[26].mxu1  ;;  %v2920_v32 = vmul.f32 %v5330_v39, %v2858_v35 }
 0x493   : > { %v2861_v56 = vpop.f32.mrb[27].mxu1  ;;  %v5497_v4 = vadd.f32 %v5337_v44, %v2922_v52  ;;  %v2923_v49 = vmul.f32 %v3499_v17, %v5330_v39 }
 0x494   : > { %v5483_v42 = vadd.f32 %v5337_v44, %v2920_v32  ;;  %v2921_v26 = vmul.f32 %v5330_v39, %v2861_v56 }
 0x495   : > { %v3018_v50 = vsel %vm1122_vm4, %v5497_v4, 0.0  ;;  %v5503_v51 = vadd.f32 %v5337_v44, %v2923_v49 }
 0x496   : > { %v3014_v9 = vsel %vm1122_vm4, %v5483_v42, 0.0  ;;  %v5491_v46 = vadd.f32 %v5337_v44, %v2921_v26 }
 0x497   : > { %v3015_v43 = vadd.f32 %v3014_v9, %v3013_v1  ;;  %v3020_v47 = vsel %vm1122_vm4, %v5503_v51, 0.0 }
 0x498   : > { %v3016_v15 = vsel %vm1122_vm4, %v5491_v46, 0.0 }
 0x499   : > { %v3017_v61 = vadd.f32 %v3016_v15, %v3015_v43 }
 0x49b   : > { %v3019_v40 = vadd.f32 %v3018_v50, %v3017_v61 }
 0x49d   : > { %v3021_v12 = vadd.f32 %v3020_v47, %v3019_v40 }
 0x4ad   : > { %v3502_v35 = vpop.f32.mrb[28].mxu1 }
 0x4ae   : > { %v2874_v56 = vpop.f32.mrb[29].mxu1  ;;  %v2926_v34 = vmul.f32 %v3502_v35, %v5330_v39 }
 0x4af   : > { %v2924_v22 = vmul.f32 %v5330_v39, %v2874_v56  ;;  %v3503_v30 = vpop.f32.mrb[30].mxu1  ;;  %v3051_v56 = vlaneseq }
 0x4b0   : > { %v2877_v8 = vpop.f32.mrb[31].mxu1  ;;  %v2927_v53 = vmul.f32 %v3503_v30, %v5330_v39  ;;  %v5515_v32 = vadd.f32 %v5337_v44, %v2926_v34 }
 0x4b1   : > { %v5510_v17 = vadd.f32 %v5337_v44, %v2924_v22  ;;  %v2925_v10 = vmul.f32 %v5330_v39, %v2877_v8  ;;  %v3052_v34 = vshrl.u32 %v3051_v56, 7  ;;  %v3073_v22 = vpop.permute.xlu1 %3072  ;;  %v3059_v8 = vpop.permute.xlu0 %3058 }
 0x4b2   : > { %v5523_v11 = vadd.f32 %v5337_v44, %v2927_v53  ;;  %v3026_v39 = vsel %vm1122_vm4, %v5515_v32, 0.0 }
 0x4b3   : > { %v3022_v36 = vsel %vm1122_vm4, %v5510_v17, 0.0  ;;  %v5520_v6 = vadd.f32 %v5337_v44, %v2925_v10  ;;  %v3053_v30 = vsub.s32 0, %v3052_v34 }
 0x4b4   : > { %v3023_v26 = vadd.f32 %v3022_v36, %v3021_v12  ;;  %v3028_v52 = vsel %vm1122_vm4, %v5523_v11, 0.0 }
 0x4b5   : > { %v3024_v0 = vsel %vm1122_vm4, %v5520_v6, 0.0  ;;  %v3064_v47 = vrot.slane %v3059_v8, %v3053_v30 }
 0x4b6   : > { %v3025_v9 = vadd.f32 %v3024_v0, %v3023_v26  ;;  %v3078_v26 = vrot.slane %v3073_v22, %v3053_v30 }
 0x4b8   : > { %v3027_v1 = vadd.f32 %v3026_v39, %v3025_v9  ;;  %v3049_v9 = vpop.permute.xlu0 %3048 }
 0x4b9   : > { %v3054_v39 = vrot.slane %v3049_v9, %v3053_v30 }
 0x4ba   : > { %v3029_v43 = vadd.f32 %v3028_v52, %v3027_v1 }
 0x4bc   : > { %v3030_v15 = vrot.slane %v3029_v43, 4 }
 0x4be   : > { %v3031_v49 = vadd.f32 %v3030_v15, %v3029_v43 }
 0x4c0   : > { %v3032_v61 = vrot.slane %v3031_v49, 2 }
 0x4c2   : > { %v3033_v50 = vadd.f32 %v3032_v61, %v3031_v49 }
 0x4c4   : > { %v3034_v35 = vrot.slane %v3033_v50, 1 }
 0x4c6   : > { %v3035_v40 = vadd.f32 %v3034_v35, %v3033_v50 }
 0x4c8   : > { %v3036_v44 = vmul.f32 0.00390625, %v3035_v40 }
 0x4ca   : > { %3038 = vrot.lane.b32.xlu1 %v3036_v44, %s3653_s12  ;;  %s3581_s12 = sshll.u32 %s3656_s9, 4  ;;  %s3582_s12 = int_to_ptr.vmem [resolvable:$false] %s3581_s12 }
 0x4cb   : > { %p3584_p0 = scmp.lt.s32.totalorder %s5637_s22, %s3582_s12 }
 0x53c   : > { %v3039_v53 = vpop.permute.xlu1 %3038 }
 0x53d   : > { %v3042_v10 = vsel %vm3041_vm13, 0.0, %v3039_v53 }
 0x53e   : > { %v3044_v12 = vsel %vm3043_vm14, %v3042_v10, 0.0 }
 0x53f   : > { %v3065_v36 = vmul.f32 %v3064_v47, %v3044_v12  ;;  %v3079_v0 = vmul.f32 %v3078_v26, %v3044_v12  ;;  %v3055_v52 = vmul.f32 %v3054_v39, %v3044_v12 }
 0x541   : > { %3067 = vrot.lane.b32.xlu1 %v3065_v36, %s3654_s20  ;;  %s3583_s20 = scalar_lea.vmem %s3582_s12, 256 }
 0x542   : > { %p3585_p1 = scmp.lt.s32.totalorder %s3583_s20, %s3577_s10 }
 0x544   : > { %p3586_p2 = por %p3585_p1, %p3584_p0 }
 0x545   : > { %3081 = vrot.lane.b32.xlu1 %v3079_v0, %s3655_s13 }
 0x546   : > { %p3587_p3 = pnand %p3586_p2, %p3580_p13 }
 0x5b3   : > { %v3068_v1 = vpop.permute.xlu1 %3067 }
 0x5b4   : > { %v3070_v43 = vadd.f32 %v3068_v1, %v3055_v52  ;;  %v5739_v1 = vld [vmem:[#allocation5_spill] sm:$0xff] }
 0x5b7   : > { %v3082_v15 = vpop.permute.xlu1 %3081 }
 0x5b8   : > { %v3084_v49 = vadd.f32 %v3082_v15, %v3070_v43 }
 0x5ba   : > { %v3085_v61 = vsub.f32 0.0, %v3084_v49 }
 0x5bc   : > { %v3086_v50 = vmul.f32 1.442695, %v3085_v61  ;;  %v5741_v61 = vld [vmem:[#allocation6_spill] sm:$0xff] }
 0x5be   : > { %3571 = vpow2.f32 %v3086_v50 }
 0x5c8   : > { %v3572_v35 = vpop.eup %3571 }
 0x5c9   : > { %v3088_v40 = vadd.f32 1.0, %v3572_v35 }
 0x5cb   : > { %3573 = vrcp.f32 %v3088_v40 }
 0x5d5   : > { %v3574_v44 = vpop.eup %3573 }
 0x5d6   : > { %v5531_v56 = vrot.slane %v3574_v44, %v3053_v30 }
 0x5d8   : > { %v3111_v34 = vmul.f32 %v5531_v56, %v5435_v23  ;;  %v3095_v22 = vmul.f32 %v5531_v56, %v5344_v58  ;;  %v3096_v53 = vmul.f32 %v5531_v56, %v5340_v33  ;;  %v3112_v10 = vmul.f32 %v5531_v56, %v5443_v37 }
 0x5d9   : > { %v3097_v30 = vmul.f32 %v5531_v56, %v5349_v14  ;;  %v3113_v23 = vmul.f32 %v5531_v56, %v5449_v57  ;;  %v3098_v33 = vmul.f32 %v5531_v56, %v5358_v62  ;;  %v3114_v37 = vmul.f32 %v5531_v56, %v5456_v24  ;;  %v5738_v62 = vld [vmem:[#allocation17_spill] sm:$0xff] }
 0x5da   : > { %v3143_v8 = vadd.f32 %v3111_v34, %v3911_v13  ;;  %v3127_v12 = vadd.f32 %v3095_v22, %v3772_v18  ;;  %v3128_v58 = vadd.f32 %v3096_v53, %v3775_v20  ;;  %v3144_v13 = vadd.f32 %v3112_v10, %v3923_v21  ;;  %v5743_v22 = vld [vmem:[#allocation7_spill] sm:$0xff] }
 0x5db   : > { %v3129_v18 = vadd.f32 %v3097_v30, %v3783_v27  ;;  %v3145_v26 = vadd.f32 %v3113_v23, %v3959_v60  ;;  %v3099_v20 = vmul.f32 %v5531_v56, %v5361_v38  ;;  %v3115_v21 = vmul.f32 %v5531_v56, %v5459_v63  ;;  %v5740_v38 = vld [vmem:[#allocation18_spill] sm:$0xff]  ;;  %v5745_v30 = vld [vmem:[#allocation8_spill] sm:$0xff] }
 0x5dc   : > { %v3175_v47 = vmax.f32 %v3143_v8, 0.0  ;;  %v3159_v36 = vmax.f32 %v3127_v12, 0.0  ;;  %v3160_v14 = vmax.f32 %v3128_v58, 0.0  ;;  %v3176_v0 = vmax.f32 %v3144_v13, 0.0 }
 0x5dd   : > { %v3130_v57 = vadd.f32 %v3098_v33, %v3789_v31  ;;  %v3146_v9 = vadd.f32 %v3114_v37, %v5738_v62  ;;  %v3161_v39 = vmax.f32 %v3129_v18, 0.0  ;;  %v3177_v24 = vmax.f32 %v3145_v26, 0.0  ;;  %v5747_v37 = vld [vmem:[#allocation9_spill] sm:$0xff] }
 0x5de   : > { %3223 = vxpose.xlu1.b32.start [1/16] (narrow) %v3175_v47, 8  ;;  %3191 = vxpose.xlu0.b32.start [1/16] (narrow) %v3159_v36, 8  ;;  %v3100_v27 = vmul.f32 %v5531_v56, %v5369_v19  ;;  %v3116_v60 = vmul.f32 %v5531_v56, %v5467_v16  ;;  %v3131_v52 = vadd.f32 %v3099_v20, %v5739_v1  ;;  %v5742_v19 = vld [vmem:[#allocation19_spill] sm:$0xff] }
 0x5df   : > { %v3147_v43 = vadd.f32 %v3115_v21, %v5740_v38  ;;  %v3162_v15 = vmax.f32 %v3130_v57, 0.0  ;;  %v3178_v63 = vmax.f32 %v3146_v9, 0.0  ;;  %v3101_v31 = vmul.f32 %v5531_v56, %v5375_v5  ;;  %v5744_v5 = vld [vmem:[#allocation20_spill] sm:$0xff]  ;;  %v5749_v21 = vld [vmem:[#allocation10_spill] sm:$0xff] }
 0x5e0   : > { %v3117_v49 = vmul.f32 %v5531_v56, %v5473_v29  ;;  %v3132_v50 = vadd.f32 %v3100_v27, %v5741_v61  ;;  %v3148_v35 = vadd.f32 %v3116_v60, %v5742_v19  ;;  %v3163_v40 = vmax.f32 %v3131_v52, 0.0  ;;  %v5751_v27 = vld [vmem:[#allocation11_spill] sm:$0xff]  ;;  %v5755_v19 = vld [vmem:[#allocation13_spill] sm:$0xff] }
 0x5e1   : > { %v3179_v16 = vmax.f32 %v3147_v43, 0.0  ;;  %v3102_v44 = vmul.f32 %v5531_v56, %v5382_v3  ;;  %v3118_v34 = vmul.f32 %v5531_v56, %v5480_v54  ;;  %v3133_v8 = vadd.f32 %v3101_v31, %v5743_v22  ;;  %v5746_v3 = vld [vmem:[#allocation21_spill] sm:$0xff]  ;;  %v5757_v22 = vld [vmem:[#allocation14_spill] sm:$0xff] }
 0x5e2   : > { %3224 = vxpose.xlu1.b32.cont [2/16] (narrow) %v3176_v0, 8  ;;  %3192 = vxpose.xlu0.b32.cont [2/16] (narrow) %v3160_v14, 8  ;;  %v3149_v47 = vadd.f32 %v3117_v49, %v5744_v5  ;;  %v3164_v53 = vmax.f32 %v3132_v50, 0.0  ;;  %v3180_v29 = vmax.f32 %v3148_v35, 0.0  ;;  %v3103_v10 = vmul.f32 %v5531_v56, %v5385_v45  ;;  %v5748_v45 = vld [vmem:[#allocation22_spill] sm:$0xff] }
 0x5e3   : > { %v3119_v12 = vmul.f32 %v5531_v56, %v5483_v42  ;;  %v3134_v23 = vadd.f32 %v3102_v44, %v5745_v30  ;;  %v3150_v58 = vadd.f32 %v3118_v34, %v5746_v3  ;;  %v3165_v13 = vmax.f32 %v3133_v8, 0.0  ;;  %v5761_v3 = vld [vmem:[#allocation16_spill] sm:$0xff] }
 0x5e4   : > { %v3181_v54 = vmax.f32 %v3149_v47, 0.0  ;;  %v3104_v36 = vmul.f32 %v5531_v56, %v5393_v48  ;;  %v3120_v33 = vmul.f32 %v5531_v56, %v5491_v46  ;;  %v3135_v18 = vadd.f32 %v3103_v10, %v5747_v37  ;;  %v5750_v48 = vld [vmem:[#allocation23_spill] sm:$0xff] }
 0x5e5   : > { %v3151_v26 = vadd.f32 %v3119_v12, %v5748_v45  ;;  %v3166_v14 = vmax.f32 %v3134_v23, 0.0  ;;  %v3182_v42 = vmax.f32 %v3150_v58, 0.0  ;;  %v3105_v0 = vmul.f32 %v5531_v56, %v5399_v25  ;;  %v5752_v25 = vld [vmem:[#allocation24_spill] sm:$0xff]  ;;  %v5759_v10 = vld [vmem:[#allocation15_spill] sm:$0xff] }
 0x5e6   : > { %3225 = vxpose.xlu1.b32.cont [3/16] (narrow) %v3177_v24, 8  ;;  %3193 = vxpose.xlu0.b32.cont [3/16] (narrow) %v3161_v39, 8  ;;  %v3121_v20 = vmul.f32 %v5531_v56, %v5497_v4  ;;  %v3136_v57 = vadd.f32 %v3104_v36, %v5749_v21  ;;  %v3152_v62 = vadd.f32 %v3120_v33, %v5750_v48  ;;  %v3167_v9 = vmax.f32 %v3135_v18, 0.0 }
 0x5e7   : > { %v3183_v46 = vmax.f32 %v3151_v26, 0.0  ;;  %v3106_v39 = vmul.f32 %v5531_v56, %v5406_v28  ;;  %v3122_v24 = vmul.f32 %v5531_v56, %v5503_v51  ;;  %v3137_v60 = vadd.f32 %v3105_v0, %v5751_v27  ;;  %v5754_v28 = vld [vmem:[#allocation25_spill] sm:$0xff] }
 0x5e8   : > { %v3153_v1 = vadd.f32 %v3121_v20, %v5752_v25  ;;  %v3168_v52 = vmax.f32 %v3136_v57, 0.0  ;;  %v3184_v4 = vmax.f32 %v3152_v62, 0.0  ;;  %v3107_v38 = vmul.f32 %v5531_v56, %v5409_v7  ;;  %v5756_v7 = vld [vmem:[#allocation26_spill] sm:$0xff] }
 0x5e9   : > { %v3123_v43 = vmul.f32 %v5531_v56, %v5510_v17  ;;  %v3154_v31 = vadd.f32 %v3122_v24, %v5754_v28  ;;  %v3169_v49 = vmax.f32 %v3137_v60, 0.0  ;;  %v3108_v61 = vmul.f32 %v5531_v56, %v5417_v55  ;;  %v5758_v55 = vld [vmem:[#allocation27_spill] sm:$0xff] }
 0x5ea   : > { %3226 = vxpose.xlu1.b32.cont [4/16] (narrow) %v3178_v63, 8  ;;  %3194 = vxpose.xlu0.b32.cont [4/16] (narrow) %v3162_v15, 8  ;;  %v5753_v15 = vld [vmem:[#allocation12_spill] sm:$0xff]  ;;  %v3185_v51 = vmax.f32 %v3153_v1, 0.0  ;;  %v3124_v50 = vmul.f32 %v5531_v56, %v5520_v6  ;;  %v3139_v35 = vadd.f32 %v3107_v38, %v5755_v19  ;;  %v3109_v44 = vmul.f32 %v5531_v56, %v5424_v41 }
 0x5eb   : > { %v3138_v63 = vadd.f32 %v3106_v39, %v5753_v15  ;;  %v3186_v17 = vmax.f32 %v3154_v31, 0.0  ;;  %v3125_v34 = vmul.f32 %v5531_v56, %v5515_v32  ;;  %v3140_v8 = vadd.f32 %v3108_v61, %v5757_v22  ;;  %v5760_v41 = vld [vmem:[#allocation28_spill] sm:$0xff] }
 0x5ec   : > { %v3156_v5 = vadd.f32 %v3124_v50, %v5758_v55  ;;  %v3171_v47 = vmax.f32 %v3139_v35, 0.0  ;;  %v3141_v12 = vadd.f32 %v3109_v44, %v5759_v10 }
 0x5ed   : > { %v3157_v30 = vadd.f32 %v3125_v34, %v5760_v41  ;;  %v3172_v32 = vmax.f32 %v3140_v8, 0.0 }
 0x5ee   : > { %3227 = vxpose.xlu1.b32.cont [5/16] (narrow) %v3179_v16, 8  ;;  %3195 = vxpose.xlu0.b32.cont [5/16] (narrow) %v3163_v40, 8  ;;  %v3155_v40 = vadd.f32 %v3123_v43, %v5756_v7  ;;  %v3170_v16 = vmax.f32 %v3138_v63, 0.0  ;;  %v3188_v23 = vmax.f32 %v3156_v5, 0.0  ;;  %v3173_v36 = vmax.f32 %v3141_v12, 0.0 }
 0x5ef   : > { %v3189_v33 = vmax.f32 %v3157_v30, 0.0 }
 0x5f0   : > { %v3187_v6 = vmax.f32 %v3155_v40, 0.0 }
 0x5f2   : > { %3228 = vxpose.xlu1.b32.cont [6/16] (narrow) %v3180_v29, 8  ;;  %3196 = vxpose.xlu0.b32.cont [6/16] (narrow) %v3164_v53, 8  ;;  %v3110_v53 = vmul.f32 %v5531_v56, %v5432_v59  ;;  %v3126_v29 = vmul.f32 %v5531_v56, %v5523_v11 }
 0x5f4   : > { %v3142_v58 = vadd.f32 %v3110_v53, %v5761_v3 }
 0x5f6   : > { %3229 = vxpose.xlu1.b32.cont [7/16] (narrow) %v3181_v54, 8  ;;  %3197 = vxpose.xlu0.b32.cont [7/16] (narrow) %v3165_v13, 8  ;;  %v5762_v13 = vld [vmem:[#allocation29_spill] sm:$0xff]  ;;  %v3174_v59 = vmax.f32 %v3142_v58, 0.0 }
 0x5f7   : > { %v3158_v54 = vadd.f32 %v3126_v29, %v5762_v13 }
 0x5f9   : > { %v3190_v11 = vmax.f32 %v3158_v54, 0.0 }
 0x5fa   : > { %3230 = vxpose.xlu1.b32.cont [8/16] (narrow) %v3182_v42, 8  ;;  %3198 = vxpose.xlu0.b32.cont [8/16] (narrow) %v3166_v14, 8 }
 0x5fe   : > { %3231 = vxpose.xlu1.b32.cont [9/16] (narrow) %v3183_v46, 8  ;;  %3199 = vxpose.xlu0.b32.cont [9/16] (narrow) %v3167_v9, 8 }
 0x602   : > { %3232 = vxpose.xlu1.b32.cont [10/16] (narrow) %v3184_v4, 8  ;;  %3200 = vxpose.xlu0.b32.cont [10/16] (narrow) %v3168_v52, 8 }
 0x606   : > { %3233 = vxpose.xlu1.b32.cont [11/16] (narrow) %v3185_v51, 8  ;;  %3201 = vxpose.xlu0.b32.cont [11/16] (narrow) %v3169_v49, 8 }
 0x60a   : > { %3234 = vxpose.xlu1.b32.cont [12/16] (narrow) %v3186_v17, 8  ;;  %3202 = vxpose.xlu0.b32.cont [12/16] (narrow) %v3170_v16, 8 }
 0x60e   : > { %3235 = vxpose.xlu1.b32.cont [13/16] (narrow) %v3187_v6, 8  ;;  %3203 = vxpose.xlu0.b32.cont [13/16] (narrow) %v3171_v47, 8 }
 0x612   : > { %3236 = vxpose.xlu1.b32.cont [14/16] (narrow) %v3188_v23, 8  ;;  %3204 = vxpose.xlu0.b32.cont [14/16] (narrow) %v3172_v32, 8 }
 0x616   : > { %3237 = vxpose.xlu1.b32.cont [15/16] (narrow) %v3189_v33, 8  ;;  %3205 = vxpose.xlu0.b32.cont [15/16] (narrow) %v3173_v36, 8 }
 0x61a   : > { %3238 = vxpose.xlu1.b32.end [16/16] (narrow) %v3190_v11, 8  ;;  %3206 = vxpose.xlu0.b32.end [16/16] (narrow) %v3174_v59, 8 }
 0x643   : > { %3563 = vset.pattern.permute.xlu0 %v3651_v2 }
 0x65e   : > { %v3239_v56 = vpop.trf.xlu1  ;;  %v3207_v37 = vpop.trf.xlu0 }
 0x65f   : > { %v3257_v18 = vcombine.low %v3207_v37, %v3239_v56 }
 0x661   : > { %3259 = vst [vmem:[%s298_s21] sm:$0xff] %v3257_v18 }
 0x662   : > { %3590 = shalt.err (!%p3587_p3)
}
 0x663   : > { %s3591_s13 = scalar_lea.hbm %s5635_s25, 128  ;;  %s3595_s19 = scalar_lea.hbm %s5685_s8, 256 }
 0x664   : > { %p3592_p4 = scmp.ne.s32.totalorder %s5635_s25, %s3591_s13  ;;  %p3596_p9 = scmp.lt.u32.totalorder %s5635_s25, %s5685_s8 }
 0x665   : > { %p3597_p10 = scmp.lt.u32.totalorder %s3595_s19, %s3591_s13  ;;  %p3599_p12 = scmp.lt.u32.totalorder %s3591_s13, %s5635_s25 }
 0x666   : > { %p3593_p7 = pnand %p3592_p4, %p3740_p5 }
 0x667   : > { %p3598_p11 = por %p3597_p10, %p3596_p9 }
 0x668   : > { %p3594_p8 = pneg %p3593_p7 }
 0x669   : > { %p3600_p13 = por %p3599_p12, %p3598_p11 }
 0x66b   : > { %p3601_p0 = pnand %p3600_p13, %p3594_p8 }
 0x66d   : > { %3604 = shalt.err (!%p3601_p0)
}
 0x66e   : > { %3506 = dma.vmem_to_hbm [thread:$0]  (%p3740_p5), %s5637_s22, 128, %s5635_s25, %s3261_s26  }
 0x66f PF: > { %p3512_p1 = scmp.ge.s32.totalorder %s3639_s30, 2  ;;  %s3287_s24 = sand.u32 1, %s3627_s27  }
 0x670   : > { %s3288_s10 = scalar_lea.sflag [#allocation3], %s3287_s24 }
 0x671   : > { %p3509_p2 = pnand %p3512_p1, %p3744_p6 }
 0x673   : > { %3622 = dma.done.wait (!%p3509_p2), %s3288_s10, 128  }
 0x674   : > { %3624 = vsyncadd (!%p3509_p2), %s3288_s10, 4294967168  ;;  %p18_p3 = scmp.ge.s32.totalorder %s3727_s11, 4   ;;  %s5763_s27 = smov %s3631_s28 }
 0x675   : > { %s5764_s28 = smov %s3635_s29  ;;  %s5765_s29 = smov %s3738_s14 }
 0x676   : > { %s5766_s30 = smov %s3727_s11  ;;  %20 = sbr.rel (!%p18_p3) target bundleno = 3 (0x3), region = 87 }
 0x67d   :  { %3293 = vsyncpa [#allocation3], 1 }
 0x67e   :  { %3295 = vsyncpa [#allocation3 + $0x1], 1 }

</bundles_post_ra>
